<compile_context>
chip_gen: v7x
topology: tpu7x:2x2x1
jax: 0.10.0
libtpu: 0.0.40
codegen_flags: <defaults>
</compile_context>

<pallas_src>
import functools

import jax
import jax.numpy as jnp
from jax.experimental import pallas as pl
from jax.experimental.pallas import tpu as pltpu


def residual_block_kernel(x_ref, w1_ref, b1_ref, w2_ref, b2_ref, o_ref, pad_ref,
                          *, H, W, C, eps, compute_dtype):
    """One batch element per grid step.

    x_ref:   (1, H, W, C)   input feature map (channels on the lane axis)
    w*_ref:  (9, C, C)      3x3 conv weights, tap-major, each tap laid out (ci, co)
    b*_ref:  (1, C)         conv biases (f32)
    o_ref:   (1, H, W, C)   output
    pad_ref: VMEM scratch (H+2, W+2, C), reflection-padded image, reused by
             both convolutions.
    """
    x = x_ref[0]                                            # (H, W, C)

    def reflect_pad(img):
        # Interior.
        pad_ref[1:H + 1, 1:W + 1, :] = img
        # Top / bottom rows: ReflectionPad2d(1) -> padded row 0 = row 1,
        # padded row H+1 = row H-2 (reflection without edge repeat).
        pad_ref[0:1, 1:W + 1, :] = img[1:2, :, :]
        pad_ref[H + 1:H + 2, 1:W + 1, :] = img[H - 2:H - 1, :, :]
        # Left / right columns (corners included): copy already-padded columns.
        pad_ref[:, 0:1, :] = pad_ref[:, 2:3, :]
        pad_ref[:, W + 1:W + 2, :] = pad_ref[:, W - 1:W, :]

    def conv3x3(w_ref, b_ref):
        # 3x3 conv == 9 MXU matmuls (H*W, C) @ (C, C), accumulated in f32.
        acc = None
        for kh in range(3):
            for kw in range(3):
                window = pad_ref[kh:kh + H, kw:kw + W, :].reshape(H * W, C)
                contrib = jnp.dot(window, w_ref[kh * 3 + kw],
                                  preferred_element_type=jnp.float32)
                acc = contrib if acc is None else acc + contrib
        return acc + b_ref[...].astype(jnp.float32)          # (H*W, C) f32

    def instance_norm(t):
        # Per-channel stats over all spatial positions (axis 0), f32 math.
        mean = jnp.mean(t, axis=0, keepdims=True)
        centered = t - mean
        var = jnp.mean(centered * centered, axis=0, keepdims=True)
        return centered * jax.lax.rsqrt(var + eps)

    # conv1 -> InstanceNorm -> ReLU
    reflect_pad(x.astype(compute_dtype))
    h = jnp.maximum(instance_norm(conv3x3(w1_ref, b1_ref)), 0.0)

    # conv2 -> InstanceNorm
    reflect_pad(h.reshape(H, W, C).astype(compute_dtype))
    h = instance_norm(conv3x3(w2_ref, b2_ref))

    # Residual add; one contiguous lane-dense store per image.
    o_ref[0] = (x.astype(jnp.float32) + h.reshape(H, W, C)).astype(o_ref.dtype)


@functools.partial(jax.jit, static_argnames=("eps", "compute_dtype"))
def residual_block_pallas(x_nchw, w1, b1, w2, b2, *, eps=1e-5,
                          compute_dtype=jnp.float32):
    """x_nchw: (B, C, H, W) f32. w*: (C_out, C_in, 3, 3) PyTorch layout. b*: (C,)."""
    B, C, H, W = x_nchw.shape

    # NCHW -> NHWC so channels sit on the lane axis.
    x_nhwc = jnp.transpose(x_nchw, (0, 2, 3, 1))                      # (B, H, W, C)

    # (C_out, C_in, kh, kw) -> (kh, kw, C_in, C_out) -> (9, C_in, C_out)
    w1_t = jnp.transpose(w1, (2, 3, 1, 0)).reshape(9, C, C).astype(compute_dtype)
    w2_t = jnp.transpose(w2, (2, 3, 1, 0)).reshape(9, C, C).astype(compute_dtype)
    b1_2 = b1.reshape(1, C).astype(jnp.float32)
    b2_2 = b2.reshape(1, C).astype(jnp.float32)

    kernel = functools.partial(residual_block_kernel, H=H, W=W, C=C, eps=eps,
                               compute_dtype=compute_dtype)

    out_nhwc = pl.pallas_call(
        kernel,
        out_shape=jax.ShapeDtypeStruct((B, H, W, C), x_nchw.dtype),
        grid_spec=pltpu.PrefetchScalarGridSpec(
            num_scalar_prefetch=0,
            grid=(B,),
            in_specs=[
                pl.BlockSpec((1, H, W, C), lambda b: (b, 0, 0, 0)),   # x
                pl.BlockSpec((9, C, C), lambda b: (0, 0, 0)),         # conv1 W
                pl.BlockSpec((1, C), lambda b: (0, 0)),               # conv1 b
                pl.BlockSpec((9, C, C), lambda b: (0, 0, 0)),         # conv2 W
                pl.BlockSpec((1, C), lambda b: (0, 0)),               # conv2 b
            ],
            out_specs=pl.BlockSpec((1, H, W, C), lambda b: (b, 0, 0, 0)),
            scratch_shapes=[pltpu.VMEM((H + 2, W + 2, C), compute_dtype)],
        ),
        compiler_params=pltpu.CompilerParams(
            dimension_semantics=("parallel",),
            vmem_limit_bytes=48 * 1024 * 1024),
    )(x_nhwc, w1_t, b1_2, w2_t, b2_2)

    # NHWC -> NCHW
    return jnp.transpose(out_nhwc, (0, 3, 1, 2))


def residual_block_ref(x, w1, b1, w2, b2, eps=1e-5):
    """Pure-JAX reference matching the PyTorch forward exactly (f32 precision)."""
    def conv3x3_reflect(t, w, b):
        tp = jnp.pad(t, ((0, 0), (0, 0), (1, 1), (1, 1)), mode="reflect")
        out = jax.lax.conv_general_dilated(
            tp, w, window_strides=(1, 1), padding="VALID",
            dimension_numbers=("NCHW", "OIHW", "NCHW"),
            precision=jax.lax.Precision.HIGHEST)
        return out + b[None, :, None, None]

    def inorm(t):
        mean = jnp.mean(t, axis=(2, 3), keepdims=True)
        var = jnp.var(t, axis=(2, 3), keepdims=True)
        return (t - mean) * jax.lax.rsqrt(var + eps)

    h = jax.nn.relu(inorm(conv3x3_reflect(x, w1, b1)))
    h = inorm(conv3x3_reflect(h, w2, b2))
    return x + h


if __name__ == "__main__":
    B, C, H, W = 2, 32, 16, 16

    key = jax.random.PRNGKey(0)
    kx, kw1, kb1, kw2, kb2 = jax.random.split(key, 5)
    x = jax.random.normal(kx, (B, C, H, W), dtype=jnp.float32)
    w1 = jax.random.normal(kw1, (C, C, 3, 3), dtype=jnp.float32) * 0.1
    b1 = jax.random.normal(kb1, (C,), dtype=jnp.float32) * 0.1
    w2 = jax.random.normal(kw2, (C, C, 3, 3), dtype=jnp.float32) * 0.1
    b2 = jax.random.normal(kb2, (C,), dtype=jnp.float32) * 0.1

    ref = residual_block_ref(x, w1, b1, w2, b2)

    # f32 path (strict check).
    out = residual_block_pallas(x, w1, b1, w2, b2, compute_dtype=jnp.float32)
    out = jax.block_until_ready(out)
    assert out.shape == (B, C, H, W)
    err_f32 = float(jnp.max(jnp.abs(out - ref)))
    assert jnp.allclose(out, ref, atol=1e-3, rtol=1e-3), err_f32

    # bf16 MXU path (production-perf configuration on v6e/v7x): loose check.
    out_bf16 = jax.block_until_ready(
        residual_block_pallas(x, w1, b1, w2, b2, compute_dtype=jnp.bfloat16))
    err_bf16 = float(jnp.max(jnp.abs(out_bf16 - ref)))
    assert err_bf16 < 0.15, err_bf16

    print("KERNEL_OK")
</pallas_src>

<mosaic_0001>
module attributes {stable_mosaic.version = 11 : i64} {
  func.func @residual_block_kernel(%arg0: i32, %arg1: memref<1x16x16x32xf32, #tpu.memory_space<vmem>>, %arg2: memref<9x32x32xf32, #tpu.memory_space<vmem>>, %arg3: memref<1x32xf32, #tpu.memory_space<vmem>>, %arg4: memref<9x32x32xf32, #tpu.memory_space<vmem>>, %arg5: memref<1x32xf32, #tpu.memory_space<vmem>>, %arg6: memref<1x16x16x32xf32, #tpu.memory_space<vmem>>, %arg7: memref<18x18x32xf32, #tpu.memory_space<vmem>>) attributes {dimension_semantics = [#tpu.dimension_semantics<parallel>], iteration_bounds = array<i64: 2>, scalar_prefetch = 0 : i64, scratch_operands = 1 : i64, tpu.core_type = #tpu.core_type<tc>, window_params = [{transform_indices = @transform_0, window_bounds = array<i64: 1, 16, 16, 32>}, {pipeline_mode = #tpu.pipeline_mode<synchronous>, transform_indices = @transform_1, window_bounds = array<i64: 9, 32, 32>}, {pipeline_mode = #tpu.pipeline_mode<synchronous>, transform_indices = @transform_2, window_bounds = array<i64: 1, 32>}, {pipeline_mode = #tpu.pipeline_mode<synchronous>, transform_indices = @transform_3, window_bounds = array<i64: 9, 32, 32>}, {pipeline_mode = #tpu.pipeline_mode<synchronous>, transform_indices = @transform_4, window_bounds = array<i64: 1, 32>}, {transform_indices = @transform_5, window_bounds = array<i64: 1, 16, 16, 32>}]} {
    %c0 = arith.constant 0 : index
    %c0_0 = arith.constant 0 : index
    %c0_1 = arith.constant 0 : index
    %c0_2 = arith.constant 0 : index
    %0 = vector.load %arg1[%c0, %c0_0, %c0_1, %c0_2] : memref<1x16x16x32xf32, #tpu.memory_space<vmem>>, vector<1x16x16x32xf32>
    %1 = vector.shape_cast %0 : vector<1x16x16x32xf32> to vector<16x16x32xf32>
    %c1 = arith.constant 1 : index
    %c1_3 = arith.constant 1 : index
    %c0_4 = arith.constant 0 : index
    %2 = vector.load %arg7[%c1, %c1_3, %c0_4] : memref<18x18x32xf32, #tpu.memory_space<vmem>>, vector<16x16x32xf32>
    tpu.vector_store %arg7[%c1, %c1_3, %c0_4], %1 {strides = array<i32>} : memref<18x18x32xf32, #tpu.memory_space<vmem>>, vector<16x16x32xf32>,
    %3 = vector.extract_strided_slice %1 {offsets = [1, 0, 0], sizes = [1, 16, 32], strides = [1, 1, 1]} : vector<16x16x32xf32> to vector<1x16x32xf32>
    %c0_5 = arith.constant 0 : index
    %c1_6 = arith.constant 1 : index
    %c0_7 = arith.constant 0 : index
    %4 = vector.load %arg7[%c0_5, %c1_6, %c0_7] : memref<18x18x32xf32, #tpu.memory_space<vmem>>, vector<1x16x32xf32>
    tpu.vector_store %arg7[%c0_5, %c1_6, %c0_7], %3 {strides = array<i32>} : memref<18x18x32xf32, #tpu.memory_space<vmem>>, vector<1x16x32xf32>,
    %5 = vector.extract_strided_slice %1 {offsets = [14, 0, 0], sizes = [1, 16, 32], strides = [1, 1, 1]} : vector<16x16x32xf32> to vector<1x16x32xf32>
    %c17 = arith.constant 17 : index
    %c1_8 = arith.constant 1 : index
    %c0_9 = arith.constant 0 : index
    %6 = vector.load %arg7[%c17, %c1_8, %c0_9] : memref<18x18x32xf32, #tpu.memory_space<vmem>>, vector<1x16x32xf32>
    tpu.vector_store %arg7[%c17, %c1_8, %c0_9], %5 {strides = array<i32>} : memref<18x18x32xf32, #tpu.memory_space<vmem>>, vector<1x16x32xf32>,
    %c0_10 = arith.constant 0 : index
    %c2 = arith.constant 2 : index
    %c0_11 = arith.constant 0 : index
    %7 = vector.load %arg7[%c0_10, %c2, %c0_11] : memref<18x18x32xf32, #tpu.memory_space<vmem>>, vector<18x1x32xf32>
    %c0_12 = arith.constant 0 : index
    %c0_13 = arith.constant 0 : index
    %c0_14 = arith.constant 0 : index
    %8 = vector.load %arg7[%c0_12, %c0_13, %c0_14] : memref<18x18x32xf32, #tpu.memory_space<vmem>>, vector<18x1x32xf32>
    tpu.vector_store %arg7[%c0_12, %c0_13, %c0_14], %7 {strides = array<i32>} : memref<18x18x32xf32, #tpu.memory_space<vmem>>, vector<18x1x32xf32>,
    %c0_15 = arith.constant 0 : index
    %c15 = arith.constant 15 : index
    %c0_16 = arith.constant 0 : index
    %9 = vector.load %arg7[%c0_15, %c15, %c0_16] : memref<18x18x32xf32, #tpu.memory_space<vmem>>, vector<18x1x32xf32>
    %c0_17 = arith.constant 0 : index
    %c17_18 = arith.constant 17 : index
    %c0_19 = arith.constant 0 : index
    %10 = vector.load %arg7[%c0_17, %c17_18, %c0_19] : memref<18x18x32xf32, #tpu.memory_space<vmem>>, vector<18x1x32xf32>
    tpu.vector_store %arg7[%c0_17, %c17_18, %c0_19], %9 {strides = array<i32>} : memref<18x18x32xf32, #tpu.memory_space<vmem>>, vector<18x1x32xf32>,
    %c0_20 = arith.constant 0 : index
    %c0_21 = arith.constant 0 : index
    %c0_22 = arith.constant 0 : index
    %11 = vector.load %arg7[%c0_20, %c0_21, %c0_22] : memref<18x18x32xf32, #tpu.memory_space<vmem>>, vector<16x16x32xf32>
    %12 = vector.shape_cast %11 : vector<16x16x32xf32> to vector<256x32xf32>
    %c0_23 = arith.constant 0 : index
    %c0_24 = arith.constant 0 : index
    %c0_25 = arith.constant 0 : index
    %13 = vector.load %arg2[%c0_23, %c0_24, %c0_25] : memref<9x32x32xf32, #tpu.memory_space<vmem>>, vector<1x32x32xf32>
    %14 = vector.shape_cast %13 : vector<1x32x32xf32> to vector<32x32xf32>
    %cst = arith.constant dense<0.000000e+00> : vector<256x32xf32>
    %15 = tpu.matmul %12, %14, %cst {dimension_numbers = #tpu.dot_dimension_numbers<[1], [0], [0], [1], [0, 0, 1, 1], [], []>} : vector<256x32xf32>, vector<32x32xf32>, vector<256x32xf32> -> vector<256x32xf32>
    %c0_26 = arith.constant 0 : index
    %c1_27 = arith.constant 1 : index
    %c0_28 = arith.constant 0 : index
    %16 = vector.load %arg7[%c0_26, %c1_27, %c0_28] : memref<18x18x32xf32, #tpu.memory_space<vmem>>, vector<16x16x32xf32>
    %17 = vector.shape_cast %16 : vector<16x16x32xf32> to vector<256x32xf32>
    %c1_29 = arith.constant 1 : index
    %c0_30 = arith.constant 0 : index
    %c0_31 = arith.constant 0 : index
    %18 = vector.load %arg2[%c1_29, %c0_30, %c0_31] : memref<9x32x32xf32, #tpu.memory_space<vmem>>, vector<1x32x32xf32>
    %19 = vector.shape_cast %18 : vector<1x32x32xf32> to vector<32x32xf32>
    %cst_32 = arith.constant dense<0.000000e+00> : vector<256x32xf32>
    %20 = tpu.matmul %17, %19, %cst_32 {dimension_numbers = #tpu.dot_dimension_numbers<[1], [0], [0], [1], [0, 0, 1, 1], [], []>} : vector<256x32xf32>, vector<32x32xf32>, vector<256x32xf32> -> vector<256x32xf32>
    %21 = arith.addf %15, %20 : vector<256x32xf32>
    %c0_33 = arith.constant 0 : index
    %c2_34 = arith.constant 2 : index
    %c0_35 = arith.constant 0 : index
    %22 = vector.load %arg7[%c0_33, %c2_34, %c0_35] : memref<18x18x32xf32, #tpu.memory_space<vmem>>, vector<16x16x32xf32>
    %23 = vector.shape_cast %22 : vector<16x16x32xf32> to vector<256x32xf32>
    %c2_36 = arith.constant 2 : index
    %c0_37 = arith.constant 0 : index
    %c0_38 = arith.constant 0 : index
    %24 = vector.load %arg2[%c2_36, %c0_37, %c0_38] : memref<9x32x32xf32, #tpu.memory_space<vmem>>, vector<1x32x32xf32>
    %25 = vector.shape_cast %24 : vector<1x32x32xf32> to vector<32x32xf32>
    %cst_39 = arith.constant dense<0.000000e+00> : vector<256x32xf32>
    %26 = tpu.matmul %23, %25, %cst_39 {dimension_numbers = #tpu.dot_dimension_numbers<[1], [0], [0], [1], [0, 0, 1, 1], [], []>} : vector<256x32xf32>, vector<32x32xf32>, vector<256x32xf32> -> vector<256x32xf32>
    %27 = arith.addf %21, %26 : vector<256x32xf32>
    %c1_40 = arith.constant 1 : index
    %c0_41 = arith.constant 0 : index
    %c0_42 = arith.constant 0 : index
    %28 = vector.load %arg7[%c1_40, %c0_41, %c0_42] : memref<18x18x32xf32, #tpu.memory_space<vmem>>, vector<16x16x32xf32>
    %29 = vector.shape_cast %28 : vector<16x16x32xf32> to vector<256x32xf32>
    %c3 = arith.constant 3 : index
    %c0_43 = arith.constant 0 : index
    %c0_44 = arith.constant 0 : index
    %30 = vector.load %arg2[%c3, %c0_43, %c0_44] : memref<9x32x32xf32, #tpu.memory_space<vmem>>, vector<1x32x32xf32>
    %31 = vector.shape_cast %30 : vector<1x32x32xf32> to vector<32x32xf32>
    %cst_45 = arith.constant dense<0.000000e+00> : vector<256x32xf32>
    %32 = tpu.matmul %29, %31, %cst_45 {dimension_numbers = #tpu.dot_dimension_numbers<[1], [0], [0], [1], [0, 0, 1, 1], [], []>} : vector<256x32xf32>, vector<32x32xf32>, vector<256x32xf32> -> vector<256x32xf32>
    %33 = arith.addf %27, %32 : vector<256x32xf32>
    %c1_46 = arith.constant 1 : index
    %c1_47 = arith.constant 1 : index
    %c0_48 = arith.constant 0 : index
    %34 = vector.load %arg7[%c1_46, %c1_47, %c0_48] : memref<18x18x32xf32, #tpu.memory_space<vmem>>, vector<16x16x32xf32>
    %35 = vector.shape_cast %34 : vector<16x16x32xf32> to vector<256x32xf32>
    %c4 = arith.constant 4 : index
    %c0_49 = arith.constant 0 : index
    %c0_50 = arith.constant 0 : index
    %36 = vector.load %arg2[%c4, %c0_49, %c0_50] : memref<9x32x32xf32, #tpu.memory_space<vmem>>, vector<1x32x32xf32>
    %37 = vector.shape_cast %36 : vector<1x32x32xf32> to vector<32x32xf32>
    %cst_51 = arith.constant dense<0.000000e+00> : vector<256x32xf32>
    %38 = tpu.matmul %35, %37, %cst_51 {dimension_numbers = #tpu.dot_dimension_numbers<[1], [0], [0], [1], [0, 0, 1, 1], [], []>} : vector<256x32xf32>, vector<32x32xf32>, vector<256x32xf32> -> vector<256x32xf32>
    %39 = arith.addf %33, %38 : vector<256x32xf32>
    %c1_52 = arith.constant 1 : index
    %c2_53 = arith.constant 2 : index
    %c0_54 = arith.constant 0 : index
    %40 = vector.load %arg7[%c1_52, %c2_53, %c0_54] : memref<18x18x32xf32, #tpu.memory_space<vmem>>, vector<16x16x32xf32>
    %41 = vector.shape_cast %40 : vector<16x16x32xf32> to vector<256x32xf32>
    %c5 = arith.constant 5 : index
    %c0_55 = arith.constant 0 : index
    %c0_56 = arith.constant 0 : index
    %42 = vector.load %arg2[%c5, %c0_55, %c0_56] : memref<9x32x32xf32, #tpu.memory_space<vmem>>, vector<1x32x32xf32>
    %43 = vector.shape_cast %42 : vector<1x32x32xf32> to vector<32x32xf32>
    %cst_57 = arith.constant dense<0.000000e+00> : vector<256x32xf32>
    %44 = tpu.matmul %41, %43, %cst_57 {dimension_numbers = #tpu.dot_dimension_numbers<[1], [0], [0], [1], [0, 0, 1, 1], [], []>} : vector<256x32xf32>, vector<32x32xf32>, vector<256x32xf32> -> vector<256x32xf32>
    %45 = arith.addf %39, %44 : vector<256x32xf32>
    %c2_58 = arith.constant 2 : index
    %c0_59 = arith.constant 0 : index
    %c0_60 = arith.constant 0 : index
    %46 = vector.load %arg7[%c2_58, %c0_59, %c0_60] : memref<18x18x32xf32, #tpu.memory_space<vmem>>, vector<16x16x32xf32>
    %47 = vector.shape_cast %46 : vector<16x16x32xf32> to vector<256x32xf32>
    %c6 = arith.constant 6 : index
    %c0_61 = arith.constant 0 : index
    %c0_62 = arith.constant 0 : index
    %48 = vector.load %arg2[%c6, %c0_61, %c0_62] : memref<9x32x32xf32, #tpu.memory_space<vmem>>, vector<1x32x32xf32>
    %49 = vector.shape_cast %48 : vector<1x32x32xf32> to vector<32x32xf32>
    %cst_63 = arith.constant dense<0.000000e+00> : vector<256x32xf32>
    %50 = tpu.matmul %47, %49, %cst_63 {dimension_numbers = #tpu.dot_dimension_numbers<[1], [0], [0], [1], [0, 0, 1, 1], [], []>} : vector<256x32xf32>, vector<32x32xf32>, vector<256x32xf32> -> vector<256x32xf32>
    %51 = arith.addf %45, %50 : vector<256x32xf32>
    %c2_64 = arith.constant 2 : index
    %c1_65 = arith.constant 1 : index
    %c0_66 = arith.constant 0 : index
    %52 = vector.load %arg7[%c2_64, %c1_65, %c0_66] : memref<18x18x32xf32, #tpu.memory_space<vmem>>, vector<16x16x32xf32>
    %53 = vector.shape_cast %52 : vector<16x16x32xf32> to vector<256x32xf32>
    %c7 = arith.constant 7 : index
    %c0_67 = arith.constant 0 : index
    %c0_68 = arith.constant 0 : index
    %54 = vector.load %arg2[%c7, %c0_67, %c0_68] : memref<9x32x32xf32, #tpu.memory_space<vmem>>, vector<1x32x32xf32>
    %55 = vector.shape_cast %54 : vector<1x32x32xf32> to vector<32x32xf32>
    %cst_69 = arith.constant dense<0.000000e+00> : vector<256x32xf32>
    %56 = tpu.matmul %53, %55, %cst_69 {dimension_numbers = #tpu.dot_dimension_numbers<[1], [0], [0], [1], [0, 0, 1, 1], [], []>} : vector<256x32xf32>, vector<32x32xf32>, vector<256x32xf32> -> vector<256x32xf32>
    %57 = arith.addf %51, %56 : vector<256x32xf32>
    %c2_70 = arith.constant 2 : index
    %c2_71 = arith.constant 2 : index
    %c0_72 = arith.constant 0 : index
    %58 = vector.load %arg7[%c2_70, %c2_71, %c0_72] : memref<18x18x32xf32, #tpu.memory_space<vmem>>, vector<16x16x32xf32>
    %59 = vector.shape_cast %58 : vector<16x16x32xf32> to vector<256x32xf32>
    %c8 = arith.constant 8 : index
    %c0_73 = arith.constant 0 : index
    %c0_74 = arith.constant 0 : index
    %60 = vector.load %arg2[%c8, %c0_73, %c0_74] : memref<9x32x32xf32, #tpu.memory_space<vmem>>, vector<1x32x32xf32>
    %61 = vector.shape_cast %60 : vector<1x32x32xf32> to vector<32x32xf32>
    %cst_75 = arith.constant dense<0.000000e+00> : vector<256x32xf32>
    %62 = tpu.matmul %59, %61, %cst_75 {dimension_numbers = #tpu.dot_dimension_numbers<[1], [0], [0], [1], [0, 0, 1, 1], [], []>} : vector<256x32xf32>, vector<32x32xf32>, vector<256x32xf32> -> vector<256x32xf32>
    %63 = arith.addf %57, %62 : vector<256x32xf32>
    %c0_76 = arith.constant 0 : index
    %c0_77 = arith.constant 0 : index
    %64 = vector.load %arg3[%c0_76, %c0_77] : memref<1x32xf32, #tpu.memory_space<vmem>>, vector<1x32xf32>
    %65 = vector.broadcast %64 : vector<1x32xf32> to vector<256x32xf32>
    %66 = arith.addf %63, %65 : vector<256x32xf32>
    %cst_78 = arith.constant dense<0.000000e+00> : vector<32xf32>
    %67 = vector.multi_reduction <add>, %66, %cst_78 [0] : vector<256x32xf32> to vector<32xf32>
    %68 = vector.shape_cast %67 : vector<32xf32> to vector<1x32xf32>
    %cst_79 = arith.constant 2.560000e+02 : f32
    %69 = vector.broadcast %cst_79 : f32 to vector<1x32xf32>
    %70 = arith.divf %68, %69 : vector<1x32xf32>
    %71 = vector.broadcast %70 : vector<1x32xf32> to vector<256x32xf32>
    %72 = arith.subf %66, %71 : vector<256x32xf32>
    %73 = arith.mulf %72, %72 : vector<256x32xf32>
    %cst_80 = arith.constant dense<0.000000e+00> : vector<32xf32>
    %74 = vector.multi_reduction <add>, %73, %cst_80 [0] : vector<256x32xf32> to vector<32xf32>
    %75 = vector.shape_cast %74 : vector<32xf32> to vector<1x32xf32>
    %cst_81 = arith.constant 2.560000e+02 : f32
    %76 = vector.broadcast %cst_81 : f32 to vector<1x32xf32>
    %77 = arith.divf %75, %76 : vector<1x32xf32>
    %cst_82 = arith.constant 9.99999974E-6 : f32
    %78 = vector.broadcast %cst_82 : f32 to vector<1x32xf32>
    %79 = arith.addf %77, %78 : vector<1x32xf32>
    %80 = math.rsqrt %79 : vector<1x32xf32>
    %81 = vector.broadcast %80 : vector<1x32xf32> to vector<256x32xf32>
    %82 = arith.mulf %72, %81 : vector<256x32xf32>
    %cst_83 = arith.constant 0.000000e+00 : f32
    %83 = vector.broadcast %cst_83 : f32 to vector<256x32xf32>
    %84 = arith.maximumf %82, %83 : vector<256x32xf32>
    %85 = vector.shape_cast %84 : vector<256x32xf32> to vector<16x16x32xf32>
    %c1_84 = arith.constant 1 : index
    %c1_85 = arith.constant 1 : index
    %c0_86 = arith.constant 0 : index
    %86 = vector.load %arg7[%c1_84, %c1_85, %c0_86] : memref<18x18x32xf32, #tpu.memory_space<vmem>>, vector<16x16x32xf32>
    tpu.vector_store %arg7[%c1_84, %c1_85, %c0_86], %85 {strides = array<i32>} : memref<18x18x32xf32, #tpu.memory_space<vmem>>, vector<16x16x32xf32>,
    %87 = vector.extract_strided_slice %85 {offsets = [1, 0, 0], sizes = [1, 16, 32], strides = [1, 1, 1]} : vector<16x16x32xf32> to vector<1x16x32xf32>
    %c0_87 = arith.constant 0 : index
    %c1_88 = arith.constant 1 : index
    %c0_89 = arith.constant 0 : index
    %88 = vector.load %arg7[%c0_87, %c1_88, %c0_89] : memref<18x18x32xf32, #tpu.memory_space<vmem>>, vector<1x16x32xf32>
    tpu.vector_store %arg7[%c0_87, %c1_88, %c0_89], %87 {strides = array<i32>} : memref<18x18x32xf32, #tpu.memory_space<vmem>>, vector<1x16x32xf32>,
    %89 = vector.extract_strided_slice %85 {offsets = [14, 0, 0], sizes = [1, 16, 32], strides = [1, 1, 1]} : vector<16x16x32xf32> to vector<1x16x32xf32>
    %c17_90 = arith.constant 17 : index
    %c1_91 = arith.constant 1 : index
    %c0_92 = arith.constant 0 : index
    %90 = vector.load %arg7[%c17_90, %c1_91, %c0_92] : memref<18x18x32xf32, #tpu.memory_space<vmem>>, vector<1x16x32xf32>
    tpu.vector_store %arg7[%c17_90, %c1_91, %c0_92], %89 {strides = array<i32>} : memref<18x18x32xf32, #tpu.memory_space<vmem>>, vector<1x16x32xf32>,
    %c0_93 = arith.constant 0 : index
    %c2_94 = arith.constant 2 : index
    %c0_95 = arith.constant 0 : index
    %91 = vector.load %arg7[%c0_93, %c2_94, %c0_95] : memref<18x18x32xf32, #tpu.memory_space<vmem>>, vector<18x1x32xf32>
    %c0_96 = arith.constant 0 : index
    %c0_97 = arith.constant 0 : index
    %c0_98 = arith.constant 0 : index
    %92 = vector.load %arg7[%c0_96, %c0_97, %c0_98] : memref<18x18x32xf32, #tpu.memory_space<vmem>>, vector<18x1x32xf32>
    tpu.vector_store %arg7[%c0_96, %c0_97, %c0_98], %91 {strides = array<i32>} : memref<18x18x32xf32, #tpu.memory_space<vmem>>, vector<18x1x32xf32>,
    %c0_99 = arith.constant 0 : index
    %c15_100 = arith.constant 15 : index
    %c0_101 = arith.constant 0 : index
    %93 = vector.load %arg7[%c0_99, %c15_100, %c0_101] : memref<18x18x32xf32, #tpu.memory_space<vmem>>, vector<18x1x32xf32>
    %c0_102 = arith.constant 0 : index
    %c17_103 = arith.constant 17 : index
    %c0_104 = arith.constant 0 : index
    %94 = vector.load %arg7[%c0_102, %c17_103, %c0_104] : memref<18x18x32xf32, #tpu.memory_space<vmem>>, vector<18x1x32xf32>
    tpu.vector_store %arg7[%c0_102, %c17_103, %c0_104], %93 {strides = array<i32>} : memref<18x18x32xf32, #tpu.memory_space<vmem>>, vector<18x1x32xf32>,
    %c0_105 = arith.constant 0 : index
    %c0_106 = arith.constant 0 : index
    %c0_107 = arith.constant 0 : index
    %95 = vector.load %arg7[%c0_105, %c0_106, %c0_107] : memref<18x18x32xf32, #tpu.memory_space<vmem>>, vector<16x16x32xf32>
    %96 = vector.shape_cast %95 : vector<16x16x32xf32> to vector<256x32xf32>
    %c0_108 = arith.constant 0 : index
    %c0_109 = arith.constant 0 : index
    %c0_110 = arith.constant 0 : index
    %97 = vector.load %arg4[%c0_108, %c0_109, %c0_110] : memref<9x32x32xf32, #tpu.memory_space<vmem>>, vector<1x32x32xf32>
    %98 = vector.shape_cast %97 : vector<1x32x32xf32> to vector<32x32xf32>
    %cst_111 = arith.constant dense<0.000000e+00> : vector<256x32xf32>
    %99 = tpu.matmul %96, %98, %cst_111 {dimension_numbers = #tpu.dot_dimension_numbers<[1], [0], [0], [1], [0, 0, 1, 1], [], []>} : vector<256x32xf32>, vector<32x32xf32>, vector<256x32xf32> -> vector<256x32xf32>
    %c0_112 = arith.constant 0 : index
    %c1_113 = arith.constant 1 : index
    %c0_114 = arith.constant 0 : index
    %100 = vector.load %arg7[%c0_112, %c1_113, %c0_114] : memref<18x18x32xf32, #tpu.memory_space<vmem>>, vector<16x16x32xf32>
    %101 = vector.shape_cast %100 : vector<16x16x32xf32> to vector<256x32xf32>
    %c1_115 = arith.constant 1 : index
    %c0_116 = arith.constant 0 : index
    %c0_117 = arith.constant 0 : index
    %102 = vector.load %arg4[%c1_115, %c0_116, %c0_117] : memref<9x32x32xf32, #tpu.memory_space<vmem>>, vector<1x32x32xf32>
    %103 = vector.shape_cast %102 : vector<1x32x32xf32> to vector<32x32xf32>
    %cst_118 = arith.constant dense<0.000000e+00> : vector<256x32xf32>
    %104 = tpu.matmul %101, %103, %cst_118 {dimension_numbers = #tpu.dot_dimension_numbers<[1], [0], [0], [1], [0, 0, 1, 1], [], []>} : vector<256x32xf32>, vector<32x32xf32>, vector<256x32xf32> -> vector<256x32xf32>
    %105 = arith.addf %99, %104 : vector<256x32xf32>
    %c0_119 = arith.constant 0 : index
    %c2_120 = arith.constant 2 : index
    %c0_121 = arith.constant 0 : index
    %106 = vector.load %arg7[%c0_119, %c2_120, %c0_121] : memref<18x18x32xf32, #tpu.memory_space<vmem>>, vector<16x16x32xf32>
    %107 = vector.shape_cast %106 : vector<16x16x32xf32> to vector<256x32xf32>
    %c2_122 = arith.constant 2 : index
    %c0_123 = arith.constant 0 : index
    %c0_124 = arith.constant 0 : index
    %108 = vector.load %arg4[%c2_122, %c0_123, %c0_124] : memref<9x32x32xf32, #tpu.memory_space<vmem>>, vector<1x32x32xf32>
    %109 = vector.shape_cast %108 : vector<1x32x32xf32> to vector<32x32xf32>
    %cst_125 = arith.constant dense<0.000000e+00> : vector<256x32xf32>
    %110 = tpu.matmul %107, %109, %cst_125 {dimension_numbers = #tpu.dot_dimension_numbers<[1], [0], [0], [1], [0, 0, 1, 1], [], []>} : vector<256x32xf32>, vector<32x32xf32>, vector<256x32xf32> -> vector<256x32xf32>
    %111 = arith.addf %105, %110 : vector<256x32xf32>
    %c1_126 = arith.constant 1 : index
    %c0_127 = arith.constant 0 : index
    %c0_128 = arith.constant 0 : index
    %112 = vector.load %arg7[%c1_126, %c0_127, %c0_128] : memref<18x18x32xf32, #tpu.memory_space<vmem>>, vector<16x16x32xf32>
    %113 = vector.shape_cast %112 : vector<16x16x32xf32> to vector<256x32xf32>
    %c3_129 = arith.constant 3 : index
    %c0_130 = arith.constant 0 : index
    %c0_131 = arith.constant 0 : index
    %114 = vector.load %arg4[%c3_129, %c0_130, %c0_131] : memref<9x32x32xf32, #tpu.memory_space<vmem>>, vector<1x32x32xf32>
    %115 = vector.shape_cast %114 : vector<1x32x32xf32> to vector<32x32xf32>
    %cst_132 = arith.constant dense<0.000000e+00> : vector<256x32xf32>
    %116 = tpu.matmul %113, %115, %cst_132 {dimension_numbers = #tpu.dot_dimension_numbers<[1], [0], [0], [1], [0, 0, 1, 1], [], []>} : vector<256x32xf32>, vector<32x32xf32>, vector<256x32xf32> -> vector<256x32xf32>
    %117 = arith.addf %111, %116 : vector<256x32xf32>
    %c1_133 = arith.constant 1 : index
    %c1_134 = arith.constant 1 : index
    %c0_135 = arith.constant 0 : index
    %118 = vector.load %arg7[%c1_133, %c1_134, %c0_135] : memref<18x18x32xf32, #tpu.memory_space<vmem>>, vector<16x16x32xf32>
    %119 = vector.shape_cast %118 : vector<16x16x32xf32> to vector<256x32xf32>
    %c4_136 = arith.constant 4 : index
    %c0_137 = arith.constant 0 : index
    %c0_138 = arith.constant 0 : index
    %120 = vector.load %arg4[%c4_136, %c0_137, %c0_138] : memref<9x32x32xf32, #tpu.memory_space<vmem>>, vector<1x32x32xf32>
    %121 = vector.shape_cast %120 : vector<1x32x32xf32> to vector<32x32xf32>
    %cst_139 = arith.constant dense<0.000000e+00> : vector<256x32xf32>
    %122 = tpu.matmul %119, %121, %cst_139 {dimension_numbers = #tpu.dot_dimension_numbers<[1], [0], [0], [1], [0, 0, 1, 1], [], []>} : vector<256x32xf32>, vector<32x32xf32>, vector<256x32xf32> -> vector<256x32xf32>
    %123 = arith.addf %117, %122 : vector<256x32xf32>
    %c1_140 = arith.constant 1 : index
    %c2_141 = arith.constant 2 : index
    %c0_142 = arith.constant 0 : index
    %124 = vector.load %arg7[%c1_140, %c2_141, %c0_142] : memref<18x18x32xf32, #tpu.memory_space<vmem>>, vector<16x16x32xf32>
    %125 = vector.shape_cast %124 : vector<16x16x32xf32> to vector<256x32xf32>
    %c5_143 = arith.constant 5 : index
    %c0_144 = arith.constant 0 : index
    %c0_145 = arith.constant 0 : index
    %126 = vector.load %arg4[%c5_143, %c0_144, %c0_145] : memref<9x32x32xf32, #tpu.memory_space<vmem>>, vector<1x32x32xf32>
    %127 = vector.shape_cast %126 : vector<1x32x32xf32> to vector<32x32xf32>
    %cst_146 = arith.constant dense<0.000000e+00> : vector<256x32xf32>
    %128 = tpu.matmul %125, %127, %cst_146 {dimension_numbers = #tpu.dot_dimension_numbers<[1], [0], [0], [1], [0, 0, 1, 1], [], []>} : vector<256x32xf32>, vector<32x32xf32>, vector<256x32xf32> -> vector<256x32xf32>
    %129 = arith.addf %123, %128 : vector<256x32xf32>
    %c2_147 = arith.constant 2 : index
    %c0_148 = arith.constant 0 : index
    %c0_149 = arith.constant 0 : index
    %130 = vector.load %arg7[%c2_147, %c0_148, %c0_149] : memref<18x18x32xf32, #tpu.memory_space<vmem>>, vector<16x16x32xf32>
    %131 = vector.shape_cast %130 : vector<16x16x32xf32> to vector<256x32xf32>
    %c6_150 = arith.constant 6 : index
    %c0_151 = arith.constant 0 : index
    %c0_152 = arith.constant 0 : index
    %132 = vector.load %arg4[%c6_150, %c0_151, %c0_152] : memref<9x32x32xf32, #tpu.memory_space<vmem>>, vector<1x32x32xf32>
    %133 = vector.shape_cast %132 : vector<1x32x32xf32> to vector<32x32xf32>
    %cst_153 = arith.constant dense<0.000000e+00> : vector<256x32xf32>
    %134 = tpu.matmul %131, %133, %cst_153 {dimension_numbers = #tpu.dot_dimension_numbers<[1], [0], [0], [1], [0, 0, 1, 1], [], []>} : vector<256x32xf32>, vector<32x32xf32>, vector<256x32xf32> -> vector<256x32xf32>
    %135 = arith.addf %129, %134 : vector<256x32xf32>
    %c2_154 = arith.constant 2 : index
    %c1_155 = arith.constant 1 : index
    %c0_156 = arith.constant 0 : index
    %136 = vector.load %arg7[%c2_154, %c1_155, %c0_156] : memref<18x18x32xf32, #tpu.memory_space<vmem>>, vector<16x16x32xf32>
    %137 = vector.shape_cast %136 : vector<16x16x32xf32> to vector<256x32xf32>
    %c7_157 = arith.constant 7 : index
    %c0_158 = arith.constant 0 : index
    %c0_159 = arith.constant 0 : index
    %138 = vector.load %arg4[%c7_157, %c0_158, %c0_159] : memref<9x32x32xf32, #tpu.memory_space<vmem>>, vector<1x32x32xf32>
    %139 = vector.shape_cast %138 : vector<1x32x32xf32> to vector<32x32xf32>
    %cst_160 = arith.constant dense<0.000000e+00> : vector<256x32xf32>
    %140 = tpu.matmul %137, %139, %cst_160 {dimension_numbers = #tpu.dot_dimension_numbers<[1], [0], [0], [1], [0, 0, 1, 1], [], []>} : vector<256x32xf32>, vector<32x32xf32>, vector<256x32xf32> -> vector<256x32xf32>
    %141 = arith.addf %135, %140 : vector<256x32xf32>
    %c2_161 = arith.constant 2 : index
    %c2_162 = arith.constant 2 : index
    %c0_163 = arith.constant 0 : index
    %142 = vector.load %arg7[%c2_161, %c2_162, %c0_163] : memref<18x18x32xf32, #tpu.memory_space<vmem>>, vector<16x16x32xf32>
    %143 = vector.shape_cast %142 : vector<16x16x32xf32> to vector<256x32xf32>
    %c8_164 = arith.constant 8 : index
    %c0_165 = arith.constant 0 : index
    %c0_166 = arith.constant 0 : index
    %144 = vector.load %arg4[%c8_164, %c0_165, %c0_166] : memref<9x32x32xf32, #tpu.memory_space<vmem>>, vector<1x32x32xf32>
    %145 = vector.shape_cast %144 : vector<1x32x32xf32> to vector<32x32xf32>
    %cst_167 = arith.constant dense<0.000000e+00> : vector<256x32xf32>
    %146 = tpu.matmul %143, %145, %cst_167 {dimension_numbers = #tpu.dot_dimension_numbers<[1], [0], [0], [1], [0, 0, 1, 1], [], []>} : vector<256x32xf32>, vector<32x32xf32>, vector<256x32xf32> -> vector<256x32xf32>
    %147 = arith.addf %141, %146 : vector<256x32xf32>
    %c0_168 = arith.constant 0 : index
    %c0_169 = arith.constant 0 : index
    %148 = vector.load %arg5[%c0_168, %c0_169] : memref<1x32xf32, #tpu.memory_space<vmem>>, vector<1x32xf32>
    %149 = vector.broadcast %148 : vector<1x32xf32> to vector<256x32xf32>
    %150 = arith.addf %147, %149 : vector<256x32xf32>
    %cst_170 = arith.constant dense<0.000000e+00> : vector<32xf32>
    %151 = vector.multi_reduction <add>, %150, %cst_170 [0] : vector<256x32xf32> to vector<32xf32>
    %152 = vector.shape_cast %151 : vector<32xf32> to vector<1x32xf32>
    %cst_171 = arith.constant 2.560000e+02 : f32
    %153 = vector.broadcast %cst_171 : f32 to vector<1x32xf32>
    %154 = arith.divf %152, %153 : vector<1x32xf32>
    %155 = vector.broadcast %154 : vector<1x32xf32> to vector<256x32xf32>
    %156 = arith.subf %150, %155 : vector<256x32xf32>
    %157 = arith.mulf %156, %156 : vector<256x32xf32>
    %cst_172 = arith.constant dense<0.000000e+00> : vector<32xf32>
    %158 = vector.multi_reduction <add>, %157, %cst_172 [0] : vector<256x32xf32> to vector<32xf32>
    %159 = vector.shape_cast %158 : vector<32xf32> to vector<1x32xf32>
    %cst_173 = arith.constant 2.560000e+02 : f32
    %160 = vector.broadcast %cst_173 : f32 to vector<1x32xf32>
    %161 = arith.divf %159, %160 : vector<1x32xf32>
    %cst_174 = arith.constant 9.99999974E-6 : f32
    %162 = vector.broadcast %cst_174 : f32 to vector<1x32xf32>
    %163 = arith.addf %161, %162 : vector<1x32xf32>
    %164 = math.rsqrt %163 : vector<1x32xf32>
    %165 = vector.broadcast %164 : vector<1x32xf32> to vector<256x32xf32>
    %166 = arith.mulf %156, %165 : vector<256x32xf32>
    %167 = vector.shape_cast %166 : vector<256x32xf32> to vector<16x16x32xf32>
    %168 = arith.addf %1, %167 : vector<16x16x32xf32>
    %c0_175 = arith.constant 0 : index
    %c0_176 = arith.constant 0 : index
    %c0_177 = arith.constant 0 : index
    %c0_178 = arith.constant 0 : index
    %169 = vector.load %arg6[%c0_175, %c0_176, %c0_177, %c0_178] : memref<1x16x16x32xf32, #tpu.memory_space<vmem>>, vector<1x16x16x32xf32>
    %170 = vector.shape_cast %169 : vector<1x16x16x32xf32> to vector<16x16x32xf32>
    %171 = vector.shape_cast %168 : vector<16x16x32xf32> to vector<1x16x16x32xf32>
    tpu.vector_store %arg6[%c0_175, %c0_176, %c0_177, %c0_178], %171 {strides = array<i32>} : memref<1x16x16x32xf32, #tpu.memory_space<vmem>>, vector<1x16x16x32xf32>,
    return
  }
  func.func @transform_0(%arg0: i32) -> (i32, i32, i32, i32) {
    %c0_i32 = arith.constant 0 : i32
    %c0_i32_0 = arith.constant 0 : i32
    %c0_i32_1 = arith.constant 0 : i32
    %c0_i32_2 = arith.constant 0 : i32
    return %arg0, %c0_i32, %c0_i32_0, %c0_i32_1 : i32, i32, i32, i32
  }
  func.func @transform_1(%arg0: i32) -> (i32, i32, i32) {
    %c0_i32 = arith.constant 0 : i32
    %c0_i32_0 = arith.constant 0 : i32
    %c0_i32_1 = arith.constant 0 : i32
    %c0_i32_2 = arith.constant 0 : i32
    return %c0_i32, %c0_i32_0, %c0_i32_1 : i32, i32, i32
  }
  func.func @transform_2(%arg0: i32) -> (i32, i32) {
    %c0_i32 = arith.constant 0 : i32
    %c0_i32_0 = arith.constant 0 : i32
    %c0_i32_1 = arith.constant 0 : i32
    return %c0_i32, %c0_i32_0 : i32, i32
  }
  func.func @transform_3(%arg0: i32) -> (i32, i32, i32) {
    %c0_i32 = arith.constant 0 : i32
    %c0_i32_0 = arith.constant 0 : i32
    %c0_i32_1 = arith.constant 0 : i32
    %c0_i32_2 = arith.constant 0 : i32
    return %c0_i32, %c0_i32_0, %c0_i32_1 : i32, i32, i32
  }
  func.func @transform_4(%arg0: i32) -> (i32, i32) {
    %c0_i32 = arith.constant 0 : i32
    %c0_i32_0 = arith.constant 0 : i32
    %c0_i32_1 = arith.constant 0 : i32
    return %c0_i32, %c0_i32_0 : i32, i32
  }
  func.func @transform_5(%arg0: i32) -> (i32, i32, i32, i32) {
    %c0_i32 = arith.constant 0 : i32
    %c0_i32_0 = arith.constant 0 : i32
    %c0_i32_1 = arith.constant 0 : i32
    %c0_i32_2 = arith.constant 0 : i32
    return %arg0, %c0_i32, %c0_i32_0, %c0_i32_1 : i32, i32, i32, i32
  }
}

</mosaic_0001>

<bundles_post_ra>
// kernel: residual_block_pallas.1
= control target key start
LH: loop header
LB: loop body
LE: loop exit
PB: predicated region body
PF: predicated region fallthrough
CT: control target
= control target key end

     0   :  { %10 = vsyncpa [#allocation4], 0  ;;  %s14153_s0 = inlined_call_operand.vmem [shape: f32[2,16,16,32], index: 0, kind: input, shape index: {}]   ;;  %s14154_s1 = inlined_call_operand.vmem [shape: f32[9,32,32], index: 1, kind: input, shape index: {}]   ;;  %s14155_s2 = inlined_call_operand.vmem [shape: f32[1,32], index: 2, kind: input, shape index: {}]   ;;  %s14156_s3 = inlined_call_operand.vmem [shape: f32[9,32,32], index: 3, kind: input, shape index: {}]   ;;  %s14157_s4 = inlined_call_operand.vmem [shape: f32[1,32], index: 4, kind: input, shape index: {}]   ;;  %s14158_s5 = inlined_call_operand.hbm [shape: f32[2,16,16,32], index: 5, kind: output, shape index: {}]  }
   0x1   :  { %12 = vsyncpa [#allocation4 + $0x1], 0  ;;  %s11203_s18 = smov 0   ;;  %s11205_s19 = smov 0  }
   0x2   :  { %s11207_s20 = smov 0   ;;  %s11209_s21 = smov 0  }
   0x3 LB: > { %s11224_s22 = sadd.s32 4294967295, %s11168_s21   ;;  %s8093_s23 = sadd.s32 4294967294, %s11168_s21   ;;  %s11168_s21 = sphi %s11209_s21, %s14531_s21   ;;  %s11164_s20 = sphi %s11207_s20, %s14530_s20   ;;  %s11160_s19 = sphi %s11205_s19, %s14529_s19   ;;  %s11156_s18 = sphi %s11203_s18, %s14528_s18  }
   0x4   : > { %s11228_s24 = sadd.s32 1, %s11168_s21   ;;  %s135_s25 = sadd.s32 1, %s11164_s20 }
   0x5   : > { %s132_s26 = ssub.s32 %s11168_s21, %s11228_s24  ;;  %p145_p0 = scmp.ne.s32.totalorder %s11164_s20, %s11160_s19 }
   0x6   : > { %p133_p1 = scmp.eq.s32.totalorder %s132_s26, 0  ;;  %p146_p2 = scmp.eq.s32.totalorder %s11224_s22, 1 }
   0x7   : > { %p151_p3 = scmp.ne.s32.totalorder %s11160_s19, %s11156_s18  ;;  %p152_p4 = scmp.eq.s32.totalorder %s8093_s23, 1 }
   0x8   : > { %s11239_s27 = scalar_select %p133_p1, %s11164_s20, %s135_s25  }
   0x9   : > { %p11241_p5 = por %p146_p2, %p145_p0  ;;  %p11245_p6 = por %p152_p4, %p151_p3 }
   0xa   : > { %p8096_p7 = scmp.ge.s32.totalorder %s11168_s21, 1  ;;  %p190_p8 = scmp.lt.s32.totalorder %s11168_s21, 3 }
   0xc   : > { %p191_p9 = pnand %p8096_p7, %p190_p8 }
   0xe   : > { %194 = sbr.rel (%p191_p9) target bundleno = 1912 (0x778), region = 40 }
  0x15   : > { %v8100_v0 = vld [vmem:[%s14154_s1 + $0x20] sm:$0xff]  ;;  %v8101_v1 = vld [vmem:[%s14154_s1 + $0x28] sm:$0xff]  ;;  %v8102_v2 = vld [vmem:[%s14154_s1 + $0x30] sm:$0xff]  ;;  %p218_p10 = scmp.lt.s32.totalorder %s11224_s22, 1  ;;  %vm256_vm0 = vcmask 261120   ;;  %vm312_vm1 = vcmask 253952  }
  0x16   : > { %v10405_v3 = vpack.c.bf16 %v8101_v1, %v8100_v0  ;;  %v8103_v4 = vld [vmem:[%s14154_s1 + $0x38] sm:$0xff]  ;;  %v399_v6 = vld [vmem:[%s14154_s1] sm:$0xff]  ;;  %v400_v7 = vld [vmem:[%s14154_s1 + $0x8] sm:$0xff]  ;;  %s215_s14 = sand.u32 1, %s11160_s19   ;;  %s8748_s17 = sshll.u32 %s11224_s22, 12 }
  0x17   : > { %v10409_v5 = vpack.c.bf16 %v8103_v4, %v8102_v2  ;;  %s219_s13 = scalar_select %p218_p10, %s11224_s22, 1  ;;  %v11276_v8 = vpack.c.bf16 %v400_v7, %v399_v6  ;;  %v401_v21 = vld [vmem:[%s14154_s1 + $0x10] sm:$0xff]  ;;  %v402_v22 = vld [vmem:[%s14154_s1 + $0x18] sm:$0xff]  ;;  %v8168_v39 = vld [vmem:[%s14154_s1 + $0x40] sm:$0xff] }
  0x18   : > { %10406 = vmatprep.subr.bf16.mxu0 %v10405_v3  ;;  %v10417_v38 = vpack.c.bf16 %v402_v22, %v401_v21  ;;  %v8169_v40 = vld [vmem:[%s14154_s1 + $0x48] sm:$0xff]  ;;  %s8097_s15 = sshll.u32 %s215_s14, 8  ;;  %s14078_s26 = scalar_lea.hbm %s14158_s5, %s8748_s17 }
  0x19   : > { %10408 = vmatpush3.bf16.msra.mxu0 %v10405_v3  ;;  %s8747_s23 = sshll.u32 %s219_s13, 8  ;;  %v11426_v43 = vpack.c.bf16 %v8169_v40, %v8168_v39  ;;  %s13987_s16 = scalar_lea.vmem [#allocation3], %s8097_s15 }
  0x1a   : > { %10410 = vmatprep.subr.bf16.mxu0 %v10409_v5  ;;  %s11274_s30 = scalar_lea.vmem %s14153_s0, %s8747_s23  ;;  %s8031_s23 = sshll.u32 %s13987_s16, 4  ;;  %s14080_s23 = int_to_ptr.vmem [resolvable:$true] %s8031_s23 }
  0x1b   : > { %v11279_v9 = vld [vmem:[%s11274_s30 + $0x10] sm:$0xff]  ;;  %v11282_v10 = vld [vmem:[%s11274_s30 + $0x18] sm:$0xff]  ;;  %v11285_v11 = vld [vmem:[%s11274_s30] sm:$0xff]  ;;  %s14112_s6 = scalar_lea.sflag [#allocation4], %s215_s14  ;;  %s11170_s7 = smov [#allocation3]  }
  0x1c   : > { %14318 = vst [vmem:[#allocation6_spill] sm:$0xff] %v11279_v9  ;;  %14319 = vst [vmem:[#allocation7_spill] sm:$0xff] %v11282_v10  ;;  %v11298_v12 = vld [vmem:[%s11274_s30 + $0x8] sm:$0xff]  ;;  %v11301_v13 = vld [vmem:[%s11274_s30 + $0x20] sm:$0xff]  ;;  %s11110_s8 = sshll.u32 %s11170_s7, 4  ;;  %s11111_s8 = int_to_ptr.vmem [resolvable:$false] %s11110_s8 }
  0x1d   : > { %14320 = vst [vmem:[#allocation8_spill] sm:$0xff] %v11285_v11  ;;  %289 = vst.msk [vmem:[#allocation2 + $0x1] sm:$0xff] %vm256_vm0, %v11279_v9  ;;  %v11304_v14 = vld [vmem:[%s11274_s30 + $0x28] sm:$0xff]  ;;  %10412 = vmatpush3.bf16.msra.mxu0 %v10409_v5  ;;  %v11313_v15 = vld [vmem:[%s11274_s30 + $0x30] sm:$0xff]  ;;  %s11112_s9 = scalar_lea.vmem %s11111_s8, 8192  ;;  %p11113_p0 = scmp.lt.s32.totalorder %s14080_s23, %s11111_s8 }
  0x1e   : > { %259 = vst.msk [vmem:[#allocation2 + $0x31] sm:$0xff] %vm256_vm0, %v11279_v9  ;;  %290 = vst.msk [vmem:[#allocation2 + $0x9] sm:$0xff] %vm256_vm0, %v11282_v10  ;;  %v11316_v16 = vld [vmem:[%s11274_s30 + $0x38] sm:$0xff]  ;;  %v11319_v17 = vld [vmem:[%s11274_s30 + $0x40] sm:$0xff]  ;;  %10414 = vmatprep.subr.bf16.mxu0 %v11276_v8 }
  0x1f   : > { %260 = vst.msk [vmem:[#allocation2 + $0x39] sm:$0xff] %vm256_vm0, %v11282_v10  ;;  %257 = vst.msk [vmem:[#allocation2 + $0x19] sm:$0xff] %vm256_vm0, %v11285_v11  ;;  %v11329_v18 = vld [vmem:[%s11274_s30 + $0x48] sm:$0xff]  ;;  %v11332_v19 = vld [vmem:[%s11274_s30 + $0x50] sm:$0xff] }
  0x20   : > { %14321 = vst [vmem:[#allocation9_spill] sm:$0xff] %v11298_v12  ;;  %14322 = vst [vmem:[#allocation10_spill] sm:$0xff] %v11301_v13  ;;  %v11335_v20 = vld [vmem:[%s11274_s30 + $0x58] sm:$0xff]  ;;  %v11350_v23 = vld [vmem:[%s11274_s30 + $0x60] sm:$0xff] }
  0x21   : > { %14323 = vst [vmem:[#allocation11_spill] sm:$0xff] %v11304_v14  ;;  %258 = vst.msk [vmem:[#allocation2 + $0x21] sm:$0xff] %vm256_vm0, %v11298_v12  ;;  %v11353_v24 = vld [vmem:[%s11274_s30 + $0x68] sm:$0xff]  ;;  %v11356_v25 = vld [vmem:[%s11274_s30 + $0x70] sm:$0xff] }
  0x22   : > { %261 = vst.msk [vmem:[#allocation2 + $0x49] sm:$0xff] %vm256_vm0, %v11301_v13  ;;  %262 = vst.msk [vmem:[#allocation2 + $0x51] sm:$0xff] %vm256_vm0, %v11304_v14  ;;  %v11365_v26 = vld [vmem:[%s11274_s30 + $0x78] sm:$0xff]  ;;  %v11368_v27 = vld [vmem:[%s11274_s30 + $0x80] sm:$0xff] }
  0x23   : > { %14324 = vst [vmem:[#allocation12_spill] sm:$0xff] %v11313_v15  ;;  %14325 = vst [vmem:[#allocation13_spill] sm:$0xff] %v11316_v16  ;;  %v11371_v28 = vld [vmem:[%s11274_s30 + $0x88] sm:$0xff]  ;;  %v11380_v29 = vld [vmem:[%s11274_s30 + $0x90] sm:$0xff] }
  0x24   : > { %14326 = vst [vmem:[#allocation14_spill] sm:$0xff] %v11319_v17  ;;  %263 = vst.msk [vmem:[#allocation2 + $0x61] sm:$0xff] %vm256_vm0, %v11313_v15  ;;  %v11383_v30 = vld [vmem:[%s11274_s30 + $0x98] sm:$0xff]  ;;  %v11386_v31 = vld [vmem:[%s11274_s30 + $0xa0] sm:$0xff] }
  0x25   : > { %264 = vst.msk [vmem:[#allocation2 + $0x69] sm:$0xff] %vm256_vm0, %v11316_v16  ;;  %265 = vst.msk [vmem:[#allocation2 + $0x79] sm:$0xff] %vm256_vm0, %v11319_v17  ;;  %v11395_v32 = vld [vmem:[%s11274_s30 + $0xa8] sm:$0xff]  ;;  %v11398_v33 = vld [vmem:[%s11274_s30 + $0xb0] sm:$0xff] }
  0x26   : > { %14327 = vst [vmem:[#allocation15_spill] sm:$0xff] %v11329_v18  ;;  %14328 = vst [vmem:[#allocation16_spill] sm:$0xff] %v11332_v19  ;;  %v11401_v34 = vld [vmem:[%s11274_s30 + $0xb8] sm:$0xff]  ;;  %v403_v35 = vld [vmem:[#allocation2 + $0x1] sm:$0xff] }
  0x27   : > { %14329 = vst [vmem:[#allocation17_spill] sm:$0xff] %v11335_v20  ;;  %266 = vst.msk [vmem:[#allocation2 + $0x81] sm:$0xff] %vm256_vm0, %v11329_v18  ;;  %v404_v36 = vld [vmem:[#allocation2 + $0x9] sm:$0xff]  ;;  %v11403_v37 = vld [vmem:[#allocation2 + $0x19] sm:$0xff]  ;;  %9405 = vmatprep.mubr.msk.f32.mxu0 %vm256_vm0, %v403_v35 }
  0x28   : > { %267 = vst.msk [vmem:[#allocation2 + $0x91] sm:$0xff] %vm256_vm0, %v11332_v19  ;;  %268 = vst.msk [vmem:[#allocation2 + $0x99] sm:$0xff] %vm256_vm0, %v11335_v20  ;;  %9406 = vmatmul.mubr.msk.f32.vlgmr.msra.gmra.mrb[0].mxu0 %vm256_vm0, %v404_v36  ;;  %v11422_v41 = vld [vmem:[#allocation2 + $0x21] sm:$0xff]  ;;  %v11424_v42 = vld [vmem:[#allocation2 + $0x31] sm:$0xff] }
  0x29   : > { %14330 = vst [vmem:[#allocation18_spill] sm:$0xff] %v11350_v23  ;;  %14331 = vst [vmem:[#allocation19_spill] sm:$0xff] %v11353_v24  ;;  %10416 = vmatpush3.bf16.msra.mxu0 %v11276_v8  ;;  %9408 = vmatprep.mubr.msk.f32.mxu0 %vm256_vm0, %v11403_v37  ;;  %v11432_v44 = vld [vmem:[#allocation2 + $0x39] sm:$0xff]  ;;  %v11434_v45 = vld [vmem:[#allocation2 + $0x49] sm:$0xff] }
  0x2a   : > { %14332 = vst [vmem:[#allocation20_spill] sm:$0xff] %v11356_v25  ;;  %269 = vst.msk [vmem:[#allocation2 + $0xa9] sm:$0xff] %vm256_vm0, %v11350_v23  ;;  %10418 = vmatprep.subr.bf16.mxu0 %v10417_v38  ;;  %v11437_v46 = vld [vmem:[%s11274_s30 + $0xc0] sm:$0xff]  ;;  %v11443_v47 = vld [vmem:[%s11274_s30 + $0xc8] sm:$0xff] }
  0x2b   : > { %270 = vst.msk [vmem:[#allocation2 + $0xb1] sm:$0xff] %vm256_vm0, %v11353_v24  ;;  %271 = vst.msk [vmem:[#allocation2 + $0xc1] sm:$0xff] %vm256_vm0, %v11356_v25  ;;  %v11446_v48 = vld [vmem:[%s11274_s30 + $0xd0] sm:$0xff]  ;;  %v11449_v49 = vld [vmem:[%s11274_s30 + $0xd8] sm:$0xff] }
  0x2c   : > { %14333 = vst [vmem:[#allocation21_spill] sm:$0xff] %v11365_v26  ;;  %14334 = vst [vmem:[#allocation22_spill] sm:$0xff] %v11368_v27  ;;  %9409 = vmatmul.mubr.msk.f32.gmra.mrb[2].mxu0 %vm256_vm0, %v11422_v41  ;;  %v11460_v50 = vld [vmem:[%s11274_s30 + $0xe0] sm:$0xff]  ;;  %v11463_v51 = vld [vmem:[%s11274_s30 + $0xe8] sm:$0xff] }
  0x2d   : > { %14335 = vst [vmem:[#allocation23_spill] sm:$0xff] %v11371_v28  ;;  %272 = vst.msk [vmem:[#allocation2 + $0xc9] sm:$0xff] %vm256_vm0, %v11365_v26  ;;  %9411 = vmatprep.mubr.msk.f32.mxu0 %vm256_vm0, %v11424_v42  ;;  %10420 = vmatpush3.bf16.msra.mxu0 %v10417_v38  ;;  %v294_v52 = vld [vmem:[#allocation2 + $0x2] sm:$0x1]  ;;  %v11467_v53 = vld [vmem:[#allocation2 + $0x51] sm:$0xff] }
  0x2e   : > { %273 = vst.msk [vmem:[#allocation2 + $0xd9] sm:$0xff] %vm256_vm0, %v11368_v27  ;;  %274 = vst.msk [vmem:[#allocation2 + $0xe1] sm:$0xff] %vm256_vm0, %v11371_v28  ;;  %10422 = vmatprep.subr.bf16.mxu0 %v11426_v43  ;;  %v295_v54 = vld [vmem:[#allocation2 + $0x1a] sm:$0x1]  ;;  %v11478_v55 = vld [vmem:[#allocation2 + $0x61] sm:$0xff] }
  0x2f   : > { %14336 = vst [vmem:[#allocation24_spill] sm:$0xff] %v11380_v29  ;;  %14337 = vst [vmem:[#allocation25_spill] sm:$0xff] %v11383_v30  ;;  %v296_v56 = vld [vmem:[#allocation2 + $0x32] sm:$0x1]  ;;  %v297_v57 = vld [vmem:[#allocation2 + $0x4a] sm:$0x1] }
  0x30   : > { %14338 = vst [vmem:[#allocation26_spill] sm:$0xff] %v11386_v31  ;;  %275 = vst.msk [vmem:[#allocation2 + $0xf1] sm:$0xff] %vm256_vm0, %v11380_v29  ;;  %9412 = vmatmul.mubr.msk.f32.gmra.mrb[4].mxu0 %vm256_vm0, %v11432_v44  ;;  %v298_v58 = vld [vmem:[#allocation2 + $0x62] sm:$0x1]  ;;  %v299_v59 = vld [vmem:[#allocation2 + $0x7a] sm:$0x1] }
  0x31   : > { %276 = vst.msk [vmem:[#allocation2 + $0xf9] sm:$0xff] %vm256_vm0, %v11383_v30  ;;  %277 = vst.msk [vmem:[#allocation2 + $0x109] sm:$0xff] %vm256_vm0, %v11386_v31  ;;  %9414 = vmatprep.mubr.msk.f32.mxu0 %vm256_vm0, %v11434_v45  ;;  %v300_v60 = vld [vmem:[#allocation2 + $0x92] sm:$0x1]  ;;  %v11488_v61 = vld [vmem:[#allocation2 + $0x69] sm:$0xff] }
  0x32   : > { %14339 = vst [vmem:[#allocation27_spill] sm:$0xff] %v11395_v32  ;;  %14340 = vst [vmem:[#allocation28_spill] sm:$0xff] %v11398_v33  ;;  %v301_v62 = vld [vmem:[#allocation2 + $0xaa] sm:$0x1]  ;;  %v11492_v63 = vld [vmem:[#allocation2 + $0x79] sm:$0xff] }
  0x33   : > { %14341 = vst [vmem:[#allocation29_spill] sm:$0xff] %v11401_v34  ;;  %278 = vst.msk [vmem:[#allocation2 + $0x111] sm:$0xff] %vm256_vm0, %v11395_v32  ;;  %v302_v0 = vld [vmem:[#allocation2 + $0xc2] sm:$0x1]  ;;  %v11502_v3 = vld [vmem:[#allocation2 + $0x91] sm:$0xff] }
  0x34   : > { %279 = vst.msk [vmem:[#allocation2 + $0x121] sm:$0xff] %vm256_vm0, %v11398_v33  ;;  %280 = vst.msk [vmem:[#allocation2 + $0x129] sm:$0xff] %vm256_vm0, %v11401_v34  ;;  %9415 = vmatmul.mubr.msk.f32.gmra.mrb[6].mxu0 %vm256_vm0, %v11467_v53  ;;  %v11500_v1 = vld [vmem:[#allocation2 + $0x81] sm:$0xff]  ;;  %v11511_v6 = vld [vmem:[#allocation2 + $0x99] sm:$0xff] }
  0x35   : > { %14342 = vst [vmem:[#allocation30_spill] sm:$0xff] %v11437_v46  ;;  %281 = vst.msk [vmem:[#allocation2 + $0x139] sm:$0xff] %vm256_vm0, %v11437_v46  ;;  %9417 = vmatprep.mubr.msk.f32.mxu0 %vm256_vm0, %v11478_v55  ;;  %v303_v2 = vld [vmem:[#allocation2 + $0xda] sm:$0x1]  ;;  %v11513_v8 = vld [vmem:[#allocation2 + $0xa9] sm:$0xff] }
  0x36   : > { %14343 = vst [vmem:[#allocation31_spill] sm:$0xff] %v11443_v47  ;;  %14344 = vst [vmem:[#allocation32_spill] sm:$0xff] %v11446_v48  ;;  %v11523_v36 = vld [vmem:[#allocation2 + $0xb1] sm:$0xff]  ;;  %v331_v38 = vld [vmem:[#allocation2 + $0xf] sm:$0x1] }
  0x37   : > { %14345 = vst [vmem:[#allocation33_spill] sm:$0xff] %v11449_v49  ;;  %282 = vst.msk [vmem:[#allocation2 + $0x141] sm:$0xff] %vm256_vm0, %v11443_v47  ;;  %v304_v4 = vld [vmem:[#allocation2 + $0xf2] sm:$0x1]  ;;  %v11525_v39 = vld [vmem:[#allocation2 + $0xc1] sm:$0xff] }
  0x38   : > { %283 = vst.msk [vmem:[#allocation2 + $0x151] sm:$0xff] %vm256_vm0, %v11446_v48  ;;  %284 = vst.msk [vmem:[#allocation2 + $0x159] sm:$0xff] %vm256_vm0, %v11449_v49  ;;  %9418 = vmatmul.mubr.msk.f32.gmra.mrb[8].mxu0 %vm256_vm0, %v11488_v61  ;;  %v305_v5 = vld [vmem:[#allocation2 + $0x10a] sm:$0x1]  ;;  %v332_v40 = vld [vmem:[#allocation2 + $0x27] sm:$0x1] }
  0x39   : > { %14346 = vst [vmem:[#allocation34_spill] sm:$0xff] %v11460_v50  ;;  %14347 = vst [vmem:[#allocation35_spill] sm:$0xff] %v11463_v51  ;;  %9420 = vmatprep.mubr.msk.f32.mxu0 %vm256_vm0, %v11492_v63  ;;  %v8204_v48 = vld [vmem:[%s14154_s1 + $0x60] sm:$0xff]  ;;  %v8205_v47 = vld [vmem:[%s14154_s1 + $0x68] sm:$0xff] }
  0x3a   : > { %285 = vst.msk [vmem:[#allocation2 + $0x169] sm:$0xff] %vm256_vm0, %v11460_v50  ;;  %292 = vst.msk [vmem:[#allocation2 + $0x199] sm:$0xff] %vm256_vm0, %v11460_v50  ;;  %v11661_v34 = vld [vmem:[#allocation2 + $0x80] sm:$0xff]  ;;  %v11669_v32 = vld [vmem:[#allocation2 + $0x98] sm:$0xff] }
  0x3b   : > { %286 = vst.msk [vmem:[#allocation2 + $0x171] sm:$0xff] %vm256_vm0, %v11463_v51  ;;  %293 = vst.msk [vmem:[#allocation2 + $0x1a1] sm:$0xff] %vm256_vm0, %v11463_v51  ;;  %v306_v7 = vld [vmem:[#allocation2 + $0x122] sm:$0x1]  ;;  %v368_v51 = vld [vmem:[#allocation2 + $0x8] sm:$0xff] }
  0x3c   : > { %313 = vst.msk [vmem:[#allocation2] sm:$0x1] %vm312_vm1, %v294_v52  ;;  %314 = vst.msk [vmem:[#allocation2 + $0x18] sm:$0x1] %vm312_vm1, %v295_v54  ;;  %9421 = vmatmul.mubr.msk.f32.gmra.mrb[10].mxu0 %vm256_vm0, %v11500_v1  ;;  %v307_v21 = vld [vmem:[#allocation2 + $0x13a] sm:$0x1] }
  0x3d   : > { %315 = vst.msk [vmem:[#allocation2 + $0x30] sm:$0x1] %vm312_vm1, %v296_v56  ;;  %316 = vst.msk [vmem:[#allocation2 + $0x48] sm:$0x1] %vm312_vm1, %v297_v57  ;;  %9423 = vmatprep.mubr.msk.f32.mxu0 %vm256_vm0, %v11502_v3  ;;  %v333_v52 = vld [vmem:[#allocation2 + $0x3f] sm:$0x1] }
  0x3e   : > { %317 = vst.msk [vmem:[#allocation2 + $0x60] sm:$0x1] %vm312_vm1, %v298_v58  ;;  %318 = vst.msk [vmem:[#allocation2 + $0x78] sm:$0x1] %vm312_vm1, %v299_v59  ;;  %v334_v54 = vld [vmem:[#allocation2 + $0x57] sm:$0x1] }
  0x3f   : > { %319 = vst.msk [vmem:[#allocation2 + $0x90] sm:$0x1] %vm312_vm1, %v300_v60  ;;  %320 = vst.msk [vmem:[#allocation2 + $0xa8] sm:$0x1] %vm312_vm1, %v301_v62  ;;  %v308_v22 = vld [vmem:[#allocation2 + $0x152] sm:$0x1] }
  0x40   : > { %321 = vst.msk [vmem:[#allocation2 + $0xc0] sm:$0x1] %vm312_vm1, %v302_v0  ;;  %322 = vst.msk [vmem:[#allocation2 + $0xd8] sm:$0x1] %vm312_vm1, %v303_v2  ;;  %9424 = vmatmul.mubr.msk.f32.gmra.mrb[12].mxu0 %vm256_vm0, %v11511_v6  ;;  %v11534_v56 = vld [vmem:[#allocation2 + $0xc9] sm:$0xff]  ;;  %v11537_v58 = vld [vmem:[#allocation2 + $0xd9] sm:$0xff] }
  0x41   : > { %323 = vst.msk [vmem:[#allocation2 + $0xf0] sm:$0x1] %vm312_vm1, %v304_v4  ;;  %324 = vst.msk [vmem:[#allocation2 + $0x108] sm:$0x1] %vm312_vm1, %v305_v5  ;;  %v309_v35 = vld [vmem:[#allocation2 + $0x16a] sm:$0x1]  ;;  %9426 = vmatprep.mubr.msk.f32.mxu0 %vm256_vm0, %v11513_v8 }
  0x42   : > { %325 = vst.msk [vmem:[#allocation2 + $0x120] sm:$0x1] %vm312_vm1, %v306_v7  ;;  %326 = vst.msk [vmem:[#allocation2 + $0x138] sm:$0x1] %vm312_vm1, %v307_v21  ;;  %v335_v57 = vld [vmem:[#allocation2 + $0x6f] sm:$0x1] }
  0x43   : > { %327 = vst.msk [vmem:[#allocation2 + $0x150] sm:$0x1] %vm312_vm1, %v308_v22  ;;  %328 = vst.msk [vmem:[#allocation2 + $0x168] sm:$0x1] %vm312_vm1, %v309_v35  ;;  %v336_v59 = vld [vmem:[#allocation2 + $0x87] sm:$0x1] }
  0x44   : > { %349 = vst.msk [vmem:[#allocation2 + $0x11] sm:$0x1] %vm312_vm1, %v331_v38  ;;  %350 = vst.msk [vmem:[#allocation2 + $0x29] sm:$0x1] %vm312_vm1, %v332_v40  ;;  %9427 = vmatmul.mubr.msk.f32.gmra.mrb[14].mxu0 %vm256_vm0, %v11523_v36  ;;  %v337_v60 = vld [vmem:[#allocation2 + $0x9f] sm:$0x1] }
  0x45   : > { %351 = vst.msk [vmem:[#allocation2 + $0x41] sm:$0x1] %vm312_vm1, %v333_v52  ;;  %9429 = vmatprep.mubr.msk.f32.mxu0 %vm256_vm0, %v11525_v39  ;;  %352 = vst.msk [vmem:[#allocation2 + $0x59] sm:$0x1] %vm312_vm1, %v334_v54  ;;  %v338_v62 = vld [vmem:[#allocation2 + $0xb7] sm:$0x1] }
  0x46   : > { %353 = vst.msk [vmem:[#allocation2 + $0x71] sm:$0x1] %vm312_vm1, %v335_v57  ;;  %354 = vst.msk [vmem:[#allocation2 + $0x89] sm:$0x1] %vm312_vm1, %v336_v59  ;;  %v11546_v0 = vld [vmem:[#allocation2 + $0xe1] sm:$0xff]  ;;  %v11549_v2 = vld [vmem:[#allocation2 + $0xf1] sm:$0xff] }
  0x47   : > { %355 = vst.msk [vmem:[#allocation2 + $0xa1] sm:$0x1] %vm312_vm1, %v337_v60  ;;  %356 = vst.msk [vmem:[#allocation2 + $0xb9] sm:$0x1] %vm312_vm1, %v338_v62  ;;  %v339_v4 = vld [vmem:[#allocation2 + $0xcf] sm:$0x1] }
  0x48   : > { %9430 = vmatmul.mubr.msk.f32.gmra.mrb[16].mxu0 %vm256_vm0, %v11534_v56  ;;  %357 = vst.msk [vmem:[#allocation2 + $0xd1] sm:$0x1] %vm312_vm1, %v339_v4  ;;  %v340_v5 = vld [vmem:[#allocation2 + $0xe7] sm:$0x1]  ;;  %v341_v7 = vld [vmem:[#allocation2 + $0xff] sm:$0x1] }
  0x49   : > { %9432 = vmatprep.mubr.msk.f32.mxu0 %vm256_vm0, %v11537_v58  ;;  %358 = vst.msk [vmem:[#allocation2 + $0xe9] sm:$0x1] %vm312_vm1, %v340_v5  ;;  %359 = vst.msk [vmem:[#allocation2 + $0x101] sm:$0x1] %vm312_vm1, %v341_v7  ;;  %v342_v21 = vld [vmem:[#allocation2 + $0x117] sm:$0x1] }
  0x4a   : > { %v11558_v22 = vld [vmem:[#allocation2 + $0xf9] sm:$0xff]  ;;  %360 = vst.msk [vmem:[#allocation2 + $0x119] sm:$0x1] %vm312_vm1, %v342_v21  ;;  %v11561_v35 = vld [vmem:[#allocation2 + $0x109] sm:$0xff]  ;;  %v11568_v40 = vld [vmem:[#allocation2 + $0x111] sm:$0xff] }
  0x4b   : > { %v343_v38 = vld [vmem:[#allocation2 + $0x12f] sm:$0x1]  ;;  %v11570_v52 = vld [vmem:[#allocation2 + $0x121] sm:$0xff]  ;;  %v11579_v59 = vld [vmem:[#allocation2 + $0x139] sm:$0xff] }
  0x4c   : > { %9433 = vmatmul.mubr.msk.f32.gmra.mrb[18].mxu0 %vm256_vm0, %v11546_v0  ;;  %361 = vst.msk [vmem:[#allocation2 + $0x131] sm:$0x1] %vm312_vm1, %v343_v38  ;;  %v344_v54 = vld [vmem:[#allocation2 + $0x147] sm:$0x1]  ;;  %v11577_v57 = vld [vmem:[#allocation2 + $0x129] sm:$0xff]  ;;  %14348 = vst [vmem:[#allocation36_spill] sm:$0xff] %v11579_v59 }
  0x4d   : > { %9435 = vmatprep.mubr.msk.f32.mxu0 %vm256_vm0, %v11549_v2  ;;  %362 = vst.msk [vmem:[#allocation2 + $0x149] sm:$0x1] %vm312_vm1, %v344_v54  ;;  %v345_v60 = vld [vmem:[#allocation2 + $0x15f] sm:$0x1]  ;;  %v11586_v62 = vld [vmem:[#allocation2 + $0x141] sm:$0xff]  ;;  %v11588_v4 = vld [vmem:[#allocation2 + $0x151] sm:$0xff] }
  0x4e   : > { %363 = vst.msk [vmem:[#allocation2 + $0x161] sm:$0x1] %vm312_vm1, %v345_v60  ;;  %14349 = vst [vmem:[#allocation37_spill] sm:$0xff] %v11586_v62  ;;  %v346_v5 = vld [vmem:[#allocation2 + $0x177] sm:$0x1]  ;;  %v11595_v7 = vld [vmem:[#allocation2 + $0x159] sm:$0xff] }
  0x4f   : > { %14350 = vst [vmem:[#allocation38_spill] sm:$0xff] %v11588_v4  ;;  %364 = vst.msk [vmem:[#allocation2 + $0x179] sm:$0x1] %vm312_vm1, %v346_v5  ;;  %v11597_v21 = vld [vmem:[#allocation2 + $0x169] sm:$0xff]  ;;  %v11603_v38 = vld [vmem:[#allocation2 + $0x171] sm:$0xff] }
  0x50   : > { %9436 = vmatmul.mubr.msk.f32.gmra.mrb[20].mxu0 %vm256_vm0, %v11558_v22  ;;  %14351 = vst [vmem:[#allocation39_spill] sm:$0xff] %v11595_v7  ;;  %14352 = vst [vmem:[#allocation40_spill] sm:$0xff] %v11597_v21  ;;  %v367_v54 = vld [vmem:[#allocation2] sm:$0xff]  ;;  %v8170_v60 = vld [vmem:[%s14154_s1 + $0x50] sm:$0xff] }
  0x51   : > { %9438 = vmatprep.mubr.msk.f32.mxu0 %vm256_vm0, %v11561_v35  ;;  %14353 = vst [vmem:[#allocation41_spill] sm:$0xff] %v11603_v38  ;;  %v8171_v5 = vld [vmem:[%s14154_s1 + $0x58] sm:$0xff]  ;;  %v11628_v46 = vld [vmem:[#allocation2 + $0x30] sm:$0xff]  ;;  %v11671_v31 = vld [vmem:[#allocation2 + $0xa8] sm:$0xff] }
  0x52   : > { %v11614_v50 = vld [vmem:[#allocation2 + $0x18] sm:$0xff]  ;;  %v10425_v49 = vpack.c.bf16 %v8171_v5, %v8170_v60  ;;  %v11630_v60 = vpack.c.bf16 %v8205_v47, %v8204_v48  ;;  %v11645_v47 = vld [vmem:[#allocation2 + $0x50] sm:$0xff]  ;;  %v11647_v48 = vld [vmem:[#allocation2 + $0x60] sm:$0xff] }
  0x53   : > { %v11636_v5 = vld [vmem:[#allocation2 + $0x38] sm:$0xff]  ;;  %v11663_v33 = vld [vmem:[#allocation2 + $0x90] sm:$0xff]  ;;  %v11679_v29 = vld [vmem:[#allocation2 + $0xc0] sm:$0xff] }
  0x54   : > { %9439 = vmatmul.mubr.msk.f32.gmra.mrb[22].mxu0 %vm256_vm0, %v11568_v40  ;;  %v11677_v30 = vld [vmem:[#allocation2 + $0xb0] sm:$0xff]  ;;  %v11685_v28 = vld [vmem:[#allocation2 + $0xc8] sm:$0xff]  ;;  %v11687_v27 = vld [vmem:[#allocation2 + $0xd8] sm:$0xff] }
  0x55   : > { %9441 = vmatprep.mubr.msk.f32.mxu0 %vm256_vm0, %v11570_v52  ;;  %v11693_v26 = vld [vmem:[#allocation2 + $0xe0] sm:$0xff]  ;;  %v11695_v25 = vld [vmem:[#allocation2 + $0xf0] sm:$0xff]  ;;  %v11701_v24 = vld [vmem:[#allocation2 + $0xf8] sm:$0xff] }
  0x56   : > { %v11703_v23 = vld [vmem:[#allocation2 + $0x108] sm:$0xff]  ;;  %v11709_v20 = vld [vmem:[#allocation2 + $0x110] sm:$0xff]  ;;  %v11711_v19 = vld [vmem:[#allocation2 + $0x120] sm:$0xff] }
  0x57   : > { %v11714_v18 = vld [vmem:[%s11274_s30 + $0xf0] sm:$0xff]  ;;  %v11722_v17 = vld [vmem:[#allocation2 + $0x128] sm:$0xff]  ;;  %v11724_v16 = vld [vmem:[#allocation2 + $0x138] sm:$0xff] }
  0x58   : > { %9442 = vmatmul.mubr.msk.f32.gmra.mrb[24].mxu0 %vm256_vm0, %v11577_v57  ;;  %14354 = vst [vmem:[#allocation42_spill] sm:$0xff] %v11714_v18  ;;  %287 = vst.msk [vmem:[#allocation2 + $0x181] sm:$0xff] %vm256_vm0, %v11714_v18  ;;  %v11730_v15 = vld [vmem:[#allocation2 + $0x140] sm:$0xff]  ;;  %v11732_v14 = vld [vmem:[#allocation2 + $0x150] sm:$0xff] }
  0x59   : > { %9444 = vmatprep.mubr.msk.f32.mxu0 %vm256_vm0, %v11579_v59  ;;  %v11736_v10 = vld [vmem:[%s11274_s30 + $0xf8] sm:$0xff]  ;;  %v11746_v12 = vld [vmem:[#allocation2 + $0x168] sm:$0xff]  ;;  %s11106_s30 = scalar_lea.vmem %s14080_s23, 4096 }
  0x5a   : > { %14355 = vst [vmem:[#allocation43_spill] sm:$0xff] %v11736_v10  ;;  %288 = vst.msk [vmem:[#allocation2 + $0x189] sm:$0xff] %vm256_vm0, %v11736_v10  ;;  %v11744_v9 = vld [vmem:[#allocation2 + $0x158] sm:$0xff]  ;;  %v1082_v11 = vld [vmem:[#allocation2 + $0x2] sm:$0xff]  ;;  %p11107_p11 = scmp.ne.s32.totalorder %s14080_s23, %s11106_s30  ;;  %p11114_p1 = scmp.lt.s32.totalorder %s11112_s9, %s11106_s30 }
  0x5b   : > { %v8206_v10 = vld [vmem:[%s14154_s1 + $0x70] sm:$0xff]  ;;  %v8207_v18 = vld [vmem:[%s14154_s1 + $0x78] sm:$0xff] }
  0x5c   : > { %9445 = vmatmul.mubr.msk.f32.gmra.mrb[26].mxu0 %vm256_vm0, %v11586_v62  ;;  %v8241_v62 = vld [vmem:[%s14154_s1 + $0x88] sm:$0xff]  ;;  %v11777_v59 = vld [vmem:[#allocation2 + $0x32] sm:$0xff]  ;;  %p11108_p12 = pnand %p11107_p11, %p11241_p5  ;;  %p11115_p2 = por %p11114_p1, %p11113_p0 }
  0x5d   : > { %9447 = vmatprep.mubr.msk.f32.mxu0 %vm256_vm0, %v11588_v4  ;;  %v8240_v4 = vld [vmem:[%s14154_s1 + $0x80] sm:$0xff] }
  0x5e   : > { %p11109_p13 = pneg %p11108_p12 }
  0x5f   : > { %v310_v13 = vld [vmem:[#allocation2 + $0x182] sm:$0x1] }
  0x60   : > { %9448 = vmatmul.mubr.msk.f32.gmra.mrb[28].mxu0 %vm256_vm0, %v11595_v7  ;;  %329 = vst.msk [vmem:[#allocation2 + $0x180] sm:$0x1] %vm312_vm1, %v310_v13  ;;  %v11752_v13 = vld [vmem:[#allocation2 + $0x170] sm:$0xff]  ;;  %v10433_v7 = vpack.c.bf16 %v8207_v18, %v8206_v10  ;;  %v11779_v10 = vpack.c.bf16 %v8241_v62, %v8240_v4  ;;  %v11785_v18 = vld [vmem:[#allocation2 + $0x3a] sm:$0xff]  ;;  %v11796_v4 = vld [vmem:[#allocation2 + $0x62] sm:$0xff]  ;;  %p11116_p3 = pnand %p11115_p2, %p11109_p13 }
  0x61   : > { %9450 = vmatprep.mubr.msk.f32.mxu0 %vm256_vm0, %v11597_v21  ;;  %v11763_v21 = vld [vmem:[#allocation2 + $0x1a] sm:$0xff]  ;;  %14356 = vst [vmem:[#allocation44_spill] sm:$0xff] %v11785_v18  ;;  %v11794_v62 = vld [vmem:[#allocation2 + $0x52] sm:$0xff]  ;;  %14359 = vst [vmem:[#allocation47_spill] sm:$0xff] %v11796_v4 }
  0x62   : > { %14358 = vst [vmem:[#allocation46_spill] sm:$0xff] %v11794_v62 }
  0x64   : > { %9451 = vmatmul.mubr.msk.f32.gmra.mrb[30].mxu0 %vm256_vm0, %v11603_v38  ;;  %v1083_v38 = vld [vmem:[#allocation2 + $0xa] sm:$0xff] }
  0x65   : > { %9461 = vmatprep.mubr.msk.f32.mxu0 %vm256_vm0, %v367_v54  ;;  %v11626_v54 = vld [vmem:[#allocation2 + $0x20] sm:$0xff] }
  0x68   : > { %9462 = vmatmul.mubr.msk.f32.vlgmr.msra.gmra.mrb[0].mxu0 %vm256_vm0, %v368_v51  ;;  %v11655_v51 = vld [vmem:[#allocation2 + $0x78] sm:$0xff] }
  0x69   : > { %10424 = vmatpush3.bf16.msra.mxu0 %v11426_v43  ;;  %9464 = vmatprep.mubr.msk.f32.mxu0 %vm256_vm0, %v11614_v50  ;;  %v11638_v43 = vld [vmem:[#allocation2 + $0x48] sm:$0xff] }
  0x6a   : > { %10426 = vmatprep.subr.bf16.mxu0 %v10425_v49 }
  0x6c   : > { %9465 = vmatmul.mubr.msk.f32.gmra.mrb[2].mxu0 %vm256_vm0, %v11626_v54 }
  0x6d   : > { %9467 = vmatprep.mubr.msk.f32.mxu0 %vm256_vm0, %v11628_v46  ;;  %10428 = vmatpush3.bf16.msra.mxu0 %v10425_v49  ;;  %v11653_v49 = vld [vmem:[#allocation2 + $0x68] sm:$0xff] }
  0x6e   : > { %10430 = vmatprep.subr.bf16.mxu0 %v11630_v60 }
  0x70   : > { %9468 = vmatmul.mubr.msk.f32.gmra.mrb[4].mxu0 %vm256_vm0, %v11636_v5 }
  0x71   : > { %9470 = vmatprep.mubr.msk.f32.mxu0 %vm256_vm0, %v11638_v43 }
  0x74   : > { %9471 = vmatmul.mubr.msk.f32.gmra.mrb[6].mxu0 %vm256_vm0, %v11645_v47 }
  0x75   : > { %9473 = vmatprep.mubr.msk.f32.mxu0 %vm256_vm0, %v11647_v48 }
  0x78   : > { %9474 = vmatmul.mubr.msk.f32.gmra.mrb[8].mxu0 %vm256_vm0, %v11653_v49 }
  0x79   : > { %9476 = vmatprep.mubr.msk.f32.mxu0 %vm256_vm0, %v11655_v51 }
  0x7c   : > { %9477 = vmatmul.mubr.msk.f32.gmra.mrb[10].mxu0 %vm256_vm0, %v11661_v34 }
  0x7d   : > { %9479 = vmatprep.mubr.msk.f32.mxu0 %vm256_vm0, %v11663_v33 }
  0x80   : > { %9480 = vmatmul.mubr.msk.f32.gmra.mrb[12].mxu0 %vm256_vm0, %v11669_v32 }
  0x81   : > { %9482 = vmatprep.mubr.msk.f32.mxu0 %vm256_vm0, %v11671_v31 }
  0x84   : > { %9483 = vmatmul.mubr.msk.f32.gmra.mrb[14].mxu0 %vm256_vm0, %v11677_v30 }
  0x85   : > { %9485 = vmatprep.mubr.msk.f32.mxu0 %vm256_vm0, %v11679_v29 }
  0x88   : > { %9486 = vmatmul.mubr.msk.f32.gmra.mrb[16].mxu0 %vm256_vm0, %v11685_v28 }
  0x89   : > { %9488 = vmatprep.mubr.msk.f32.mxu0 %vm256_vm0, %v11687_v27 }
  0x8c   : > { %9489 = vmatmul.mubr.msk.f32.gmra.mrb[18].mxu0 %vm256_vm0, %v11693_v26 }
  0x8d   : > { %9491 = vmatprep.mubr.msk.f32.mxu0 %vm256_vm0, %v11695_v25 }
  0x90   : > { %9492 = vmatmul.mubr.msk.f32.gmra.mrb[20].mxu0 %vm256_vm0, %v11701_v24 }
  0x91   : > { %9494 = vmatprep.mubr.msk.f32.mxu0 %vm256_vm0, %v11703_v23 }
  0x94   : > { %9495 = vmatmul.mubr.msk.f32.gmra.mrb[22].mxu0 %vm256_vm0, %v11709_v20 }
  0x95   : > { %9497 = vmatprep.mubr.msk.f32.mxu0 %vm256_vm0, %v11711_v19 }
  0x98   : > { %9498 = vmatmul.mubr.msk.f32.gmra.mrb[24].mxu0 %vm256_vm0, %v11722_v17 }
  0x99   : > { %9500 = vmatprep.mubr.msk.f32.mxu0 %vm256_vm0, %v11724_v16 }
  0x9c   : > { %9501 = vmatmul.mubr.msk.f32.gmra.mrb[26].mxu0 %vm256_vm0, %v11730_v15 }
  0x9d   : > { %9503 = vmatprep.mubr.msk.f32.mxu0 %vm256_vm0, %v11732_v14 }
  0xa0   : > { %9504 = vmatmul.mubr.msk.f32.gmra.mrb[28].mxu0 %vm256_vm0, %v11744_v9 }
  0xa1   : > { %9506 = vmatprep.mubr.msk.f32.mxu0 %vm256_vm0, %v11746_v12 }
  0xa4   : > { %9507 = vmatmul.mubr.msk.f32.gmra.mrb[30].mxu0 %vm256_vm0, %v11752_v13 }
  0xa5   : > { %9517 = vmatprep.mubr.msk.f32.mxu0 %vm256_vm0, %v1082_v11  ;;  %v11775_v11 = vld [vmem:[#allocation2 + $0x22] sm:$0xff] }
  0xa8   : > { %9518 = vmatmul.mubr.msk.f32.vlgmr.msra.gmra.mrb[0].mxu0 %vm256_vm0, %v1083_v38  ;;  %v11787_v38 = vld [vmem:[#allocation2 + $0x4a] sm:$0xff] }
  0xa9   : > { %10432 = vmatpush3.bf16.msra.mxu0 %v11630_v60  ;;  %9520 = vmatprep.mubr.msk.f32.mxu0 %vm256_vm0, %v11763_v21  ;;  %14357 = vst [vmem:[#allocation45_spill] sm:$0xff] %v11787_v38  ;;  %v11804_v60 = vld [vmem:[#allocation2 + $0x7a] sm:$0xff] }
  0xaa   : > { %10434 = vmatprep.subr.bf16.mxu0 %v10433_v7  ;;  %14361 = vst [vmem:[#allocation49_spill] sm:$0xff] %v11804_v60 }
  0xac   : > { %9521 = vmatmul.mubr.msk.f32.gmra.mrb[2].mxu0 %vm256_vm0, %v11775_v11 }
  0xad   : > { %9523 = vmatprep.mubr.msk.f32.mxu0 %vm256_vm0, %v11777_v59  ;;  %10436 = vmatpush3.bf16.msra.mxu0 %v10433_v7  ;;  %v11802_v7 = vld [vmem:[#allocation2 + $0x6a] sm:$0xff] }
  0xae   : > { %10438 = vmatprep.subr.bf16.mxu0 %v11779_v10  ;;  %14360 = vst [vmem:[#allocation48_spill] sm:$0xff] %v11802_v7 }
  0xb0   : > { %9524 = vmatmul.mubr.msk.f32.gmra.mrb[4].mxu0 %vm256_vm0, %v11785_v18  ;;  %v11812_v18 = vld [vmem:[#allocation2 + $0x92] sm:$0xff] }
  0xb1   : > { %9526 = vmatprep.mubr.msk.f32.mxu0 %vm256_vm0, %v11787_v38  ;;  %v11810_v38 = vld [vmem:[#allocation2 + $0x82] sm:$0xff]  ;;  %14363 = vst [vmem:[#allocation51_spill] sm:$0xff] %v11812_v18 }
  0xb2   : > { %14362 = vst [vmem:[#allocation50_spill] sm:$0xff] %v11810_v38 }
  0xb4   : > { %9527 = vmatmul.mubr.msk.f32.gmra.mrb[6].mxu0 %vm256_vm0, %v11794_v62  ;;  %v11820_v62 = vld [vmem:[#allocation2 + $0xaa] sm:$0xff] }
  0xb5   : > { %9529 = vmatprep.mubr.msk.f32.mxu0 %vm256_vm0, %v11796_v4  ;;  %v11818_v4 = vld [vmem:[#allocation2 + $0x9a] sm:$0xff]  ;;  %14365 = vst [vmem:[#allocation53_spill] sm:$0xff] %v11820_v62 }
  0xb6   : > { %14364 = vst [vmem:[#allocation52_spill] sm:$0xff] %v11818_v4 }
  0xb8   : > { %9530 = vmatmul.mubr.msk.f32.gmra.mrb[8].mxu0 %vm256_vm0, %v11802_v7  ;;  %v11828_v7 = vld [vmem:[#allocation2 + $0xc2] sm:$0xff] }
  0xb9   : > { %9532 = vmatprep.mubr.msk.f32.mxu0 %vm256_vm0, %v11804_v60  ;;  %v11826_v60 = vld [vmem:[#allocation2 + $0xb2] sm:$0xff]  ;;  %14367 = vst [vmem:[#allocation55_spill] sm:$0xff] %v11828_v7 }
  0xba   : > { %14366 = vst [vmem:[#allocation54_spill] sm:$0xff] %v11826_v60 }
  0xbc   : > { %9533 = vmatmul.mubr.msk.f32.gmra.mrb[10].mxu0 %vm256_vm0, %v11810_v38  ;;  %v11836_v38 = vld [vmem:[#allocation2 + $0xda] sm:$0xff] }
  0xbd   : > { %9535 = vmatprep.mubr.msk.f32.mxu0 %vm256_vm0, %v11812_v18  ;;  %v11834_v18 = vld [vmem:[#allocation2 + $0xca] sm:$0xff]  ;;  %14369 = vst [vmem:[#allocation57_spill] sm:$0xff] %v11836_v38 }
  0xbe   : > { %14368 = vst [vmem:[#allocation56_spill] sm:$0xff] %v11834_v18 }
  0xc0   : > { %9536 = vmatmul.mubr.msk.f32.gmra.mrb[12].mxu0 %vm256_vm0, %v11818_v4  ;;  %v11844_v4 = vld [vmem:[#allocation2 + $0xf2] sm:$0xff] }
  0xc1   : > { %9538 = vmatprep.mubr.msk.f32.mxu0 %vm256_vm0, %v11820_v62  ;;  %v11842_v62 = vld [vmem:[#allocation2 + $0xe2] sm:$0xff]  ;;  %14371 = vst [vmem:[#allocation59_spill] sm:$0xff] %v11844_v4 }
  0xc2   : > { %14370 = vst [vmem:[#allocation58_spill] sm:$0xff] %v11842_v62 }
  0xc4   : > { %9539 = vmatmul.mubr.msk.f32.gmra.mrb[14].mxu0 %vm256_vm0, %v11826_v60  ;;  %v11852_v60 = vld [vmem:[#allocation2 + $0x10a] sm:$0xff] }
  0xc5   : > { %9541 = vmatprep.mubr.msk.f32.mxu0 %vm256_vm0, %v11828_v7  ;;  %v11850_v7 = vld [vmem:[#allocation2 + $0xfa] sm:$0xff]  ;;  %14373 = vst [vmem:[#allocation61_spill] sm:$0xff] %v11852_v60 }
  0xc6   : > { %14372 = vst [vmem:[#allocation60_spill] sm:$0xff] %v11850_v7 }
  0xc8   : > { %9542 = vmatmul.mubr.msk.f32.gmra.mrb[16].mxu0 %vm256_vm0, %v11834_v18  ;;  %v11860_v18 = vld [vmem:[#allocation2 + $0x122] sm:$0xff] }
  0xc9   : > { %9544 = vmatprep.mubr.msk.f32.mxu0 %vm256_vm0, %v11836_v38  ;;  %v11858_v38 = vld [vmem:[#allocation2 + $0x112] sm:$0xff]  ;;  %14375 = vst [vmem:[#allocation63_spill] sm:$0xff] %v11860_v18 }
  0xca   : > { %14374 = vst [vmem:[#allocation62_spill] sm:$0xff] %v11858_v38 }
  0xcc   : > { %9545 = vmatmul.mubr.msk.f32.gmra.mrb[18].mxu0 %vm256_vm0, %v11842_v62  ;;  %v11868_v62 = vld [vmem:[#allocation2 + $0x13a] sm:$0xff] }
  0xcd   : > { %9547 = vmatprep.mubr.msk.f32.mxu0 %vm256_vm0, %v11844_v4  ;;  %v11866_v4 = vld [vmem:[#allocation2 + $0x12a] sm:$0xff]  ;;  %14377 = vst [vmem:[#allocation65_spill] sm:$0xff] %v11868_v62 }
  0xce   : > { %14376 = vst [vmem:[#allocation64_spill] sm:$0xff] %v11866_v4 }
  0xd0   : > { %9548 = vmatmul.mubr.msk.f32.gmra.mrb[20].mxu0 %vm256_vm0, %v11850_v7  ;;  %v11876_v7 = vld [vmem:[#allocation2 + $0x152] sm:$0xff] }
  0xd1   : > { %9550 = vmatprep.mubr.msk.f32.mxu0 %vm256_vm0, %v11852_v60  ;;  %v11874_v60 = vld [vmem:[#allocation2 + $0x142] sm:$0xff]  ;;  %14379 = vst [vmem:[#allocation67_spill] sm:$0xff] %v11876_v7 }
  0xd2   : > { %14378 = vst [vmem:[#allocation66_spill] sm:$0xff] %v11874_v60 }
  0xd4   : > { %9551 = vmatmul.mubr.msk.f32.gmra.mrb[22].mxu0 %vm256_vm0, %v11858_v38  ;;  %v11884_v38 = vld [vmem:[#allocation2 + $0x16a] sm:$0xff] }
  0xd5   : > { %9553 = vmatprep.mubr.msk.f32.mxu0 %vm256_vm0, %v11860_v18  ;;  %v11882_v18 = vld [vmem:[#allocation2 + $0x15a] sm:$0xff]  ;;  %14381 = vst [vmem:[#allocation69_spill] sm:$0xff] %v11884_v38 }
  0xd6   : > { %14380 = vst [vmem:[#allocation68_spill] sm:$0xff] %v11882_v18 }
  0xd8   : > { %9554 = vmatmul.mubr.msk.f32.gmra.mrb[24].mxu0 %vm256_vm0, %v11866_v4  ;;  %v8242_v4 = vld [vmem:[%s14154_s1 + $0x90] sm:$0xff] }
  0xd9   : > { %9556 = vmatprep.mubr.msk.f32.mxu0 %vm256_vm0, %v11868_v62  ;;  %v11890_v62 = vld [vmem:[#allocation2 + $0x172] sm:$0xff] }
  0xda   : > { %14382 = vst [vmem:[#allocation70_spill] sm:$0xff] %v11890_v62 }
  0xdc   : > { %9557 = vmatmul.mubr.msk.f32.gmra.mrb[26].mxu0 %vm256_vm0, %v11874_v60  ;;  %v8277_v60 = vld [vmem:[%s14154_s1 + $0xa8] sm:$0xff] }
  0xdd   : > { %9559 = vmatprep.mubr.msk.f32.mxu0 %vm256_vm0, %v11876_v7  ;;  %v8243_v7 = vld [vmem:[%s14154_s1 + $0x98] sm:$0xff] }
  0xe0   : > { %9560 = vmatmul.mubr.msk.f32.gmra.mrb[28].mxu0 %vm256_vm0, %v11882_v18  ;;  %v10441_v18 = vpack.c.bf16 %v8243_v7, %v8242_v4  ;;  %v8312_v7 = vld [vmem:[%s14154_s1 + $0xc0] sm:$0xff] }
  0xe1   : > { %9562 = vmatprep.mubr.msk.f32.mxu0 %vm256_vm0, %v11884_v38  ;;  %v8276_v38 = vld [vmem:[%s14154_s1 + $0xa0] sm:$0xff] }
  0xe4   : > { %9563 = vmatmul.mubr.msk.f32.gmra.mrb[30].mxu0 %vm256_vm0, %v11890_v62  ;;  %v10445_v62 = vpack.c.bf16 %v8277_v60, %v8276_v38  ;;  %v8279_v38 = vld [vmem:[%s14154_s1 + $0xb8] sm:$0xff]  ;;  %v8313_v60 = vld [vmem:[%s14154_s1 + $0xc8] sm:$0xff] }
  0xe5   : > { %9573 = vmatprep.mubr.msk.f32.mxu0 %vm256_vm0, %v11614_v50  ;;  %v347_v50 = vld [vmem:[#allocation2 + $0x18f] sm:$0x1] }
  0xe6   : > { %365 = vst.msk [vmem:[#allocation2 + $0x191] sm:$0x1] %vm312_vm1, %v347_v50  ;;  %v10453_v50 = vpack.c.bf16 %v8313_v60, %v8312_v7  ;;  %v14404_v7 = vld [vmem:[#allocation59_spill] sm:$0xff]  ;;  %v14405_v60 = vld [vmem:[#allocation60_spill] sm:$0xff] }
  0xe8   : > { %9574 = vmatmul.mubr.msk.f32.vlgmr.msra.gmra.mrb[0].mxu0 %vm256_vm0, %v11626_v54  ;;  %v11966_v54 = vld [vmem:[#allocation2 + $0x180] sm:$0xff] }
  0xe9   : > { %10440 = vmatpush3.bf16.msra.mxu0 %v11779_v10  ;;  %9576 = vmatprep.mubr.msk.f32.mxu0 %vm256_vm0, %v11628_v46  ;;  %v11972_v10 = vld [vmem:[#allocation2 + $0x188] sm:$0xff] }
  0xea   : > { %10442 = vmatprep.subr.bf16.mxu0 %v10441_v18 }
  0xec   : > { %9577 = vmatmul.mubr.msk.f32.gmra.mrb[2].mxu0 %vm256_vm0, %v11636_v5 }
  0xed   : > { %9579 = vmatprep.mubr.msk.f32.mxu0 %vm256_vm0, %v11638_v43  ;;  %10444 = vmatpush3.bf16.msra.mxu0 %v10441_v18  ;;  %v8278_v18 = vld [vmem:[%s14154_s1 + $0xb0] sm:$0xff] }
  0xee   : > { %10446 = vmatprep.subr.bf16.mxu0 %v10445_v62  ;;  %v10449_v4 = vpack.c.bf16 %v8279_v38, %v8278_v18  ;;  %v14401_v18 = vld [vmem:[#allocation56_spill] sm:$0xff]  ;;  %v14402_v38 = vld [vmem:[#allocation57_spill] sm:$0xff] }
  0xf0   : > { %9580 = vmatmul.mubr.msk.f32.gmra.mrb[4].mxu0 %vm256_vm0, %v11645_v47 }
  0xf1   : > { %9582 = vmatprep.mubr.msk.f32.mxu0 %vm256_vm0, %v11647_v48 }
  0xf4   : > { %9583 = vmatmul.mubr.msk.f32.gmra.mrb[6].mxu0 %vm256_vm0, %v11653_v49 }
  0xf5   : > { %9585 = vmatprep.mubr.msk.f32.mxu0 %vm256_vm0, %v11655_v51 }
  0xf8   : > { %9586 = vmatmul.mubr.msk.f32.gmra.mrb[8].mxu0 %vm256_vm0, %v11661_v34 }
  0xf9   : > { %9588 = vmatprep.mubr.msk.f32.mxu0 %vm256_vm0, %v11663_v33 }
  0xfc   : > { %9589 = vmatmul.mubr.msk.f32.gmra.mrb[10].mxu0 %vm256_vm0, %v11669_v32 }
  0xfd   : > { %9591 = vmatprep.mubr.msk.f32.mxu0 %vm256_vm0, %v11671_v31 }
 0x100   : > { %9592 = vmatmul.mubr.msk.f32.gmra.mrb[12].mxu0 %vm256_vm0, %v11677_v30 }
 0x101   : > { %9594 = vmatprep.mubr.msk.f32.mxu0 %vm256_vm0, %v11679_v29 }
 0x104   : > { %9595 = vmatmul.mubr.msk.f32.gmra.mrb[14].mxu0 %vm256_vm0, %v11685_v28 }
 0x105   : > { %9597 = vmatprep.mubr.msk.f32.mxu0 %vm256_vm0, %v11687_v27 }
 0x108   : > { %9598 = vmatmul.mubr.msk.f32.gmra.mrb[16].mxu0 %vm256_vm0, %v11693_v26 }
 0x109   : > { %9600 = vmatprep.mubr.msk.f32.mxu0 %vm256_vm0, %v11695_v25 }
 0x10c   : > { %9601 = vmatmul.mubr.msk.f32.gmra.mrb[18].mxu0 %vm256_vm0, %v11701_v24 }
 0x10d   : > { %9603 = vmatprep.mubr.msk.f32.mxu0 %vm256_vm0, %v11703_v23 }
 0x110   : > { %9604 = vmatmul.mubr.msk.f32.gmra.mrb[20].mxu0 %vm256_vm0, %v11709_v20 }
 0x111   : > { %9606 = vmatprep.mubr.msk.f32.mxu0 %vm256_vm0, %v11711_v19 }
 0x114   : > { %9607 = vmatmul.mubr.msk.f32.gmra.mrb[22].mxu0 %vm256_vm0, %v11722_v17 }
 0x115   : > { %9609 = vmatprep.mubr.msk.f32.mxu0 %vm256_vm0, %v11724_v16 }
 0x118   : > { %9610 = vmatmul.mubr.msk.f32.gmra.mrb[24].mxu0 %vm256_vm0, %v11730_v15 }
 0x119   : > { %9612 = vmatprep.mubr.msk.f32.mxu0 %vm256_vm0, %v11732_v14 }
 0x11c   : > { %9613 = vmatmul.mubr.msk.f32.gmra.mrb[26].mxu0 %vm256_vm0, %v11744_v9 }
 0x11d   : > { %9615 = vmatprep.mubr.msk.f32.mxu0 %vm256_vm0, %v11746_v12 }
 0x120   : > { %9616 = vmatmul.mubr.msk.f32.gmra.mrb[28].mxu0 %vm256_vm0, %v11752_v13 }
 0x121   : > { %9618 = vmatprep.mubr.msk.f32.mxu0 %vm256_vm0, %v11966_v54 }
 0x124   : > { %9619 = vmatmul.mubr.msk.f32.gmra.mrb[30].mxu0 %vm256_vm0, %v11972_v10 }
 0x125   : > { %9629 = vmatprep.mubr.msk.f32.mxu0 %vm256_vm0, %v11403_v37  ;;  %v14383_v37 = vld [vmem:[#allocation36_spill] sm:$0xff] }
 0x128   : > { %9630 = vmatmul.mubr.msk.f32.vlgmr.msra.gmra.mrb[0].mxu0 %vm256_vm0, %v11422_v41  ;;  %v14384_v41 = vld [vmem:[#allocation37_spill] sm:$0xff] }
 0x129   : > { %10448 = vmatpush3.bf16.msra.mxu0 %v10445_v62  ;;  %9632 = vmatprep.mubr.msk.f32.mxu0 %vm256_vm0, %v11424_v42  ;;  %v14385_v42 = vld [vmem:[#allocation38_spill] sm:$0xff]  ;;  %v14400_v62 = vld [vmem:[#allocation55_spill] sm:$0xff] }
 0x12a   : > { %10450 = vmatprep.subr.bf16.mxu0 %v10449_v4 }
 0x12c   : > { %9633 = vmatmul.mubr.msk.f32.gmra.mrb[2].mxu0 %vm256_vm0, %v11432_v44  ;;  %v311_v44 = vld [vmem:[#allocation2 + $0x19a] sm:$0x1] }
 0x12d   : > { %9635 = vmatprep.mubr.msk.f32.mxu0 %vm256_vm0, %v11434_v45  ;;  %10452 = vmatpush3.bf16.msra.mxu0 %v10449_v4  ;;  %330 = vst.msk [vmem:[#allocation2 + $0x198] sm:$0x1] %vm312_vm1, %v311_v44  ;;  %v14386_v45 = vld [vmem:[#allocation39_spill] sm:$0xff]  ;;  %v14403_v4 = vld [vmem:[#allocation58_spill] sm:$0xff]  ;;  %v14410_v44 = vld [vmem:[#allocation65_spill] sm:$0xff] }
 0x12e   : > { %10454 = vmatprep.subr.bf16.mxu0 %v10453_v50 }
 0x130   : > { %9636 = vmatmul.mubr.msk.f32.gmra.mrb[4].mxu0 %vm256_vm0, %v11467_v53  ;;  %v14387_v53 = vld [vmem:[#allocation40_spill] sm:$0xff] }
 0x131   : > { %9638 = vmatprep.mubr.msk.f32.mxu0 %vm256_vm0, %v11478_v55  ;;  %v12047_v55 = vld [vmem:[#allocation2 + $0x181] sm:$0xff] }
 0x134   : > { %9639 = vmatmul.mubr.msk.f32.gmra.mrb[6].mxu0 %vm256_vm0, %v11488_v61  ;;  %v14388_v61 = vld [vmem:[#allocation41_spill] sm:$0xff] }
 0x135   : > { %9641 = vmatprep.mubr.msk.f32.mxu0 %vm256_vm0, %v11492_v63  ;;  %v12053_v63 = vld [vmem:[#allocation2 + $0x189] sm:$0xff] }
 0x138   : > { %9642 = vmatmul.mubr.msk.f32.gmra.mrb[8].mxu0 %vm256_vm0, %v11500_v1  ;;  %v8314_v1 = vld [vmem:[%s14154_s1 + $0xd0] sm:$0xff] }
 0x139   : > { %9644 = vmatprep.mubr.msk.f32.mxu0 %vm256_vm0, %v11502_v3  ;;  %v8315_v3 = vld [vmem:[%s14154_s1 + $0xd8] sm:$0xff] }
 0x13c   : > { %9645 = vmatmul.mubr.msk.f32.gmra.mrb[10].mxu0 %vm256_vm0, %v11511_v6  ;;  %v10457_v6 = vpack.c.bf16 %v8315_v3, %v8314_v1  ;;  %v14414_v1 = vld [vmem:[#allocation69_spill] sm:$0xff] }
 0x13d   : > { %9647 = vmatprep.mubr.msk.f32.mxu0 %vm256_vm0, %v11513_v8  ;;  %v8348_v8 = vld [vmem:[%s14154_s1 + $0xe0] sm:$0xff] }
 0x13e   : > { %v12127_v3 = vld [vmem:[#allocation2 + $0x182] sm:$0xff] }
 0x13f   : > { %14415 = vst [vmem:[#allocation36_spill] sm:$0xff] %v12127_v3 }
 0x140   : > { %9648 = vmatmul.mubr.msk.f32.gmra.mrb[12].mxu0 %vm256_vm0, %v11523_v36  ;;  %v8349_v36 = vld [vmem:[%s14154_s1 + $0xe8] sm:$0xff] }
 0x141   : > { %9650 = vmatprep.mubr.msk.f32.mxu0 %vm256_vm0, %v11525_v39  ;;  %v10461_v39 = vpack.c.bf16 %v8349_v36, %v8348_v8  ;;  %v12133_v8 = vld [vmem:[#allocation2 + $0x18a] sm:$0xff] }
 0x142   : > { %14417 = vst [vmem:[#allocation37_spill] sm:$0xff] %v12133_v8  ;;  %v8350_v36 = vld [vmem:[%s14154_s1 + $0xf0] sm:$0xff] }
 0x144   : > { %9651 = vmatmul.mubr.msk.f32.gmra.mrb[14].mxu0 %vm256_vm0, %v11534_v56  ;;  %v14389_v56 = vld [vmem:[#allocation44_spill] sm:$0xff] }
 0x145   : > { %9653 = vmatprep.mubr.msk.f32.mxu0 %vm256_vm0, %v11537_v58  ;;  %v14390_v58 = vld [vmem:[#allocation45_spill] sm:$0xff] }
 0x148   : > { %9654 = vmatmul.mubr.msk.f32.gmra.mrb[16].mxu0 %vm256_vm0, %v11546_v0  ;;  %v14391_v0 = vld [vmem:[#allocation46_spill] sm:$0xff] }
 0x149   : > { %9656 = vmatprep.mubr.msk.f32.mxu0 %vm256_vm0, %v11549_v2  ;;  %v14392_v2 = vld [vmem:[#allocation47_spill] sm:$0xff] }
 0x14c   : > { %9657 = vmatmul.mubr.msk.f32.gmra.mrb[18].mxu0 %vm256_vm0, %v11558_v22  ;;  %v14393_v22 = vld [vmem:[#allocation48_spill] sm:$0xff] }
 0x14d   : > { %9659 = vmatprep.mubr.msk.f32.mxu0 %vm256_vm0, %v11561_v35  ;;  %v14394_v35 = vld [vmem:[#allocation49_spill] sm:$0xff] }
 0x150   : > { %9660 = vmatmul.mubr.msk.f32.gmra.mrb[20].mxu0 %vm256_vm0, %v11568_v40  ;;  %v14395_v40 = vld [vmem:[#allocation50_spill] sm:$0xff] }
 0x151   : > { %9662 = vmatprep.mubr.msk.f32.mxu0 %vm256_vm0, %v11570_v52  ;;  %v14396_v52 = vld [vmem:[#allocation51_spill] sm:$0xff] }
 0x154   : > { %9663 = vmatmul.mubr.msk.f32.gmra.mrb[22].mxu0 %vm256_vm0, %v11577_v57  ;;  %v14397_v57 = vld [vmem:[#allocation52_spill] sm:$0xff] }
 0x155   : > { %9665 = vmatprep.mubr.msk.f32.mxu0 %vm256_vm0, %v14383_v37  ;;  %v14407_v37 = vld [vmem:[#allocation62_spill] sm:$0xff] }
 0x158   : > { %9666 = vmatmul.mubr.msk.f32.gmra.mrb[24].mxu0 %vm256_vm0, %v14384_v41  ;;  %v14408_v41 = vld [vmem:[#allocation63_spill] sm:$0xff] }
 0x159   : > { %9668 = vmatprep.mubr.msk.f32.mxu0 %vm256_vm0, %v14385_v42  ;;  %v14409_v42 = vld [vmem:[#allocation64_spill] sm:$0xff] }
 0x15c   : > { %9669 = vmatmul.mubr.msk.f32.gmra.mrb[26].mxu0 %vm256_vm0, %v14386_v45  ;;  %v14411_v45 = vld [vmem:[#allocation66_spill] sm:$0xff] }
 0x15d   : > { %9671 = vmatprep.mubr.msk.f32.mxu0 %vm256_vm0, %v14387_v53  ;;  %v14412_v53 = vld [vmem:[#allocation67_spill] sm:$0xff] }
 0x160   : > { %9672 = vmatmul.mubr.msk.f32.gmra.mrb[28].mxu0 %vm256_vm0, %v14388_v61  ;;  %v14413_v61 = vld [vmem:[#allocation68_spill] sm:$0xff] }
 0x161   : > { %9674 = vmatprep.mubr.msk.f32.mxu0 %vm256_vm0, %v12047_v55 }
 0x164   : > { %9675 = vmatmul.mubr.msk.f32.gmra.mrb[30].mxu0 %vm256_vm0, %v12053_v63 }
 0x165   : > { %9685 = vmatprep.mubr.msk.f32.mxu0 %vm256_vm0, %v11763_v21  ;;  %v14398_v21 = vld [vmem:[#allocation53_spill] sm:$0xff] }
 0x168   : > { %9686 = vmatmul.mubr.msk.f32.vlgmr.msra.gmra.mrb[0].mxu0 %vm256_vm0, %v11775_v11  ;;  %v14399_v11 = vld [vmem:[#allocation54_spill] sm:$0xff] }
 0x169   : > { %10456 = vmatpush3.bf16.msra.mxu0 %v10453_v50  ;;  %9688 = vmatprep.mubr.msk.f32.mxu0 %vm256_vm0, %v11777_v59  ;;  %v14406_v50 = vld [vmem:[#allocation61_spill] sm:$0xff] }
 0x16a   : > { %10458 = vmatprep.subr.bf16.mxu0 %v10457_v6 }
 0x16c   : > { %9689 = vmatmul.mubr.msk.f32.gmra.mrb[2].mxu0 %vm256_vm0, %v14389_v56 }
 0x16d   : > { %9691 = vmatprep.mubr.msk.f32.mxu0 %vm256_vm0, %v14390_v58  ;;  %10460 = vmatpush3.bf16.msra.mxu0 %v10457_v6  ;;  %v14416_v6 = vld [vmem:[#allocation70_spill] sm:$0xff] }
 0x16e   : > { %10462 = vmatprep.subr.bf16.mxu0 %v10461_v39 }
 0x170   : > { %9692 = vmatmul.mubr.msk.f32.gmra.mrb[4].mxu0 %vm256_vm0, %v14391_v0 }
 0x171   : > { %9694 = vmatprep.mubr.msk.f32.mxu0 %vm256_vm0, %v14392_v2 }
 0x174   : > { %9695 = vmatmul.mubr.msk.f32.gmra.mrb[6].mxu0 %vm256_vm0, %v14393_v22 }
 0x175   : > { %9697 = vmatprep.mubr.msk.f32.mxu0 %vm256_vm0, %v14394_v35 }
 0x178   : > { %9698 = vmatmul.mubr.msk.f32.gmra.mrb[8].mxu0 %vm256_vm0, %v14395_v40 }
 0x179   : > { %9700 = vmatprep.mubr.msk.f32.mxu0 %vm256_vm0, %v14396_v52 }
 0x17c   : > { %9701 = vmatmul.mubr.msk.f32.gmra.mrb[10].mxu0 %vm256_vm0, %v14397_v57 }
 0x17d   : > { %9703 = vmatprep.mubr.msk.f32.mxu0 %vm256_vm0, %v14398_v21 }
 0x180   : > { %9704 = vmatmul.mubr.msk.f32.gmra.mrb[12].mxu0 %vm256_vm0, %v14399_v11 }
 0x181   : > { %9706 = vmatprep.mubr.msk.f32.mxu0 %vm256_vm0, %v14400_v62 }
 0x184   : > { %9707 = vmatmul.mubr.msk.f32.gmra.mrb[14].mxu0 %vm256_vm0, %v14401_v18 }
 0x185   : > { %9709 = vmatprep.mubr.msk.f32.mxu0 %vm256_vm0, %v14402_v38 }
 0x188   : > { %9710 = vmatmul.mubr.msk.f32.gmra.mrb[16].mxu0 %vm256_vm0, %v14403_v4 }
 0x189   : > { %9712 = vmatprep.mubr.msk.f32.mxu0 %vm256_vm0, %v14404_v7 }
 0x18c   : > { %9713 = vmatmul.mubr.msk.f32.gmra.mrb[18].mxu0 %vm256_vm0, %v14405_v60 }
 0x18d   : > { %9715 = vmatprep.mubr.msk.f32.mxu0 %vm256_vm0, %v14406_v50 }
 0x190   : > { %9716 = vmatmul.mubr.msk.f32.gmra.mrb[20].mxu0 %vm256_vm0, %v14407_v37 }
 0x191   : > { %9718 = vmatprep.mubr.msk.f32.mxu0 %vm256_vm0, %v14408_v41 }
 0x194   : > { %9719 = vmatmul.mubr.msk.f32.gmra.mrb[22].mxu0 %vm256_vm0, %v14409_v42 }
 0x195   : > { %9721 = vmatprep.mubr.msk.f32.mxu0 %vm256_vm0, %v14410_v44 }
 0x198   : > { %9722 = vmatmul.mubr.msk.f32.gmra.mrb[24].mxu0 %vm256_vm0, %v14411_v45 }
 0x199   : > { %9724 = vmatprep.mubr.msk.f32.mxu0 %vm256_vm0, %v14412_v53 }
 0x19c   : > { %9725 = vmatmul.mubr.msk.f32.gmra.mrb[26].mxu0 %vm256_vm0, %v14413_v61  ;;  %v8351_v61 = vld [vmem:[%s14154_s1 + $0xf8] sm:$0xff] }
 0x19d   : > { %9727 = vmatprep.mubr.msk.f32.mxu0 %vm256_vm0, %v14414_v1  ;;  %v8385_v1 = vld [vmem:[%s14154_s1 + $0x108] sm:$0xff] }
 0x1a0   : > { %9728 = vmatmul.mubr.msk.f32.gmra.mrb[28].mxu0 %vm256_vm0, %v14416_v6  ;;  %v10465_v6 = vpack.c.bf16 %v8351_v61, %v8350_v36  ;;  %v3058_v61 = vld [vmem:[#allocation2 + $0x159] sm:$0xff] }
 0x1a1   : > { %9730 = vmatprep.mubr.msk.f32.mxu0 %vm256_vm0, %v12127_v3  ;;  %v8384_v3 = vld [vmem:[%s14154_s1 + $0x100] sm:$0xff] }
 0x1a4   : > { %9731 = vmatmul.mubr.msk.f32.gmra.mrb[30].mxu0 %vm256_vm0, %v12133_v8  ;;  %v10469_v8 = vpack.c.bf16 %v8385_v1, %v8384_v3  ;;  %v3059_v1 = vld [vmem:[#allocation2 + $0x169] sm:$0xff]  ;;  %v3060_v3 = vld [vmem:[#allocation2 + $0x171] sm:$0xff] }
 0x1a5   : > { %9741 = vmatprep.mubr.msk.f32.mxu0 %vm256_vm0, %v11628_v46  ;;  %v3047_v46 = vld [vmem:[#allocation2 + $0xd9] sm:$0xff] }
 0x1a8   : > { %9742 = vmatmul.mubr.msk.f32.vlgmr.msra.gmra.mrb[0].mxu0 %vm256_vm0, %v11636_v5  ;;  %v3048_v5 = vld [vmem:[#allocation2 + $0xe1] sm:$0xff] }
 0x1a9   : > { %10464 = vmatpush3.bf16.msra.mxu0 %v10461_v39  ;;  %9744 = vmatprep.mubr.msk.f32.mxu0 %vm256_vm0, %v11638_v43  ;;  %v3049_v43 = vld [vmem:[#allocation2 + $0xf1] sm:$0xff] }
 0x1aa   : > { %10466 = vmatprep.subr.bf16.mxu0 %v10465_v6  ;;  %v3057_v39 = vld [vmem:[#allocation2 + $0x151] sm:$0xff] }
 0x1ac   : > { %9745 = vmatmul.mubr.msk.f32.gmra.mrb[2].mxu0 %vm256_vm0, %v11645_v47  ;;  %v3050_v47 = vld [vmem:[#allocation2 + $0xf9] sm:$0xff] }
 0x1ad   : > { %9747 = vmatprep.mubr.msk.f32.mxu0 %vm256_vm0, %v11647_v48  ;;  %10468 = vmatpush3.bf16.msra.mxu0 %v10465_v6  ;;  %v3051_v48 = vld [vmem:[#allocation2 + $0x109] sm:$0xff]  ;;  %v3063_v6 = vld [vmem:[#allocation2 + $0x199] sm:$0xff] }
 0x1ae   : > { %10470 = vmatprep.subr.bf16.mxu0 %v10469_v8 }
 0x1b0   : > { %9748 = vmatmul.mubr.msk.f32.gmra.mrb[4].mxu0 %vm256_vm0, %v11653_v49  ;;  %v3052_v49 = vld [vmem:[#allocation2 + $0x111] sm:$0xff] }
 0x1b1   : > { %9750 = vmatprep.mubr.msk.f32.mxu0 %vm256_vm0, %v11655_v51  ;;  %v3053_v51 = vld [vmem:[#allocation2 + $0x121] sm:$0xff] }
 0x1b4   : > { %9751 = vmatmul.mubr.msk.f32.gmra.mrb[6].mxu0 %vm256_vm0, %v11661_v34  ;;  %v3046_v34 = vld [vmem:[#allocation2 + $0xc9] sm:$0xff] }
 0x1b5   : > { %9753 = vmatprep.mubr.msk.f32.mxu0 %vm256_vm0, %v11663_v33  ;;  %v3045_v33 = vld [vmem:[#allocation2 + $0xc1] sm:$0xff] }
 0x1b8   : > { %9754 = vmatmul.mubr.msk.f32.gmra.mrb[8].mxu0 %vm256_vm0, %v11669_v32  ;;  %v3044_v32 = vld [vmem:[#allocation2 + $0xb1] sm:$0xff] }
 0x1b9   : > { %9756 = vmatprep.mubr.msk.f32.mxu0 %vm256_vm0, %v11671_v31  ;;  %v3043_v31 = vld [vmem:[#allocation2 + $0xa9] sm:$0xff] }
 0x1bc   : > { %9757 = vmatmul.mubr.msk.f32.gmra.mrb[10].mxu0 %vm256_vm0, %v11677_v30  ;;  %v3042_v30 = vld [vmem:[#allocation2 + $0x99] sm:$0xff] }
 0x1bd   : > { %9759 = vmatprep.mubr.msk.f32.mxu0 %vm256_vm0, %v11679_v29  ;;  %v3041_v29 = vld [vmem:[#allocation2 + $0x91] sm:$0xff] }
 0x1c0   : > { %9760 = vmatmul.mubr.msk.f32.gmra.mrb[12].mxu0 %vm256_vm0, %v11685_v28  ;;  %v3040_v28 = vld [vmem:[#allocation2 + $0x81] sm:$0xff] }
 0x1c1   : > { %9762 = vmatprep.mubr.msk.f32.mxu0 %vm256_vm0, %v11687_v27  ;;  %v3039_v27 = vld [vmem:[#allocation2 + $0x79] sm:$0xff] }
 0x1c4   : > { %9763 = vmatmul.mubr.msk.f32.gmra.mrb[14].mxu0 %vm256_vm0, %v11693_v26  ;;  %v3038_v26 = vld [vmem:[#allocation2 + $0x69] sm:$0xff] }
 0x1c5   : > { %9765 = vmatprep.mubr.msk.f32.mxu0 %vm256_vm0, %v11695_v25  ;;  %v3037_v25 = vld [vmem:[#allocation2 + $0x61] sm:$0xff] }
 0x1c8   : > { %9766 = vmatmul.mubr.msk.f32.gmra.mrb[16].mxu0 %vm256_vm0, %v11701_v24  ;;  %v3036_v24 = vld [vmem:[#allocation2 + $0x51] sm:$0xff] }
 0x1c9   : > { %9768 = vmatprep.mubr.msk.f32.mxu0 %vm256_vm0, %v11703_v23 }
 0x1cc   : > { %9769 = vmatmul.mubr.msk.f32.gmra.mrb[18].mxu0 %vm256_vm0, %v11709_v20  ;;  %v348_v20 = vld [vmem:[#allocation2 + $0x1a7] sm:$0x1] }
 0x1cd   : > { %9771 = vmatprep.mubr.msk.f32.mxu0 %vm256_vm0, %v11711_v19  ;;  %366 = vst.msk [vmem:[#allocation2 + $0x1a9] sm:$0x1] %vm312_vm1, %v348_v20  ;;  %v3035_v19 = vld [vmem:[#allocation2 + $0x49] sm:$0xff] }
 0x1d0   : > { %9772 = vmatmul.mubr.msk.f32.gmra.mrb[20].mxu0 %vm256_vm0, %v11722_v17  ;;  %v3034_v17 = vld [vmem:[#allocation2 + $0x39] sm:$0xff] }
 0x1d1   : > { %9774 = vmatprep.mubr.msk.f32.mxu0 %vm256_vm0, %v11724_v16  ;;  %v2673_v16 = vld [vmem:[#allocation2 + $0x198] sm:$0xff] }
 0x1d4   : > { %9775 = vmatmul.mubr.msk.f32.gmra.mrb[22].mxu0 %vm256_vm0, %v11730_v15  ;;  %v8387_v15 = vld [vmem:[%s14154_s1 + $0x118] sm:$0xff] }
 0x1d5   : > { %9777 = vmatprep.mubr.msk.f32.mxu0 %vm256_vm0, %v11732_v14  ;;  %v2674_v14 = vld [vmem:[#allocation2 + $0x1a0] sm:$0xff] }
 0x1d8   : > { %9778 = vmatmul.mubr.msk.f32.gmra.mrb[24].mxu0 %vm256_vm0, %v11744_v9  ;;  %v3033_v9 = vld [vmem:[#allocation2 + $0x31] sm:$0xff] }
 0x1d9   : > { %9780 = vmatprep.mubr.msk.f32.mxu0 %vm256_vm0, %v11746_v12  ;;  %v8386_v12 = vld [vmem:[%s14154_s1 + $0x110] sm:$0xff] }
 0x1da   : > { %v10473_v23 = vpack.c.bf16 %v8387_v15, %v8386_v12 }
 0x1dc   : > { %9781 = vmatmul.mubr.msk.f32.gmra.mrb[26].mxu0 %vm256_vm0, %v11752_v13  ;;  %v3054_v13 = vld [vmem:[#allocation2 + $0x129] sm:$0xff] }
 0x1dd   : > { %9783 = vmatprep.mubr.msk.f32.mxu0 %vm256_vm0, %v11966_v54  ;;  %v3055_v54 = vld [vmem:[#allocation2 + $0x139] sm:$0xff] }
 0x1e0   : > { %9784 = vmatmul.mubr.msk.f32.gmra.mrb[28].mxu0 %vm256_vm0, %v11972_v10  ;;  %v3056_v10 = vld [vmem:[#allocation2 + $0x141] sm:$0xff] }
 0x1e1   : > { %9786 = vmatprep.mubr.msk.f32.mxu0 %vm256_vm0, %v2673_v16 }
 0x1e4   : > { %9787 = vmatmul.mubr.msk.f32.gmra.mrb[30].mxu0 %vm256_vm0, %v2674_v14 }
 0x1e5   : > { %9797 = vmatprep.mubr.msk.f32.mxu0 %vm256_vm0, %v3033_v9 }
 0x1e8   : > { %9798 = vmatmul.mubr.msk.f32.vlgmr.msra.gmra.mrb[0].mxu0 %vm256_vm0, %v3034_v17 }
 0x1e9   : > { %10472 = vmatpush3.bf16.msra.mxu0 %v10469_v8  ;;  %9800 = vmatprep.mubr.msk.f32.mxu0 %vm256_vm0, %v3035_v19  ;;  %v3064_v8 = vld [vmem:[#allocation2 + $0x1a1] sm:$0xff] }
 0x1ea   : > { %10474 = vmatprep.subr.bf16.mxu0 %v10473_v23 }
 0x1ec   : > { %9801 = vmatmul.mubr.msk.f32.gmra.mrb[2].mxu0 %vm256_vm0, %v3036_v24 }
 0x1ed   : > { %9803 = vmatprep.mubr.msk.f32.mxu0 %vm256_vm0, %v3037_v25  ;;  %10476 = vmatpush3.bf16.msra.mxu0 %v10473_v23 }
 0x1f0   : > { %9804 = vmatmul.mubr.msk.f32.gmra.mrb[4].mxu0 %vm256_vm0, %v3038_v26 }
 0x1f1   : > { %9806 = vmatprep.mubr.msk.f32.mxu0 %vm256_vm0, %v3039_v27 }
 0x1f4   : > { %9807 = vmatmul.mubr.msk.f32.gmra.mrb[6].mxu0 %vm256_vm0, %v3040_v28 }
 0x1f5   : > { %9809 = vmatprep.mubr.msk.f32.mxu0 %vm256_vm0, %v3041_v29 }
 0x1f8   : > { %9810 = vmatmul.mubr.msk.f32.gmra.mrb[8].mxu0 %vm256_vm0, %v3042_v30 }
 0x1f9   : > { %9812 = vmatprep.mubr.msk.f32.mxu0 %vm256_vm0, %v3043_v31 }
 0x1fc   : > { %9813 = vmatmul.mubr.msk.f32.gmra.mrb[10].mxu0 %vm256_vm0, %v3044_v32 }
 0x1fd   : > { %9815 = vmatprep.mubr.msk.f32.mxu0 %vm256_vm0, %v3045_v33 }
 0x200   : > { %9816 = vmatmul.mubr.msk.f32.gmra.mrb[12].mxu0 %vm256_vm0, %v3046_v34 }
 0x201   : > { %9818 = vmatprep.mubr.msk.f32.mxu0 %vm256_vm0, %v3047_v46 }
 0x204   : > { %9819 = vmatmul.mubr.msk.f32.gmra.mrb[14].mxu0 %vm256_vm0, %v3048_v5 }
 0x205   : > { %9821 = vmatprep.mubr.msk.f32.mxu0 %vm256_vm0, %v3049_v43 }
 0x208   : > { %9822 = vmatmul.mubr.msk.f32.gmra.mrb[16].mxu0 %vm256_vm0, %v3050_v47 }
 0x209   : > { %9824 = vmatprep.mubr.msk.f32.mxu0 %vm256_vm0, %v3051_v48 }
 0x20c   : > { %9825 = vmatmul.mubr.msk.f32.gmra.mrb[18].mxu0 %vm256_vm0, %v3052_v49 }
 0x20d   : > { %9827 = vmatprep.mubr.msk.f32.mxu0 %vm256_vm0, %v3053_v51 }
 0x210   : > { %9828 = vmatmul.mubr.msk.f32.gmra.mrb[20].mxu0 %vm256_vm0, %v3054_v13 }
 0x211   : > { %9830 = vmatprep.mubr.msk.f32.mxu0 %vm256_vm0, %v3055_v54 }
 0x214   : > { %9831 = vmatmul.mubr.msk.f32.gmra.mrb[22].mxu0 %vm256_vm0, %v3056_v10 }
 0x215   : > { %9833 = vmatprep.mubr.msk.f32.mxu0 %vm256_vm0, %v3057_v39 }
 0x218   : > { %9834 = vmatmul.mubr.msk.f32.gmra.mrb[24].mxu0 %vm256_vm0, %v3058_v61 }
 0x219   : > { %9836 = vmatprep.mubr.msk.f32.mxu0 %vm256_vm0, %v3059_v1 }
 0x21c   : > { %9837 = vmatmul.mubr.msk.f32.gmra.mrb[26].mxu0 %vm256_vm0, %v3060_v3 }
 0x21d   : > { %9839 = vmatprep.mubr.msk.f32.mxu0 %vm256_vm0, %v12047_v55  ;;  %v14419_v55 = vld [vmem:[#allocation69_spill] sm:$0xff] }
 0x220   : > { %9840 = vmatmul.mubr.msk.f32.gmra.mrb[28].mxu0 %vm256_vm0, %v12053_v63  ;;  %v14420_v63 = vld [vmem:[#allocation70_spill] sm:$0xff] }
 0x221   : > { %9842 = vmatprep.mubr.msk.f32.mxu0 %vm256_vm0, %v3063_v6 }
 0x224   : > { %9843 = vmatmul.mubr.msk.f32.gmra.mrb[30].mxu0 %vm256_vm0, %v3064_v8 }
 0x225   : > { %9853 = vmatprep.mubr.msk.f32.mxu0 %vm256_vm0, %v11777_v59  ;;  %v14418_v59 = vld [vmem:[#allocation68_spill] sm:$0xff] }
 0x228   : > { %9854 = vmatmul.mubr.msk.f32.vlgmr.msra.gmra.mrb[0].mxu0 %vm256_vm0, %v14389_v56  ;;  %v14421_v56 = vld [vmem:[#allocation36_spill] sm:$0xff] }
 0x229   : > { %9856 = vmatprep.mubr.msk.f32.mxu0 %vm256_vm0, %v14390_v58  ;;  %v3453_v58 = vld [vmem:[#allocation2 + $0x19a] sm:$0xff] }
 0x22c   : > { %9857 = vmatmul.mubr.msk.f32.gmra.mrb[2].mxu0 %vm256_vm0, %v14391_v0  ;;  %v14422_v0 = vld [vmem:[#allocation37_spill] sm:$0xff] }
 0x22d   : > { %9859 = vmatprep.mubr.msk.f32.mxu0 %vm256_vm0, %v14392_v2  ;;  %v3454_v2 = vld [vmem:[#allocation2 + $0x1a2] sm:$0xff] }
 0x230   : > { %9860 = vmatmul.mubr.msk.f32.gmra.mrb[4].mxu0 %vm256_vm0, %v14393_v22  ;;  %v12317_v22 = vld [vmem:[%s14155_s2] ss:$0 sm:$0xff] }
 0x231   : > { %9862 = vmatprep.mubr.msk.f32.mxu0 %vm256_vm0, %v14394_v35 }
 0x234   : > { %9863 = vmatmul.mubr.msk.f32.gmra.mrb[6].mxu0 %vm256_vm0, %v14395_v40 }
 0x235   : > { %9865 = vmatprep.mubr.msk.f32.mxu0 %vm256_vm0, %v14396_v52 }
 0x238   : > { %9866 = vmatmul.mubr.msk.f32.gmra.mrb[8].mxu0 %vm256_vm0, %v14397_v57 }
 0x239   : > { %9868 = vmatprep.mubr.msk.f32.mxu0 %vm256_vm0, %v14398_v21 }
 0x23c   : > { %9869 = vmatmul.mubr.msk.f32.gmra.mrb[10].mxu0 %vm256_vm0, %v14399_v11 }
 0x23d   : > { %9871 = vmatprep.mubr.msk.f32.mxu0 %vm256_vm0, %v14400_v62 }
 0x240   : > { %9872 = vmatmul.mubr.msk.f32.gmra.mrb[12].mxu0 %vm256_vm0, %v14401_v18 }
 0x241   : > { %9874 = vmatprep.mubr.msk.f32.mxu0 %vm256_vm0, %v14402_v38 }
 0x244   : > { %9875 = vmatmul.mubr.msk.f32.gmra.mrb[14].mxu0 %vm256_vm0, %v14403_v4 }
 0x245   : > { %9877 = vmatprep.mubr.msk.f32.mxu0 %vm256_vm0, %v14404_v7 }
 0x248   : > { %9878 = vmatmul.mubr.msk.f32.gmra.mrb[16].mxu0 %vm256_vm0, %v14405_v60 }
 0x249   : > { %9880 = vmatprep.mubr.msk.f32.mxu0 %vm256_vm0, %v14406_v50 }
 0x24c   : > { %9881 = vmatmul.mubr.msk.f32.gmra.mrb[18].mxu0 %vm256_vm0, %v14407_v37 }
 0x24d   : > { %9883 = vmatprep.mubr.msk.f32.mxu0 %vm256_vm0, %v14408_v41 }
 0x250   : > { %9884 = vmatmul.mubr.msk.f32.gmra.mrb[20].mxu0 %vm256_vm0, %v14409_v42 }
 0x251   : > { %9886 = vmatprep.mubr.msk.f32.mxu0 %vm256_vm0, %v14410_v44 }
 0x254   : > { %9887 = vmatmul.mubr.msk.f32.gmra.mrb[22].mxu0 %vm256_vm0, %v14411_v45 }
 0x255   : > { %9889 = vmatprep.mubr.msk.f32.mxu0 %vm256_vm0, %v14412_v53 }
 0x258   : > { %9890 = vmatmul.mubr.msk.f32.gmra.mrb[24].mxu0 %vm256_vm0, %v14418_v59 }
 0x259   : > { %9892 = vmatprep.mubr.msk.f32.mxu0 %vm256_vm0, %v14419_v55 }
 0x25c   : > { %9893 = vmatmul.mubr.msk.f32.gmra.mrb[26].mxu0 %vm256_vm0, %v14420_v63 }
 0x25d   : > { %9895 = vmatprep.mubr.msk.f32.mxu0 %vm256_vm0, %v14421_v56 }
 0x260   : > { %9896 = vmatmul.mubr.msk.f32.gmra.mrb[28].mxu0 %vm256_vm0, %v14422_v0 }
 0x261   : > { %9898 = vmatprep.mubr.msk.f32.mxu0 %vm256_vm0, %v3453_v58 }
 0x264   : > { %9899 = vmatmul.mubr.msk.f32.gmra.mrb[30].mxu0 %vm256_vm0, %v3454_v2 }
 0x2fb   : > { %v9855_v35 = vpop.f32.mrb[0].mxu0 }
 0x2fc   : > { %v12320_v40 = vadd.f32 %v9855_v35, %v12317_v22  ;;  %v3622_v52 = vpop.f32.mrb[1].mxu0 }
 0x2fd   : > { %v12323_v57 = vadd.f32 %v12317_v22, %v3622_v52 }
 0x2fe   : > { %v3853_v21 = vsel %vm256_vm0, %v12320_v40, 0.0 }
 0x2ff   : > { %v3852_v11 = vsel %vm256_vm0, %v12323_v57, 0.0  ;;  %v9858_v62 = vpop.f32.mrb[2].mxu0 }
 0x300   : > { %v3632_v18 = vpop.f32.mrb[3].mxu0  ;;  %v12330_v38 = vadd.f32 %v9858_v62, %v12317_v22  ;;  %v3854_v7 = vadd.f32 %v3853_v21, %v3852_v11 }
 0x301   : > { %v12333_v4 = vadd.f32 %v12317_v22, %v3632_v18 }
 0x302   : > { %v3857_v42 = vsel %vm256_vm0, %v12330_v38, 0.0 }
 0x303   : > { %v3855_v60 = vsel %vm256_vm0, %v12333_v4, 0.0  ;;  %v9861_v50 = vpop.f32.mrb[4].mxu0 }
 0x304   : > { %v3856_v37 = vadd.f32 %v3855_v60, %v3854_v7  ;;  %v3642_v41 = vpop.f32.mrb[5].mxu0  ;;  %v12340_v44 = vadd.f32 %v9861_v50, %v12317_v22 }
 0x305   : > { %v12343_v45 = vadd.f32 %v12317_v22, %v3642_v41 }
 0x306   : > { %v3858_v53 = vadd.f32 %v3857_v42, %v3856_v37  ;;  %v3861_v9 = vsel %vm256_vm0, %v12340_v44, 0.0 }
 0x307   : > { %v3859_v36 = vsel %vm256_vm0, %v12343_v45, 0.0  ;;  %v9864_v20 = vpop.f32.mrb[6].mxu0 }
 0x308   : > { %v3860_v16 = vadd.f32 %v3859_v36, %v3858_v53  ;;  %v3652_v14 = vpop.f32.mrb[7].mxu0  ;;  %v12350_v12 = vadd.f32 %v9864_v20, %v12317_v22 }
 0x309   : > { %v12353_v15 = vadd.f32 %v12317_v22, %v3652_v14 }
 0x30a   : > { %v3862_v17 = vadd.f32 %v3861_v9, %v3860_v16  ;;  %v3865_v26 = vsel %vm256_vm0, %v12350_v12, 0.0 }
 0x30b   : > { %v3863_v19 = vsel %vm256_vm0, %v12353_v15, 0.0  ;;  %v9867_v23 = vpop.f32.mrb[8].mxu0 }
 0x30c   : > { %v3864_v24 = vadd.f32 %v3863_v19, %v3862_v17  ;;  %v3662_v25 = vpop.f32.mrb[9].mxu0  ;;  %v12360_v27 = vadd.f32 %v9867_v23, %v12317_v22 }
 0x30d   : > { %v12363_v28 = vadd.f32 %v12317_v22, %v3662_v25 }
 0x30e   : > { %v3866_v29 = vadd.f32 %v3865_v26, %v3864_v24  ;;  %v3869_v34 = vsel %vm256_vm0, %v12360_v27, 0.0 }
 0x30f   : > { %v3867_v30 = vsel %vm256_vm0, %v12363_v28, 0.0  ;;  %v9870_v31 = vpop.f32.mrb[10].mxu0 }
 0x310   : > { %v3868_v32 = vadd.f32 %v3867_v30, %v3866_v29  ;;  %v3672_v33 = vpop.f32.mrb[11].mxu0  ;;  %v12370_v46 = vadd.f32 %v9870_v31, %v12317_v22 }
 0x311   : > { %v12373_v5 = vadd.f32 %v12317_v22, %v3672_v33 }
 0x312   : > { %v3870_v43 = vadd.f32 %v3869_v34, %v3868_v32  ;;  %v3873_v13 = vsel %vm256_vm0, %v12370_v46, 0.0 }
 0x313   : > { %v3871_v47 = vsel %vm256_vm0, %v12373_v5, 0.0  ;;  %v9873_v48 = vpop.f32.mrb[12].mxu0 }
 0x314   : > { %v3872_v49 = vadd.f32 %v3871_v47, %v3870_v43  ;;  %v3682_v51 = vpop.f32.mrb[13].mxu0  ;;  %v12380_v54 = vadd.f32 %v9873_v48, %v12317_v22 }
 0x315   : > { %v12383_v10 = vadd.f32 %v12317_v22, %v3682_v51 }
 0x316   : > { %v3874_v39 = vadd.f32 %v3873_v13, %v3872_v49  ;;  %v3877_v8 = vsel %vm256_vm0, %v12380_v54, 0.0 }
 0x317   : > { %v3875_v61 = vsel %vm256_vm0, %v12383_v10, 0.0  ;;  %v9876_v1 = vpop.f32.mrb[14].mxu0 }
 0x318   : > { %v3876_v3 = vadd.f32 %v3875_v61, %v3874_v39  ;;  %v3692_v6 = vpop.f32.mrb[15].mxu0  ;;  %v12390_v59 = vadd.f32 %v9876_v1, %v12317_v22 }
 0x319   : > { %v12393_v55 = vadd.f32 %v12317_v22, %v3692_v6 }
 0x31a   : > { %v3878_v63 = vadd.f32 %v3877_v8, %v3876_v3  ;;  %v3881_v35 = vsel %vm256_vm0, %v12390_v59, 0.0 }
 0x31b   : > { %v3879_v56 = vsel %vm256_vm0, %v12393_v55, 0.0  ;;  %v9879_v58 = vpop.f32.mrb[16].mxu0 }
 0x31c   : > { %v3880_v0 = vadd.f32 %v3879_v56, %v3878_v63  ;;  %v3702_v2 = vpop.f32.mrb[17].mxu0  ;;  %v12400_v52 = vadd.f32 %v9879_v58, %v12317_v22 }
 0x31d   : > { %v12403_v21 = vadd.f32 %v12317_v22, %v3702_v2 }
 0x31e   : > { %v3882_v11 = vadd.f32 %v3881_v35, %v3880_v0  ;;  %v3885_v50 = vsel %vm256_vm0, %v12400_v52, 0.0 }
 0x31f   : > { %v3883_v62 = vsel %vm256_vm0, %v12403_v21, 0.0  ;;  %v9882_v18 = vpop.f32.mrb[18].mxu0 }
 0x320   : > { %v3884_v7 = vadd.f32 %v3883_v62, %v3882_v11  ;;  %v3712_v60 = vpop.f32.mrb[19].mxu0  ;;  %v12410_v37 = vadd.f32 %v9882_v18, %v12317_v22 }
 0x321   : > { %v12413_v41 = vadd.f32 %v12317_v22, %v3712_v60 }
 0x322   : > { %v3886_v42 = vadd.f32 %v3885_v50, %v3884_v7  ;;  %v3889_v14 = vsel %vm256_vm0, %v12410_v37, 0.0 }
 0x323   : > { %v3887_v53 = vsel %vm256_vm0, %v12413_v41, 0.0  ;;  %v9885_v36 = vpop.f32.mrb[20].mxu0 }
 0x324   : > { %v3888_v20 = vadd.f32 %v3887_v53, %v3886_v42  ;;  %v3722_v16 = vpop.f32.mrb[21].mxu0  ;;  %v12420_v9 = vadd.f32 %v9885_v36, %v12317_v22 }
 0x325   : > { %v12423_v17 = vadd.f32 %v12317_v22, %v3722_v16 }
 0x326   : > { %v3890_v19 = vadd.f32 %v3889_v14, %v3888_v20  ;;  %v3893_v29 = vsel %vm256_vm0, %v12420_v9, 0.0 }
 0x327   : > { %v3891_v23 = vsel %vm256_vm0, %v12423_v17, 0.0  ;;  %v9888_v24 = vpop.f32.mrb[22].mxu0 }
 0x328   : > { %v3892_v25 = vadd.f32 %v3891_v23, %v3890_v19  ;;  %v3732_v26 = vpop.f32.mrb[23].mxu0  ;;  %v12430_v30 = vadd.f32 %v9888_v24, %v12317_v22 }
 0x329   : > { %v12433_v31 = vadd.f32 %v12317_v22, %v3732_v26 }
 0x32a   : > { %v3894_v32 = vadd.f32 %v3893_v29, %v3892_v25  ;;  %v3897_v48 = vsel %vm256_vm0, %v12430_v30, 0.0 }
 0x32b   : > { %v3895_v33 = vsel %vm256_vm0, %v12433_v31, 0.0  ;;  %v9891_v34 = vpop.f32.mrb[24].mxu0 }
 0x32c   : > { %v3896_v43 = vadd.f32 %v3895_v33, %v3894_v32  ;;  %v3742_v47 = vpop.f32.mrb[25].mxu0  ;;  %v12440_v49 = vadd.f32 %v9891_v34, %v12317_v22  ;;  %v8421_v34 = vld [vmem:[%s14156_s3 + $0x20] sm:$0xff] }
 0x32d   : > { %v12443_v51 = vadd.f32 %v12317_v22, %v3742_v47 }
 0x32e   : > { %v3898_v13 = vadd.f32 %v3897_v48, %v3896_v43  ;;  %v3901_v6 = vsel %vm256_vm0, %v12440_v49, 0.0  ;;  %v8422_v43 = vld [vmem:[%s14156_s3 + $0x28] sm:$0xff]  ;;  %v8423_v48 = vld [vmem:[%s14156_s3 + $0x30] sm:$0xff] }
 0x32f   : > { %v3899_v39 = vsel %vm256_vm0, %v12443_v51, 0.0  ;;  %v9894_v61 = vpop.f32.mrb[26].mxu0  ;;  %v10477_v47 = vpack.c.bf16 %v8422_v43, %v8421_v34 }
 0x330   : > { %v3900_v1 = vadd.f32 %v3899_v39, %v3898_v13  ;;  %v3752_v3 = vpop.f32.mrb[27].mxu0  ;;  %v3847_v8 = vadd.f32 %v9894_v61, %v12317_v22  ;;  %v8424_v13 = vld [vmem:[%s14156_s3 + $0x38] sm:$0xff] }
 0x331   : > { %v3846_v63 = vadd.f32 %v12317_v22, %v3752_v3  ;;  %10478 = vmatprep.subr.bf16.mxu1 %v10477_v47  ;;  %v10481_v61 = vpack.c.bf16 %v8424_v13, %v8423_v48  ;;  %v4264_v3 = vld [vmem:[%s14156_s3 + $0x8] sm:$0xff] }
 0x332   : > { %v3902_v56 = vadd.f32 %v3901_v6, %v3900_v1  ;;  %v3905_v11 = vsel %vm256_vm0, %v3847_v8, 0.0  ;;  %v4263_v1 = vld [vmem:[%s14156_s3] sm:$0xff]  ;;  %10480 = vmatpush3.bf16.msra.mxu1 %v10477_v47 }
 0x333   : > { %v3903_v58 = vsel %vm256_vm0, %v3846_v63, 0.0  ;;  %v9897_v0 = vpop.f32.mrb[28].mxu0  ;;  %10482 = vmatprep.subr.bf16.mxu1 %v10481_v61 }
 0x334   : > { %v3904_v2 = vadd.f32 %v3903_v58, %v3902_v56  ;;  %v3762_v35 = vpop.f32.mrb[29].mxu0  ;;  %v3849_v62 = vadd.f32 %v9897_v0, %v12317_v22  ;;  %v12479_v56 = vpack.c.bf16 %v4264_v3, %v4263_v1 }
 0x335   : > { %v3848_v18 = vadd.f32 %v12317_v22, %v3762_v35 }
 0x336   : > { %v3906_v7 = vadd.f32 %v3905_v11, %v3904_v2  ;;  %v3909_v36 = vsel %vm256_vm0, %v3849_v62, 0.0  ;;  %10484 = vmatpush3.bf16.msra.mxu1 %v10481_v61 }
 0x337   : > { %v3907_v60 = vsel %vm256_vm0, %v3848_v18, 0.0  ;;  %v9900_v50 = vpop.f32.mrb[30].mxu0  ;;  %10486 = vmatprep.subr.bf16.mxu1 %v12479_v56 }
 0x338   : > { %v3908_v42 = vadd.f32 %v3907_v60, %v3906_v7  ;;  %v3772_v53 = vpop.f32.mrb[31].mxu0  ;;  %v3851_v20 = vadd.f32 %v9900_v50, %v12317_v22 }
 0x339   : > { %v3850_v16 = vadd.f32 %v12317_v22, %v3772_v53 }
 0x33a   : > { %v3910_v14 = vadd.f32 %v3909_v36, %v3908_v42  ;;  %v3913_v24 = vsel %vm256_vm0, %v3851_v20, 0.0 }
 0x33b   : > { %v3911_v19 = vsel %vm256_vm0, %v3850_v16, 0.0 }
 0x33c   : > { %v3912_v23 = vadd.f32 %v3911_v19, %v3910_v14 }
 0x33e   : > { %v3914_v25 = vadd.f32 %v3913_v24, %v3912_v23 }
 0x340   : > { %v3915_v26 = vrot.slane %v3914_v25, 4 }
 0x342   : > { %v3916_v29 = vadd.f32 %v3915_v26, %v3914_v25 }
 0x344   : > { %v3917_v32 = vrot.slane %v3916_v29, 2 }
 0x346   : > { %v3918_v33 = vadd.f32 %v3917_v32, %v3916_v29 }
 0x348   : > { %v3919_v22 = vrot.slane %v3918_v33, 1 }
 0x34a   : > { %v3920_v39 = vadd.f32 %v3919_v22, %v3918_v33 }
 0x34c   : > { %v3922_v6 = vmul.f32 0.00390625, %v3920_v39 }
 0x34e   : > { %v12482_v58 = vsub.f32 %v12373_v5, %v3922_v6  ;;  %v12485_v0 = vsub.f32 %v12370_v46, %v3922_v6  ;;  %v12489_v2 = vsub.f32 %v12383_v10, %v3922_v6  ;;  %v12492_v35 = vsub.f32 %v12380_v54, %v3922_v6 }
 0x34f   : > { %v12495_v11 = vsub.f32 %v12393_v55, %v3922_v6  ;;  %v12498_v7 = vsub.f32 %v12390_v59, %v3922_v6  ;;  %v12501_v5 = vsub.f32 %v12403_v21, %v3922_v6  ;;  %v12504_v46 = vsub.f32 %v12400_v52, %v3922_v6 }
 0x350   : > { %v12507_v60 = vsub.f32 %v12413_v41, %v3922_v6  ;;  %v12510_v10 = vsub.f32 %v12410_v37, %v3922_v6  ;;  %v12513_v54 = vsub.f32 %v12423_v17, %v3922_v6  ;;  %v12516_v55 = vsub.f32 %v12420_v9, %v3922_v6 }
 0x351   : > { %v12519_v59 = vsub.f32 %v12433_v31, %v3922_v6  ;;  %v12522_v21 = vsub.f32 %v12430_v30, %v3922_v6  ;;  %v12525_v52 = vsub.f32 %v12443_v51, %v3922_v6  ;;  %v12528_v41 = vsub.f32 %v12440_v49, %v3922_v6 }
 0x352   : > { %v12530_v37 = vsub.f32 %v3846_v63, %v3922_v6  ;;  %v12532_v50 = vsub.f32 %v3847_v8, %v3922_v6  ;;  %v12534_v17 = vsub.f32 %v3848_v18, %v3922_v6  ;;  %v12536_v9 = vsub.f32 %v3849_v62, %v3922_v6 }
 0x353   : > { %v12538_v42 = vsub.f32 %v3850_v16, %v3922_v6  ;;  %v12540_v31 = vsub.f32 %v3851_v20, %v3922_v6  ;;  %v12543_v30 = vsub.f32 %v12323_v57, %v3922_v6  ;;  %v12546_v51 = vsub.f32 %v12320_v40, %v3922_v6 }
 0x354   : > { %v12549_v49 = vsub.f32 %v12333_v4, %v3922_v6  ;;  %v12552_v8 = vsub.f32 %v12330_v38, %v3922_v6  ;;  %v12559_v18 = vsub.f32 %v12343_v45, %v3922_v6  ;;  %v12564_v40 = vsub.f32 %v12340_v44, %v3922_v6 }
 0x355   : > { %v3955_v63 = vmul.f32 %v12543_v30, %v12543_v30  ;;  %v3956_v62 = vmul.f32 %v12546_v51, %v12546_v51  ;;  %v12571_v20 = vsub.f32 %v12353_v15, %v3922_v6  ;;  %v12577_v44 = vsub.f32 %v12350_v12, %v3922_v6 }
 0x356   : > { %v3957_v57 = vmul.f32 %v12549_v49, %v12549_v49  ;;  %v3958_v4 = vmul.f32 %v12552_v8, %v12552_v8  ;;  %v3959_v45 = vmul.f32 %v12559_v18, %v12559_v18  ;;  %v3960_v19 = vmul.f32 %v12564_v40, %v12564_v40 }
 0x357   : > { %v3987_v38 = vsel %vm256_vm0, %v3955_v63, 0.0  ;;  %v3988_v53 = vsel %vm256_vm0, %v3956_v62, 0.0  ;;  %v12583_v25 = vsub.f32 %v12363_v28, %v3922_v6  ;;  %v3961_v15 = vmul.f32 %v12571_v20, %v12571_v20 }
 0x358   : > { %v3989_v36 = vadd.f32 %v3988_v53, %v3987_v38  ;;  %v3990_v16 = vsel %vm256_vm0, %v3957_v57, 0.0  ;;  %v3992_v23 = vsel %vm256_vm0, %v3958_v4, 0.0  ;;  %v3994_v26 = vsel %vm256_vm0, %v3959_v45, 0.0 }
 0x359   : > { %v12589_v32 = vsub.f32 %v12360_v27, %v3922_v6  ;;  %v3962_v12 = vmul.f32 %v12577_v44, %v12577_v44  ;;  %v3996_v33 = vsel %vm256_vm0, %v3960_v19, 0.0  ;;  %v3963_v43 = vmul.f32 %v12583_v25, %v12583_v25 }
 0x35a   : > { %v3991_v14 = vadd.f32 %v3990_v16, %v3989_v36  ;;  %v3998_v28 = vsel %vm256_vm0, %v3961_v15, 0.0  ;;  %v3965_v27 = vmul.f32 %v12482_v58, %v12482_v58  ;;  %v3966_v1 = vmul.f32 %v12485_v0, %v12485_v0 }
 0x35b   : > { %v3964_v47 = vmul.f32 %v12589_v32, %v12589_v32  ;;  %v4000_v48 = vsel %vm256_vm0, %v3962_v12, 0.0  ;;  %v4002_v39 = vsel %vm256_vm0, %v3963_v43, 0.0  ;;  %v3967_v63 = vmul.f32 %v12489_v2, %v12489_v2 }
 0x35c   : > { %v3993_v24 = vadd.f32 %v3992_v23, %v3991_v14  ;;  %v4006_v62 = vsel %vm256_vm0, %v3965_v27, 0.0  ;;  %v3968_v4 = vmul.f32 %v12492_v35, %v12492_v35  ;;  %v4008_v38 = vsel %vm256_vm0, %v3966_v1, 0.0 }
 0x35d   : > { %v4004_v3 = vsel %vm256_vm0, %v3964_v47, 0.0  ;;  %v3969_v36 = vmul.f32 %v12495_v11, %v12495_v11  ;;  %v4010_v45 = vsel %vm256_vm0, %v3967_v63, 0.0  ;;  %v3970_v14 = vmul.f32 %v12498_v7, %v12498_v7 }
 0x35e   : > { %v3995_v29 = vadd.f32 %v3994_v26, %v3993_v24  ;;  %v4012_v19 = vsel %vm256_vm0, %v3968_v4, 0.0  ;;  %v3971_v24 = vmul.f32 %v12501_v5, %v12501_v5 }
 0x35f   : > { %v4014_v15 = vsel %vm256_vm0, %v3969_v36, 0.0  ;;  %v4016_v12 = vsel %vm256_vm0, %v3970_v14, 0.0 }
 0x360   : > { %v3997_v34 = vadd.f32 %v3996_v33, %v3995_v29  ;;  %v3972_v29 = vmul.f32 %v12504_v46, %v12504_v46  ;;  %v4018_v43 = vsel %vm256_vm0, %v3971_v24, 0.0 }
 0x362   : > { %v3999_v22 = vadd.f32 %v3998_v28, %v3997_v34  ;;  %v3973_v34 = vmul.f32 %v12507_v60, %v12507_v60  ;;  %v4020_v47 = vsel %vm256_vm0, %v3972_v29, 0.0 }
 0x364   : > { %v4001_v13 = vadd.f32 %v4000_v48, %v3999_v22  ;;  %v3974_v22 = vmul.f32 %v12510_v10, %v12510_v10  ;;  %v4022_v27 = vsel %vm256_vm0, %v3973_v34, 0.0 }
 0x366   : > { %v4003_v61 = vadd.f32 %v4002_v39, %v4001_v13  ;;  %v3975_v13 = vmul.f32 %v12513_v54, %v12513_v54  ;;  %v4024_v1 = vsel %vm256_vm0, %v3974_v22, 0.0 }
 0x368   : > { %v4005_v6 = vadd.f32 %v4004_v3, %v4003_v61  ;;  %v3976_v61 = vmul.f32 %v12516_v55, %v12516_v55  ;;  %v4026_v63 = vsel %vm256_vm0, %v3975_v13, 0.0 }
 0x36a   : > { %v4007_v57 = vadd.f32 %v4006_v62, %v4005_v6  ;;  %v3977_v6 = vmul.f32 %v12519_v59, %v12519_v59  ;;  %v4028_v4 = vsel %vm256_vm0, %v3976_v61, 0.0 }
 0x36c   : > { %v4009_v53 = vadd.f32 %v4008_v38, %v4007_v57  ;;  %v3978_v57 = vmul.f32 %v12522_v21, %v12522_v21  ;;  %v4030_v36 = vsel %vm256_vm0, %v3977_v6, 0.0 }
 0x36e   : > { %v4011_v16 = vadd.f32 %v4010_v45, %v4009_v53  ;;  %v3979_v53 = vmul.f32 %v12525_v52, %v12525_v52  ;;  %v4032_v14 = vsel %vm256_vm0, %v3978_v57, 0.0 }
 0x370   : > { %v4013_v23 = vadd.f32 %v4012_v19, %v4011_v16  ;;  %v3980_v16 = vmul.f32 %v12528_v41, %v12528_v41  ;;  %v4034_v24 = vsel %vm256_vm0, %v3979_v53, 0.0 }
 0x372   : > { %v4015_v26 = vadd.f32 %v4014_v15, %v4013_v23  ;;  %v3981_v23 = vmul.f32 %v12530_v37, %v12530_v37  ;;  %v4036_v29 = vsel %vm256_vm0, %v3980_v16, 0.0 }
 0x374   : > { %v4017_v33 = vadd.f32 %v4016_v12, %v4015_v26  ;;  %v3982_v26 = vmul.f32 %v12532_v50, %v12532_v50  ;;  %v4038_v34 = vsel %vm256_vm0, %v3981_v23, 0.0 }
 0x376   : > { %v4019_v28 = vadd.f32 %v4018_v43, %v4017_v33  ;;  %v3983_v33 = vmul.f32 %v12534_v17, %v12534_v17  ;;  %v4040_v22 = vsel %vm256_vm0, %v3982_v26, 0.0 }
 0x378   : > { %v4021_v48 = vadd.f32 %v4020_v47, %v4019_v28  ;;  %v3984_v28 = vmul.f32 %v12536_v9, %v12536_v9  ;;  %v4042_v13 = vsel %vm256_vm0, %v3983_v33, 0.0 }
 0x37a   : > { %v4023_v39 = vadd.f32 %v4022_v27, %v4021_v48  ;;  %v3985_v48 = vmul.f32 %v12538_v42, %v12538_v42  ;;  %v4044_v61 = vsel %vm256_vm0, %v3984_v28, 0.0 }
 0x37c   : > { %v4025_v3 = vadd.f32 %v4024_v1, %v4023_v39  ;;  %v3986_v39 = vmul.f32 %v12540_v31, %v12540_v31 }
 0x37e   : > { %v4027_v62 = vadd.f32 %v4026_v63, %v4025_v3  ;;  %v4046_v3 = vsel %vm256_vm0, %v3985_v48, 0.0  ;;  %v4048_v63 = vsel %vm256_vm0, %v3986_v39, 0.0 }
 0x380   : > { %v4029_v38 = vadd.f32 %v4028_v4, %v4027_v62 }
 0x382   : > { %v4031_v45 = vadd.f32 %v4030_v36, %v4029_v38 }
 0x384   : > { %v4033_v19 = vadd.f32 %v4032_v14, %v4031_v45 }
 0x386   : > { %v4035_v15 = vadd.f32 %v4034_v24, %v4033_v19 }
 0x388   : > { %v4037_v12 = vadd.f32 %v4036_v29, %v4035_v15 }
 0x38a   : > { %v4039_v43 = vadd.f32 %v4038_v34, %v4037_v12 }
 0x38c   : > { %v4041_v47 = vadd.f32 %v4040_v22, %v4039_v43 }
 0x38e   : > { %v4043_v27 = vadd.f32 %v4042_v13, %v4041_v47 }
 0x390   : > { %v4045_v1 = vadd.f32 %v4044_v61, %v4043_v27 }
 0x392   : > { %v4047_v6 = vadd.f32 %v4046_v3, %v4045_v1 }
 0x394   : > { %v4049_v62 = vadd.f32 %v4048_v63, %v4047_v6 }
 0x396   : > { %v4050_v57 = vrot.slane %v4049_v62, 4 }
 0x398   : > { %v4051_v4 = vadd.f32 %v4050_v57, %v4049_v62 }
 0x39a   : > { %v4052_v38 = vrot.slane %v4051_v4, 2 }
 0x39c   : > { %v4053_v53 = vadd.f32 %v4052_v38, %v4051_v4 }
 0x39e   : > { %v4054_v36 = vrot.slane %v4053_v53, 1 }
 0x3a0   : > { %v4055_v45 = vadd.f32 %v4054_v36, %v4053_v53 }
 0x3a2   : > { %v4056_v16 = vmul.f32 0.00390625, %v4055_v45 }
 0x3a4   : > { %v4057_v14 = vadd.f32 1e-05, %v4056_v16 }
 0x3a6   : > { %11102 = vrsqrt.f32 %v4057_v14  ;;  %v4265_v14 = vld [vmem:[%s14156_s3 + $0x10] sm:$0xff] }
 0x3b0   : > { %v11103_v19 = vpop.eup %11102 }
 0x3b1   : > { %v4089_v23 = vmul.f32 %v11103_v19, %v12538_v42  ;;  %v4059_v24 = vmul.f32 %v11103_v19, %v12543_v30  ;;  %v4060_v15 = vmul.f32 %v11103_v19, %v12546_v51  ;;  %v4061_v26 = vmul.f32 %v11103_v19, %v12549_v49 }
 0x3b2   : > { %v4062_v29 = vmul.f32 %v11103_v19, %v12552_v8  ;;  %v4063_v12 = vmul.f32 %v11103_v19, %v12559_v18  ;;  %v4064_v33 = vmul.f32 %v11103_v19, %v12564_v40  ;;  %v4065_v34 = vmul.f32 %v11103_v19, %v12571_v20 }
 0x3b3   : > { %v4121_v43 = vmax.f32 %v4089_v23, 0.0  ;;  %v4066_v28 = vmul.f32 %v11103_v19, %v12577_v44  ;;  %v4067_v22 = vmul.f32 %v11103_v19, %v12583_v25  ;;  %v4068_v42 = vmul.f32 %v11103_v19, %v12589_v32 }
 0x3b4   : > { %v4069_v30 = vmul.f32 %v11103_v19, %v12482_v58  ;;  %v4070_v51 = vmul.f32 %v11103_v19, %v12485_v0  ;;  %v4071_v49 = vmul.f32 %v11103_v19, %v12489_v2  ;;  %v4072_v8 = vmul.f32 %v11103_v19, %v12492_v35 }
 0x3b5   : > { %v4073_v18 = vmul.f32 %v11103_v19, %v12495_v11  ;;  %v12685_v40 = vmul.f32 %v11103_v19, %v12498_v7  ;;  %v12688_v20 = vmul.f32 %v11103_v19, %v12501_v5  ;;  %v12691_v44 = vmul.f32 %v11103_v19, %v12504_v46  ;;  %4153 = vst.msk [vmem:[#allocation2 + $0x181] sm:$0xff] %vm256_vm0, %v4121_v43  ;;  %v8490_v43 = vld [vmem:[%s14156_s3 + $0x48] sm:$0xff] }
 0x3b6   : > { %v12695_v58 = vmul.f32 %v11103_v19, %v12507_v60  ;;  %v12698_v0 = vmul.f32 %v11103_v19, %v12510_v10  ;;  %v12701_v2 = vmul.f32 %v11103_v19, %v12513_v54  ;;  %v12704_v35 = vmul.f32 %v11103_v19, %v12516_v55 }
 0x3b7   : > { %v12707_v11 = vmul.f32 %v11103_v19, %v12519_v59  ;;  %v12710_v7 = vmul.f32 %v11103_v19, %v12522_v21  ;;  %v12713_v5 = vmul.f32 %v11103_v19, %v12525_v52  ;;  %v12716_v46 = vmul.f32 %v11103_v19, %v12528_v41 }
 0x3b8   : > { %v12719_v60 = vmul.f32 %v11103_v19, %v12530_v37  ;;  %v12722_v10 = vmul.f32 %v11103_v19, %v12532_v50  ;;  %v12725_v54 = vmul.f32 %v11103_v19, %v12534_v17  ;;  %v12728_v55 = vmul.f32 %v11103_v19, %v12536_v9 }
 0x3b9   : > { %v12731_v59 = vmul.f32 %v11103_v19, %v12540_v31  ;;  %v4091_v21 = vmax.f32 %v4059_v24, 0.0  ;;  %v4092_v52 = vmax.f32 %v4060_v15, 0.0  ;;  %v4093_v25 = vmax.f32 %v4061_v26, 0.0  ;;  %v4266_v19 = vld [vmem:[%s14156_s3 + $0x18] sm:$0xff] }
 0x3ba   : > { %v4094_v41 = vmax.f32 %v4062_v29, 0.0  ;;  %v4095_v32 = vmax.f32 %v4063_v12, 0.0  ;;  %v4096_v47 = vmax.f32 %v4064_v33, 0.0  ;;  %v4097_v37 = vmax.f32 %v4065_v34, 0.0  ;;  %v8489_v34 = vld [vmem:[%s14156_s3 + $0x40] sm:$0xff] }
 0x3bb   : > { %v4098_v48 = vmax.f32 %v4066_v28, 0.0  ;;  %v4099_v13 = vmax.f32 %v4067_v22, 0.0  ;;  %v4100_v50 = vmax.f32 %v4068_v42, 0.0  ;;  %v4101_v27 = vmax.f32 %v4069_v30, 0.0  ;;  %4123 = vst.msk [vmem:[#allocation2 + $0x19] sm:$0xff] %vm256_vm0, %v4091_v21  ;;  %4124 = vst.msk [vmem:[#allocation2 + $0x21] sm:$0xff] %vm256_vm0, %v4092_v52 }
 0x3bc   : > { %4125 = vst.msk [vmem:[#allocation2 + $0x31] sm:$0xff] %vm256_vm0, %v4093_v25  ;;  %4155 = vst.msk [vmem:[#allocation2 + $0x1] sm:$0xff] %vm256_vm0, %v4093_v25  ;;  %v4102_v17 = vmax.f32 %v4070_v51, 0.0  ;;  %v4103_v9 = vmax.f32 %v4071_v49, 0.0  ;;  %v4104_v31 = vmax.f32 %v4072_v8, 0.0  ;;  %v4105_v39 = vmax.f32 %v4073_v18, 0.0 }
 0x3bd   : > { %4126 = vst.msk [vmem:[#allocation2 + $0x39] sm:$0xff] %vm256_vm0, %v4094_v41  ;;  %4127 = vst.msk [vmem:[#allocation2 + $0x49] sm:$0xff] %vm256_vm0, %v4095_v32  ;;  %v4175_v61 = vld [vmem:[#allocation2 + $0x182] sm:$0x1]  ;;  %v4106_v1 = vmax.f32 %v12685_v40, 0.0  ;;  %v4107_v3 = vmax.f32 %v12688_v20, 0.0  ;;  %v10489_v12 = vpack.c.bf16 %v4266_v19, %v4265_v14  ;;  %v12804_v22 = vpack.c.bf16 %v8490_v43, %v8489_v34 }
 0x3be   : > { %4128 = vst.msk [vmem:[#allocation2 + $0x51] sm:$0xff] %vm256_vm0, %v4096_v47  ;;  %4129 = vst.msk [vmem:[#allocation2 + $0x61] sm:$0xff] %vm256_vm0, %v4097_v37  ;;  %v4108_v6 = vmax.f32 %v12691_v44, 0.0  ;;  %v4109_v63 = vmax.f32 %v12695_v58, 0.0  ;;  %v4110_v62 = vmax.f32 %v12698_v0, 0.0  ;;  %v4111_v57 = vmax.f32 %v12701_v2, 0.0 }
 0x3bf   : > { %4156 = vst.msk [vmem:[#allocation2 + $0x9] sm:$0xff] %vm256_vm0, %v4094_v41  ;;  %4130 = vst.msk [vmem:[#allocation2 + $0x69] sm:$0xff] %vm256_vm0, %v4098_v48  ;;  %v4112_v4 = vmax.f32 %v12704_v35, 0.0  ;;  %v4113_v38 = vmax.f32 %v12707_v11, 0.0  ;;  %v4114_v53 = vmax.f32 %v12710_v7, 0.0  ;;  %v4115_v36 = vmax.f32 %v12713_v5, 0.0 }
 0x3c0   : > { %4131 = vst.msk [vmem:[#allocation2 + $0x79] sm:$0xff] %vm256_vm0, %v4099_v13  ;;  %4132 = vst.msk [vmem:[#allocation2 + $0x81] sm:$0xff] %vm256_vm0, %v4100_v50  ;;  %v4116_v45 = vmax.f32 %v12716_v46, 0.0  ;;  %v4117_v16 = vmax.f32 %v12719_v60, 0.0  ;;  %v4118_v23 = vmax.f32 %v12722_v10, 0.0  ;;  %v4119_v24 = vmax.f32 %v12725_v54, 0.0 }
 0x3c1   : > { %4133 = vst.msk [vmem:[#allocation2 + $0x91] sm:$0xff] %vm256_vm0, %v4101_v27  ;;  %4134 = vst.msk [vmem:[#allocation2 + $0x99] sm:$0xff] %vm256_vm0, %v4102_v17  ;;  %v4120_v15 = vmax.f32 %v12728_v55, 0.0  ;;  %v4122_v26 = vmax.f32 %v12731_v59, 0.0 }
 0x3c2   : > { %4193 = vst.msk [vmem:[#allocation2 + $0x180] sm:$0x1] %vm312_vm1, %v4175_v61  ;;  %v12799_v28 = vld [vmem:[#allocation2 + $0x19] sm:$0xff]  ;;  %v12806_v42 = vld [vmem:[#allocation2 + $0x21] sm:$0xff] }
 0x3c3   : > { %4135 = vst.msk [vmem:[#allocation2 + $0xa9] sm:$0xff] %vm256_vm0, %v4103_v9  ;;  %4136 = vst.msk [vmem:[#allocation2 + $0xb1] sm:$0xff] %vm256_vm0, %v4104_v31  ;;  %v4267_v29 = vld [vmem:[#allocation2 + $0x1] sm:$0xff]  ;;  %v12810_v30 = vld [vmem:[#allocation2 + $0x31] sm:$0xff] }
 0x3c4   : > { %4137 = vst.msk [vmem:[#allocation2 + $0xc1] sm:$0xff] %vm256_vm0, %v4105_v39  ;;  %4138 = vst.msk [vmem:[#allocation2 + $0xc9] sm:$0xff] %vm256_vm0, %v4106_v1  ;;  %9909 = vmatprep.mubr.msk.f32.mxu1 %vm256_vm0, %v4267_v29  ;;  %v12819_v51 = vld [vmem:[#allocation2 + $0x49] sm:$0xff]  ;;  %v4159_v49 = vld [vmem:[#allocation2 + $0x2] sm:$0x1] }
 0x3c5   : > { %4139 = vst.msk [vmem:[#allocation2 + $0xd9] sm:$0xff] %vm256_vm0, %v4107_v3  ;;  %4140 = vst.msk [vmem:[#allocation2 + $0xe1] sm:$0xff] %vm256_vm0, %v4108_v6  ;;  %v4160_v8 = vld [vmem:[#allocation2 + $0x1a] sm:$0x1]  ;;  %v4161_v18 = vld [vmem:[#allocation2 + $0x32] sm:$0x1] }
 0x3c6   : > { %4141 = vst.msk [vmem:[#allocation2 + $0xf1] sm:$0xff] %vm256_vm0, %v4109_v63  ;;  %4142 = vst.msk [vmem:[#allocation2 + $0xf9] sm:$0xff] %vm256_vm0, %v4110_v62  ;;  %v4268_v33 = vld [vmem:[#allocation2 + $0x9] sm:$0xff]  ;;  %v12825_v20 = vld [vmem:[#allocation2 + $0x51] sm:$0xff] }
 0x3c7   : > { %4143 = vst.msk [vmem:[#allocation2 + $0x109] sm:$0xff] %vm256_vm0, %v4111_v57  ;;  %4144 = vst.msk [vmem:[#allocation2 + $0x111] sm:$0xff] %vm256_vm0, %v4112_v4  ;;  %9910 = vmatmul.mubr.msk.f32.vlgmr.msra.gmra.mrb[0].mxu1 %vm256_vm0, %v4268_v33  ;;  %v4162_v40 = vld [vmem:[#allocation2 + $0x4a] sm:$0x1]  ;;  %v4163_v44 = vld [vmem:[#allocation2 + $0x62] sm:$0x1] }
 0x3c8   : > { %4145 = vst.msk [vmem:[#allocation2 + $0x121] sm:$0xff] %vm256_vm0, %v4113_v38  ;;  %4146 = vst.msk [vmem:[#allocation2 + $0x129] sm:$0xff] %vm256_vm0, %v4114_v53  ;;  %10488 = vmatpush3.bf16.msra.mxu1 %v12479_v56  ;;  %9912 = vmatprep.mubr.msk.f32.mxu1 %vm256_vm0, %v12799_v28  ;;  %v12815_v56 = vld [vmem:[#allocation2 + $0x39] sm:$0xff]  ;;  %v12831_v58 = vld [vmem:[#allocation2 + $0x61] sm:$0xff] }
 0x3c9   : > { %4147 = vst.msk [vmem:[#allocation2 + $0x139] sm:$0xff] %vm256_vm0, %v4115_v36  ;;  %4148 = vst.msk [vmem:[#allocation2 + $0x141] sm:$0xff] %vm256_vm0, %v4116_v45  ;;  %10490 = vmatprep.subr.bf16.mxu1 %v10489_v12  ;;  %v4164_v0 = vld [vmem:[#allocation2 + $0x7a] sm:$0x1]  ;;  %v4165_v2 = vld [vmem:[#allocation2 + $0x92] sm:$0x1] }
 0x3ca   : > { %4149 = vst.msk [vmem:[#allocation2 + $0x151] sm:$0xff] %vm256_vm0, %v4117_v16  ;;  %4150 = vst.msk [vmem:[#allocation2 + $0x159] sm:$0xff] %vm256_vm0, %v4118_v23  ;;  %v4166_v35 = vld [vmem:[#allocation2 + $0xaa] sm:$0x1]  ;;  %v12845_v60 = vld [vmem:[#allocation2 + $0x79] sm:$0xff] }
 0x3cb   : > { %4151 = vst.msk [vmem:[#allocation2 + $0x169] sm:$0xff] %vm256_vm0, %v4119_v24  ;;  %4152 = vst.msk [vmem:[#allocation2 + $0x171] sm:$0xff] %vm256_vm0, %v4120_v15  ;;  %9913 = vmatmul.mubr.msk.f32.gmra.mrb[2].mxu1 %vm256_vm0, %v12806_v42  ;;  %v4167_v11 = vld [vmem:[#allocation2 + $0xc2] sm:$0x1]  ;;  %v12839_v5 = vld [vmem:[#allocation2 + $0x69] sm:$0xff] }
 0x3cc   : > { %4154 = vst.msk [vmem:[#allocation2 + $0x189] sm:$0xff] %vm256_vm0, %v4122_v26  ;;  %4157 = vst.msk [vmem:[#allocation2 + $0x199] sm:$0xff] %vm256_vm0, %v4119_v24  ;;  %9915 = vmatprep.mubr.msk.f32.mxu1 %vm256_vm0, %v12810_v30  ;;  %10492 = vmatpush3.bf16.msra.mxu1 %v10489_v12  ;;  %v4168_v7 = vld [vmem:[#allocation2 + $0xda] sm:$0x1]  ;;  %v12852_v59 = vld [vmem:[#allocation2 + $0x81] sm:$0xff] }
 0x3cd   : > { %4158 = vst.msk [vmem:[#allocation2 + $0x1a1] sm:$0xff] %vm256_vm0, %v4120_v15  ;;  %10494 = vmatprep.subr.bf16.mxu1 %v12804_v22  ;;  %v4169_v46 = vld [vmem:[#allocation2 + $0xf2] sm:$0x1]  ;;  %v12863_v41 = vld [vmem:[#allocation2 + $0x99] sm:$0xff]  ;;  %v4195_v32 = vld [vmem:[#allocation2 + $0xf] sm:$0x1] }
 0x3ce   : > { %4177 = vst.msk [vmem:[#allocation2] sm:$0x1] %vm312_vm1, %v4159_v49  ;;  %4178 = vst.msk [vmem:[#allocation2 + $0x18] sm:$0x1] %vm312_vm1, %v4160_v8  ;;  %v4170_v10 = vld [vmem:[#allocation2 + $0x10a] sm:$0x1] }
 0x3cf   : > { %9916 = vmatmul.mubr.msk.f32.gmra.mrb[4].mxu1 %vm256_vm0, %v12815_v56  ;;  %4179 = vst.msk [vmem:[#allocation2 + $0x30] sm:$0x1] %vm312_vm1, %v4161_v18  ;;  %4180 = vst.msk [vmem:[#allocation2 + $0x48] sm:$0x1] %vm312_vm1, %v4162_v40  ;;  %v4171_v54 = vld [vmem:[#allocation2 + $0x122] sm:$0x1] }
 0x3d0   : > { %9918 = vmatprep.mubr.msk.f32.mxu1 %vm256_vm0, %v12819_v51  ;;  %4181 = vst.msk [vmem:[#allocation2 + $0x60] sm:$0x1] %vm312_vm1, %v4163_v44  ;;  %4182 = vst.msk [vmem:[#allocation2 + $0x78] sm:$0x1] %vm312_vm1, %v4164_v0  ;;  %v4172_v55 = vld [vmem:[#allocation2 + $0x13a] sm:$0x1] }
 0x3d1   : > { %4183 = vst.msk [vmem:[#allocation2 + $0x90] sm:$0x1] %vm312_vm1, %v4165_v2  ;;  %4184 = vst.msk [vmem:[#allocation2 + $0xa8] sm:$0x1] %vm312_vm1, %v4166_v35  ;;  %v4173_v21 = vld [vmem:[#allocation2 + $0x152] sm:$0x1] }
 0x3d2   : > { %4185 = vst.msk [vmem:[#allocation2 + $0xc0] sm:$0x1] %vm312_vm1, %v4167_v11  ;;  %4186 = vst.msk [vmem:[#allocation2 + $0xd8] sm:$0x1] %vm312_vm1, %v4168_v7  ;;  %v12857_v52 = vld [vmem:[#allocation2 + $0x91] sm:$0xff]  ;;  %v12867_v47 = vld [vmem:[#allocation2 + $0xa9] sm:$0xff] }
 0x3d3   : > { %9919 = vmatmul.mubr.msk.f32.gmra.mrb[6].mxu1 %vm256_vm0, %v12825_v20  ;;  %4187 = vst.msk [vmem:[#allocation2 + $0xf0] sm:$0x1] %vm312_vm1, %v4169_v46  ;;  %4188 = vst.msk [vmem:[#allocation2 + $0x108] sm:$0x1] %vm312_vm1, %v4170_v10  ;;  %v4174_v25 = vld [vmem:[#allocation2 + $0x16a] sm:$0x1] }
 0x3d4   : > { %9921 = vmatprep.mubr.msk.f32.mxu1 %vm256_vm0, %v12831_v58  ;;  %4189 = vst.msk [vmem:[#allocation2 + $0x120] sm:$0x1] %vm312_vm1, %v4171_v54  ;;  %4190 = vst.msk [vmem:[#allocation2 + $0x138] sm:$0x1] %vm312_vm1, %v4172_v55  ;;  %v4196_v37 = vld [vmem:[#allocation2 + $0x27] sm:$0x1] }
 0x3d5   : > { %4191 = vst.msk [vmem:[#allocation2 + $0x150] sm:$0x1] %vm312_vm1, %v4173_v21  ;;  %4192 = vst.msk [vmem:[#allocation2 + $0x168] sm:$0x1] %vm312_vm1, %v4174_v25  ;;  %v4197_v48 = vld [vmem:[#allocation2 + $0x3f] sm:$0x1] }
 0x3d6   : > { %4213 = vst.msk [vmem:[#allocation2 + $0x11] sm:$0x1] %vm312_vm1, %v4195_v32  ;;  %4214 = vst.msk [vmem:[#allocation2 + $0x29] sm:$0x1] %vm312_vm1, %v4196_v37  ;;  %v4198_v13 = vld [vmem:[#allocation2 + $0x57] sm:$0x1] }
 0x3d7   : > { %9922 = vmatmul.mubr.msk.f32.gmra.mrb[8].mxu1 %vm256_vm0, %v12839_v5  ;;  %4215 = vst.msk [vmem:[#allocation2 + $0x41] sm:$0x1] %vm312_vm1, %v4197_v48  ;;  %v12874_v50 = vld [vmem:[#allocation2 + $0xb1] sm:$0xff]  ;;  %4216 = vst.msk [vmem:[#allocation2 + $0x59] sm:$0x1] %vm312_vm1, %v4198_v13  ;;  %v12879_v17 = vld [vmem:[#allocation2 + $0xc1] sm:$0xff] }
 0x3d8   : > { %9924 = vmatprep.mubr.msk.f32.mxu1 %vm256_vm0, %v12845_v60  ;;  %v4199_v27 = vld [vmem:[#allocation2 + $0x6f] sm:$0x1]  ;;  %v4200_v9 = vld [vmem:[#allocation2 + $0x87] sm:$0x1]  ;;  %v4201_v31 = vld [vmem:[#allocation2 + $0x9f] sm:$0x1] }
 0x3d9   : > { %4217 = vst.msk [vmem:[#allocation2 + $0x71] sm:$0x1] %vm312_vm1, %v4199_v27  ;;  %4218 = vst.msk [vmem:[#allocation2 + $0x89] sm:$0x1] %vm312_vm1, %v4200_v9  ;;  %v4202_v39 = vld [vmem:[#allocation2 + $0xb7] sm:$0x1] }
 0x3da   : > { %4219 = vst.msk [vmem:[#allocation2 + $0xa1] sm:$0x1] %vm312_vm1, %v4201_v31  ;;  %4220 = vst.msk [vmem:[#allocation2 + $0xb9] sm:$0x1] %vm312_vm1, %v4202_v39  ;;  %v12887_v61 = vld [vmem:[#allocation2 + $0xc9] sm:$0xff]  ;;  %v12891_v3 = vld [vmem:[#allocation2 + $0xd9] sm:$0xff] }
 0x3db   : > { %9925 = vmatmul.mubr.msk.f32.gmra.mrb[10].mxu1 %vm256_vm0, %v12852_v59  ;;  %v4203_v1 = vld [vmem:[#allocation2 + $0xcf] sm:$0x1]  ;;  %v4204_v6 = vld [vmem:[#allocation2 + $0xe7] sm:$0x1]  ;;  %v4205_v63 = vld [vmem:[#allocation2 + $0xff] sm:$0x1] }
 0x3dc   : > { %9927 = vmatprep.mubr.msk.f32.mxu1 %vm256_vm0, %v12857_v52  ;;  %4221 = vst.msk [vmem:[#allocation2 + $0xd1] sm:$0x1] %vm312_vm1, %v4203_v1  ;;  %4222 = vst.msk [vmem:[#allocation2 + $0xe9] sm:$0x1] %vm312_vm1, %v4204_v6  ;;  %v4206_v62 = vld [vmem:[#allocation2 + $0x117] sm:$0x1] }
 0x3dd   : > { %4223 = vst.msk [vmem:[#allocation2 + $0x101] sm:$0x1] %vm312_vm1, %v4205_v63  ;;  %v12898_v57 = vld [vmem:[#allocation2 + $0xe1] sm:$0xff]  ;;  %4224 = vst.msk [vmem:[#allocation2 + $0x119] sm:$0x1] %vm312_vm1, %v4206_v62  ;;  %v12903_v38 = vld [vmem:[#allocation2 + $0xf1] sm:$0xff] }
 0x3de   : > { %v4207_v4 = vld [vmem:[#allocation2 + $0x12f] sm:$0x1]  ;;  %v4208_v53 = vld [vmem:[#allocation2 + $0x147] sm:$0x1]  ;;  %v4209_v36 = vld [vmem:[#allocation2 + $0x15f] sm:$0x1] }
 0x3df   : > { %9928 = vmatmul.mubr.msk.f32.gmra.mrb[12].mxu1 %vm256_vm0, %v12863_v41  ;;  %4225 = vst.msk [vmem:[#allocation2 + $0x131] sm:$0x1] %vm312_vm1, %v4207_v4  ;;  %4226 = vst.msk [vmem:[#allocation2 + $0x149] sm:$0x1] %vm312_vm1, %v4208_v53  ;;  %v4210_v45 = vld [vmem:[#allocation2 + $0x177] sm:$0x1] }
 0x3e0   : > { %9930 = vmatprep.mubr.msk.f32.mxu1 %vm256_vm0, %v12867_v47  ;;  %4227 = vst.msk [vmem:[#allocation2 + $0x161] sm:$0x1] %vm312_vm1, %v4209_v36  ;;  %v12910_v16 = vld [vmem:[#allocation2 + $0xf9] sm:$0xff]  ;;  %4228 = vst.msk [vmem:[#allocation2 + $0x179] sm:$0x1] %vm312_vm1, %v4210_v45  ;;  %v12915_v14 = vld [vmem:[#allocation2 + $0x109] sm:$0xff] }
 0x3e1   : > { %v4211_v19 = vld [vmem:[#allocation2 + $0x18f] sm:$0x1]  ;;  %v4176_v23 = vld [vmem:[#allocation2 + $0x19a] sm:$0x1]  ;;  %v12921_v24 = vld [vmem:[#allocation2 + $0x111] sm:$0xff] }
 0x3e2   : > { %4229 = vst.msk [vmem:[#allocation2 + $0x191] sm:$0x1] %vm312_vm1, %v4211_v19  ;;  %4194 = vst.msk [vmem:[#allocation2 + $0x198] sm:$0x1] %vm312_vm1, %v4176_v23  ;;  %v12925_v15 = vld [vmem:[#allocation2 + $0x121] sm:$0xff]  ;;  %v12929_v26 = vld [vmem:[#allocation2 + $0x129] sm:$0xff] }
 0x3e3   : > { %9931 = vmatmul.mubr.msk.f32.gmra.mrb[14].mxu1 %vm256_vm0, %v12874_v50  ;;  %v12933_v29 = vld [vmem:[#allocation2 + $0x139] sm:$0xff]  ;;  %v12937_v12 = vld [vmem:[#allocation2 + $0x141] sm:$0xff]  ;;  %v12941_v33 = vld [vmem:[#allocation2 + $0x151] sm:$0xff] }
 0x3e4   : > { %9933 = vmatprep.mubr.msk.f32.mxu1 %vm256_vm0, %v12879_v17  ;;  %14423 = vst [vmem:[#allocation38_spill] sm:$0xff] %v12937_v12  ;;  %14424 = vst [vmem:[#allocation39_spill] sm:$0xff] %v12941_v33  ;;  %v4212_v34 = vld [vmem:[#allocation2 + $0x1a7] sm:$0x1]  ;;  %v12945_v43 = vld [vmem:[#allocation2 + $0x159] sm:$0xff] }
 0x3e5   : > { %14425 = vst [vmem:[#allocation40_spill] sm:$0xff] %v12945_v43  ;;  %4230 = vst.msk [vmem:[#allocation2 + $0x1a9] sm:$0x1] %vm312_vm1, %v4212_v34  ;;  %v12950_v49 = vld [vmem:[#allocation2 + $0x169] sm:$0xff]  ;;  %v12954_v8 = vld [vmem:[#allocation2 + $0x171] sm:$0xff] }
 0x3e6   : > { %14426 = vst [vmem:[#allocation41_spill] sm:$0xff] %v12950_v49  ;;  %14427 = vst [vmem:[#allocation44_spill] sm:$0xff] %v12954_v8  ;;  %v8491_v18 = vld [vmem:[%s14156_s3 + $0x50] sm:$0xff]  ;;  %v8492_v40 = vld [vmem:[%s14156_s3 + $0x58] sm:$0xff] }
 0x3e7   : > { %9934 = vmatmul.mubr.msk.f32.gmra.mrb[16].mxu1 %vm256_vm0, %v12887_v61  ;;  %v4231_v44 = vld [vmem:[#allocation2] sm:$0xff]  ;;  %v10497_v0 = vpack.c.bf16 %v8492_v40, %v8491_v18  ;;  %v4232_v2 = vld [vmem:[#allocation2 + $0x8] sm:$0xff]  ;;  %v12972_v7 = vld [vmem:[#allocation2 + $0x18] sm:$0xff] }
 0x3e8   : > { %9936 = vmatprep.mubr.msk.f32.mxu1 %vm256_vm0, %v12891_v3  ;;  %v8525_v35 = vld [vmem:[%s14156_s3 + $0x60] sm:$0xff]  ;;  %v8526_v11 = vld [vmem:[%s14156_s3 + $0x68] sm:$0xff]  ;;  %v12983_v54 = vld [vmem:[#allocation2 + $0x30] sm:$0xff] }
 0x3e9   : > { %v12977_v46 = vpack.c.bf16 %v8526_v11, %v8525_v35  ;;  %v12979_v10 = vld [vmem:[#allocation2 + $0x20] sm:$0xff]  ;;  %v12992_v55 = vld [vmem:[#allocation2 + $0x48] sm:$0xff]  ;;  %v12996_v21 = vld [vmem:[#allocation2 + $0x50] sm:$0xff] }
 0x3ea   : > { %v13000_v25 = vld [vmem:[#allocation2 + $0x60] sm:$0xff]  ;;  %v13004_v32 = vld [vmem:[#allocation2 + $0x68] sm:$0xff]  ;;  %v13008_v37 = vld [vmem:[#allocation2 + $0x78] sm:$0xff] }
 0x3eb   : > { %9937 = vmatmul.mubr.msk.f32.gmra.mrb[18].mxu1 %vm256_vm0, %v12898_v57  ;;  %v13012_v48 = vld [vmem:[#allocation2 + $0x80] sm:$0xff]  ;;  %v13016_v13 = vld [vmem:[#allocation2 + $0x90] sm:$0xff]  ;;  %v13020_v27 = vld [vmem:[#allocation2 + $0x98] sm:$0xff] }
 0x3ec   : > { %9939 = vmatprep.mubr.msk.f32.mxu1 %vm256_vm0, %v12903_v38  ;;  %v13024_v9 = vld [vmem:[#allocation2 + $0xa8] sm:$0xff]  ;;  %v13028_v31 = vld [vmem:[#allocation2 + $0xb0] sm:$0xff]  ;;  %v13032_v39 = vld [vmem:[#allocation2 + $0xc0] sm:$0xff] }
 0x3ed   : > { %v13036_v1 = vld [vmem:[#allocation2 + $0xc8] sm:$0xff]  ;;  %v13040_v6 = vld [vmem:[#allocation2 + $0xd8] sm:$0xff]  ;;  %v13044_v63 = vld [vmem:[#allocation2 + $0xe0] sm:$0xff] }
 0x3ee   : > { %v13048_v62 = vld [vmem:[#allocation2 + $0xf0] sm:$0xff]  ;;  %v13052_v4 = vld [vmem:[#allocation2 + $0xf8] sm:$0xff]  ;;  %v13056_v53 = vld [vmem:[#allocation2 + $0x108] sm:$0xff] }
 0x3ef   : > { %9940 = vmatmul.mubr.msk.f32.gmra.mrb[20].mxu1 %vm256_vm0, %v12910_v16  ;;  %v13060_v36 = vld [vmem:[#allocation2 + $0x110] sm:$0xff]  ;;  %v13064_v45 = vld [vmem:[#allocation2 + $0x120] sm:$0xff]  ;;  %v13068_v19 = vld [vmem:[#allocation2 + $0x128] sm:$0xff] }
 0x3f0   : > { %9942 = vmatprep.mubr.msk.f32.mxu1 %vm256_vm0, %v12915_v14  ;;  %v13072_v23 = vld [vmem:[#allocation2 + $0x138] sm:$0xff]  ;;  %v13076_v34 = vld [vmem:[#allocation2 + $0x140] sm:$0xff]  ;;  %v13080_v18 = vld [vmem:[#allocation2 + $0x150] sm:$0xff] }
 0x3f1   : > { %v13084_v40 = vld [vmem:[#allocation2 + $0x158] sm:$0xff]  ;;  %v4946_v11 = vld [vmem:[#allocation2 + $0x2] sm:$0xff] }
 0x3f2   : > { %v8528_v35 = vld [vmem:[%s14156_s3 + $0x78] sm:$0xff] }
 0x3f3   : > { %9943 = vmatmul.mubr.msk.f32.gmra.mrb[22].mxu1 %vm256_vm0, %v12921_v24 }
 0x3f4   : > { %9945 = vmatprep.mubr.msk.f32.mxu1 %vm256_vm0, %v12925_v15 }
 0x3f7   : > { %9946 = vmatmul.mubr.msk.f32.gmra.mrb[24].mxu1 %vm256_vm0, %v12929_v26 }
 0x3f8   : > { %9948 = vmatprep.mubr.msk.f32.mxu1 %vm256_vm0, %v12933_v29 }
 0x3fb   : > { %9949 = vmatmul.mubr.msk.f32.gmra.mrb[26].mxu1 %vm256_vm0, %v12937_v12  ;;  %v13110_v12 = vld [vmem:[#allocation2 + $0x1a] sm:$0xff] }
 0x3fc   : > { %9951 = vmatprep.mubr.msk.f32.mxu1 %vm256_vm0, %v12941_v33  ;;  %v8562_v33 = vld [vmem:[%s14156_s3 + $0x88] sm:$0xff] }
 0x3ff   : > { %9952 = vmatmul.mubr.msk.f32.gmra.mrb[28].mxu1 %vm256_vm0, %v12945_v43  ;;  %v8561_v43 = vld [vmem:[%s14156_s3 + $0x80] sm:$0xff] }
 0x400   : > { %9954 = vmatprep.mubr.msk.f32.mxu1 %vm256_vm0, %v12950_v49  ;;  %v4947_v49 = vld [vmem:[#allocation2 + $0xa] sm:$0xff] }
 0x403   : > { %9955 = vmatmul.mubr.msk.f32.gmra.mrb[30].mxu1 %vm256_vm0, %v12954_v8 }
 0x404   : > { %9965 = vmatprep.mubr.msk.f32.mxu1 %vm256_vm0, %v4231_v44  ;;  %v13088_v44 = vld [vmem:[#allocation2 + $0x168] sm:$0xff] }
 0x407   : > { %9966 = vmatmul.mubr.msk.f32.vlgmr.msra.gmra.mrb[0].mxu1 %vm256_vm0, %v4232_v2  ;;  %v8527_v2 = vld [vmem:[%s14156_s3 + $0x70] sm:$0xff] }
 0x408   : > { %10496 = vmatpush3.bf16.msra.mxu1 %v12804_v22  ;;  %9968 = vmatprep.mubr.msk.f32.mxu1 %vm256_vm0, %v12972_v7  ;;  %v12988_v22 = vld [vmem:[#allocation2 + $0x38] sm:$0xff]  ;;  %v10505_v8 = vpack.c.bf16 %v8528_v35, %v8527_v2  ;;  %v13115_v2 = vpack.c.bf16 %v8562_v33, %v8561_v43  ;;  %v13117_v35 = vld [vmem:[#allocation2 + $0x22] sm:$0xff]  ;;  %v13130_v33 = vld [vmem:[#allocation2 + $0x4a] sm:$0xff] }
 0x409   : > { %10498 = vmatprep.subr.bf16.mxu1 %v10497_v0  ;;  %14430 = vst [vmem:[#allocation47_spill] sm:$0xff] %v13130_v33  ;;  %v13134_v43 = vld [vmem:[#allocation2 + $0x52] sm:$0xff] }
 0x40a   : > { %14431 = vst [vmem:[#allocation48_spill] sm:$0xff] %v13134_v43 }
 0x40b   : > { %9969 = vmatmul.mubr.msk.f32.gmra.mrb[2].mxu1 %vm256_vm0, %v12979_v10 }
 0x40c   : > { %9971 = vmatprep.mubr.msk.f32.mxu1 %vm256_vm0, %v12983_v54  ;;  %10500 = vmatpush3.bf16.msra.mxu1 %v10497_v0  ;;  %v13092_v0 = vld [vmem:[#allocation2 + $0x170] sm:$0xff] }
 0x40d   : > { %10502 = vmatprep.subr.bf16.mxu1 %v12977_v46 }
 0x40f   : > { %9972 = vmatmul.mubr.msk.f32.gmra.mrb[4].mxu1 %vm256_vm0, %v12988_v22 }
 0x410   : > { %9974 = vmatprep.mubr.msk.f32.mxu1 %vm256_vm0, %v12992_v55 }
 0x413   : > { %9975 = vmatmul.mubr.msk.f32.gmra.mrb[6].mxu1 %vm256_vm0, %v12996_v21 }
 0x414   : > { %9977 = vmatprep.mubr.msk.f32.mxu1 %vm256_vm0, %v13000_v25 }
 0x417   : > { %9978 = vmatmul.mubr.msk.f32.gmra.mrb[8].mxu1 %vm256_vm0, %v13004_v32 }
 0x418   : > { %9980 = vmatprep.mubr.msk.f32.mxu1 %vm256_vm0, %v13008_v37 }
 0x41b   : > { %9981 = vmatmul.mubr.msk.f32.gmra.mrb[10].mxu1 %vm256_vm0, %v13012_v48 }
 0x41c   : > { %9983 = vmatprep.mubr.msk.f32.mxu1 %vm256_vm0, %v13016_v13 }
 0x41f   : > { %9984 = vmatmul.mubr.msk.f32.gmra.mrb[12].mxu1 %vm256_vm0, %v13020_v27 }
 0x420   : > { %9986 = vmatprep.mubr.msk.f32.mxu1 %vm256_vm0, %v13024_v9 }
 0x423   : > { %9987 = vmatmul.mubr.msk.f32.gmra.mrb[14].mxu1 %vm256_vm0, %v13028_v31 }
 0x424   : > { %9989 = vmatprep.mubr.msk.f32.mxu1 %vm256_vm0, %v13032_v39 }
 0x427   : > { %9990 = vmatmul.mubr.msk.f32.gmra.mrb[16].mxu1 %vm256_vm0, %v13036_v1 }
 0x428   : > { %9992 = vmatprep.mubr.msk.f32.mxu1 %vm256_vm0, %v13040_v6 }
 0x42b   : > { %9993 = vmatmul.mubr.msk.f32.gmra.mrb[18].mxu1 %vm256_vm0, %v13044_v63 }
 0x42c   : > { %9995 = vmatprep.mubr.msk.f32.mxu1 %vm256_vm0, %v13048_v62 }
 0x42f   : > { %9996 = vmatmul.mubr.msk.f32.gmra.mrb[20].mxu1 %vm256_vm0, %v13052_v4 }
 0x430   : > { %9998 = vmatprep.mubr.msk.f32.mxu1 %vm256_vm0, %v13056_v53 }
 0x433   : > { %9999 = vmatmul.mubr.msk.f32.gmra.mrb[22].mxu1 %vm256_vm0, %v13060_v36 }
 0x434   : > { %10001 = vmatprep.mubr.msk.f32.mxu1 %vm256_vm0, %v13064_v45 }
 0x437   : > { %10002 = vmatmul.mubr.msk.f32.gmra.mrb[24].mxu1 %vm256_vm0, %v13068_v19 }
 0x438   : > { %10004 = vmatprep.mubr.msk.f32.mxu1 %vm256_vm0, %v13072_v23 }
 0x43b   : > { %10005 = vmatmul.mubr.msk.f32.gmra.mrb[26].mxu1 %vm256_vm0, %v13076_v34 }
 0x43c   : > { %10007 = vmatprep.mubr.msk.f32.mxu1 %vm256_vm0, %v13080_v18 }
 0x43f   : > { %10008 = vmatmul.mubr.msk.f32.gmra.mrb[28].mxu1 %vm256_vm0, %v13084_v40 }
 0x440   : > { %10010 = vmatprep.mubr.msk.f32.mxu1 %vm256_vm0, %v13088_v44 }
 0x443   : > { %10011 = vmatmul.mubr.msk.f32.gmra.mrb[30].mxu1 %vm256_vm0, %v13092_v0 }
 0x444   : > { %10021 = vmatprep.mubr.msk.f32.mxu1 %vm256_vm0, %v4946_v11  ;;  %v13121_v11 = vld [vmem:[#allocation2 + $0x32] sm:$0xff] }
 0x445   : > { %14428 = vst [vmem:[#allocation45_spill] sm:$0xff] %v13121_v11 }
 0x447   : > { %10022 = vmatmul.mubr.msk.f32.vlgmr.msra.gmra.mrb[0].mxu1 %vm256_vm0, %v4947_v49  ;;  %v13126_v49 = vld [vmem:[#allocation2 + $0x3a] sm:$0xff] }
 0x448   : > { %10504 = vmatpush3.bf16.msra.mxu1 %v12977_v46  ;;  %10024 = vmatprep.mubr.msk.f32.mxu1 %vm256_vm0, %v13110_v12  ;;  %14429 = vst [vmem:[#allocation46_spill] sm:$0xff] %v13126_v49  ;;  %v13138_v46 = vld [vmem:[#allocation2 + $0x62] sm:$0xff] }
 0x449   : > { %10506 = vmatprep.subr.bf16.mxu1 %v10505_v8  ;;  %14432 = vst [vmem:[#allocation49_spill] sm:$0xff] %v13138_v46 }
 0x44b   : > { %10025 = vmatmul.mubr.msk.f32.gmra.mrb[2].mxu1 %vm256_vm0, %v13117_v35 }
 0x44c   : > { %10027 = vmatprep.mubr.msk.f32.mxu1 %vm256_vm0, %v13121_v11  ;;  %10508 = vmatpush3.bf16.msra.mxu1 %v10505_v8  ;;  %v13142_v8 = vld [vmem:[#allocation2 + $0x6a] sm:$0xff] }
 0x44d   : > { %10510 = vmatprep.subr.bf16.mxu1 %v13115_v2  ;;  %14433 = vst [vmem:[#allocation50_spill] sm:$0xff] %v13142_v8  ;;  %v8598_v11 = vld [vmem:[%s14156_s3 + $0xa8] sm:$0xff] }
 0x44f   : > { %10028 = vmatmul.mubr.msk.f32.gmra.mrb[4].mxu1 %vm256_vm0, %v13126_v49  ;;  %v13146_v49 = vld [vmem:[#allocation2 + $0x7a] sm:$0xff] }
 0x450   : > { %10030 = vmatprep.mubr.msk.f32.mxu1 %vm256_vm0, %v13130_v33  ;;  %14434 = vst [vmem:[#allocation51_spill] sm:$0xff] %v13146_v49  ;;  %v13150_v33 = vld [vmem:[#allocation2 + $0x82] sm:$0xff] }
 0x451   : > { %14435 = vst [vmem:[#allocation52_spill] sm:$0xff] %v13150_v33 }
 0x453   : > { %10031 = vmatmul.mubr.msk.f32.gmra.mrb[6].mxu1 %vm256_vm0, %v13134_v43  ;;  %v13154_v43 = vld [vmem:[#allocation2 + $0x92] sm:$0xff] }
 0x454   : > { %10033 = vmatprep.mubr.msk.f32.mxu1 %vm256_vm0, %v13138_v46  ;;  %14436 = vst [vmem:[#allocation53_spill] sm:$0xff] %v13154_v43  ;;  %v13158_v46 = vld [vmem:[#allocation2 + $0x9a] sm:$0xff] }
 0x455   : > { %14437 = vst [vmem:[#allocation54_spill] sm:$0xff] %v13158_v46 }
 0x457   : > { %10034 = vmatmul.mubr.msk.f32.gmra.mrb[8].mxu1 %vm256_vm0, %v13142_v8  ;;  %v13162_v8 = vld [vmem:[#allocation2 + $0xaa] sm:$0xff] }
 0x458   : > { %10036 = vmatprep.mubr.msk.f32.mxu1 %vm256_vm0, %v13146_v49  ;;  %14438 = vst [vmem:[#allocation55_spill] sm:$0xff] %v13162_v8  ;;  %v13166_v49 = vld [vmem:[#allocation2 + $0xb2] sm:$0xff] }
 0x459   : > { %14439 = vst [vmem:[#allocation56_spill] sm:$0xff] %v13166_v49 }
 0x45b   : > { %10037 = vmatmul.mubr.msk.f32.gmra.mrb[10].mxu1 %vm256_vm0, %v13150_v33  ;;  %v13170_v33 = vld [vmem:[#allocation2 + $0xc2] sm:$0xff] }
 0x45c   : > { %10039 = vmatprep.mubr.msk.f32.mxu1 %vm256_vm0, %v13154_v43  ;;  %14440 = vst [vmem:[#allocation57_spill] sm:$0xff] %v13170_v33  ;;  %v13174_v43 = vld [vmem:[#allocation2 + $0xca] sm:$0xff] }
 0x45d   : > { %14441 = vst [vmem:[#allocation58_spill] sm:$0xff] %v13174_v43 }
 0x45f   : > { %10040 = vmatmul.mubr.msk.f32.gmra.mrb[12].mxu1 %vm256_vm0, %v13158_v46  ;;  %v13178_v46 = vld [vmem:[#allocation2 + $0xda] sm:$0xff] }
 0x460   : > { %10042 = vmatprep.mubr.msk.f32.mxu1 %vm256_vm0, %v13162_v8  ;;  %14442 = vst [vmem:[#allocation59_spill] sm:$0xff] %v13178_v46  ;;  %v13182_v8 = vld [vmem:[#allocation2 + $0xe2] sm:$0xff] }
 0x461   : > { %14443 = vst [vmem:[#allocation60_spill] sm:$0xff] %v13182_v8 }
 0x463   : > { %10043 = vmatmul.mubr.msk.f32.gmra.mrb[14].mxu1 %vm256_vm0, %v13166_v49  ;;  %v13186_v49 = vld [vmem:[#allocation2 + $0xf2] sm:$0xff] }
 0x464   : > { %10045 = vmatprep.mubr.msk.f32.mxu1 %vm256_vm0, %v13170_v33  ;;  %14444 = vst [vmem:[#allocation61_spill] sm:$0xff] %v13186_v49  ;;  %v13190_v33 = vld [vmem:[#allocation2 + $0xfa] sm:$0xff] }
 0x465   : > { %14445 = vst [vmem:[#allocation62_spill] sm:$0xff] %v13190_v33 }
 0x467   : > { %10046 = vmatmul.mubr.msk.f32.gmra.mrb[16].mxu1 %vm256_vm0, %v13174_v43  ;;  %v13194_v43 = vld [vmem:[#allocation2 + $0x10a] sm:$0xff] }
 0x468   : > { %10048 = vmatprep.mubr.msk.f32.mxu1 %vm256_vm0, %v13178_v46  ;;  %14446 = vst [vmem:[#allocation63_spill] sm:$0xff] %v13194_v43  ;;  %v13198_v46 = vld [vmem:[#allocation2 + $0x112] sm:$0xff] }
 0x469   : > { %14447 = vst [vmem:[#allocation64_spill] sm:$0xff] %v13198_v46 }
 0x46b   : > { %10049 = vmatmul.mubr.msk.f32.gmra.mrb[18].mxu1 %vm256_vm0, %v13182_v8  ;;  %v13202_v8 = vld [vmem:[#allocation2 + $0x122] sm:$0xff] }
 0x46c   : > { %10051 = vmatprep.mubr.msk.f32.mxu1 %vm256_vm0, %v13186_v49  ;;  %14448 = vst [vmem:[#allocation65_spill] sm:$0xff] %v13202_v8  ;;  %v13206_v49 = vld [vmem:[#allocation2 + $0x12a] sm:$0xff] }
 0x46d   : > { %14449 = vst [vmem:[#allocation66_spill] sm:$0xff] %v13206_v49 }
 0x46f   : > { %10052 = vmatmul.mubr.msk.f32.gmra.mrb[20].mxu1 %vm256_vm0, %v13190_v33  ;;  %v13210_v33 = vld [vmem:[#allocation2 + $0x13a] sm:$0xff] }
 0x470   : > { %10054 = vmatprep.mubr.msk.f32.mxu1 %vm256_vm0, %v13194_v43  ;;  %14450 = vst [vmem:[#allocation67_spill] sm:$0xff] %v13210_v33  ;;  %v13214_v43 = vld [vmem:[#allocation2 + $0x142] sm:$0xff] }
 0x471   : > { %14451 = vst [vmem:[#allocation68_spill] sm:$0xff] %v13214_v43 }
 0x473   : > { %10055 = vmatmul.mubr.msk.f32.gmra.mrb[22].mxu1 %vm256_vm0, %v13198_v46  ;;  %v13218_v46 = vld [vmem:[#allocation2 + $0x152] sm:$0xff] }
 0x474   : > { %10057 = vmatprep.mubr.msk.f32.mxu1 %vm256_vm0, %v13202_v8  ;;  %14452 = vst [vmem:[#allocation69_spill] sm:$0xff] %v13218_v46  ;;  %v13222_v8 = vld [vmem:[#allocation2 + $0x15a] sm:$0xff] }
 0x475   : > { %14453 = vst [vmem:[#allocation70_spill] sm:$0xff] %v13222_v8 }
 0x477   : > { %10058 = vmatmul.mubr.msk.f32.gmra.mrb[24].mxu1 %vm256_vm0, %v13206_v49  ;;  %v13226_v49 = vld [vmem:[#allocation2 + $0x16a] sm:$0xff] }
 0x478   : > { %10060 = vmatprep.mubr.msk.f32.mxu1 %vm256_vm0, %v13210_v33  ;;  %14454 = vst [vmem:[#allocation36_spill] sm:$0xff] %v13226_v49  ;;  %v13230_v33 = vld [vmem:[#allocation2 + $0x172] sm:$0xff] }
 0x479   : > { %14455 = vst [vmem:[#allocation37_spill] sm:$0xff] %v13230_v33 }
 0x47b   : > { %10061 = vmatmul.mubr.msk.f32.gmra.mrb[26].mxu1 %vm256_vm0, %v13214_v43  ;;  %v8563_v43 = vld [vmem:[%s14156_s3 + $0x90] sm:$0xff] }
 0x47c   : > { %10063 = vmatprep.mubr.msk.f32.mxu1 %vm256_vm0, %v13218_v46  ;;  %v8564_v46 = vld [vmem:[%s14156_s3 + $0x98] sm:$0xff] }
 0x47f   : > { %10064 = vmatmul.mubr.msk.f32.gmra.mrb[28].mxu1 %vm256_vm0, %v13222_v8  ;;  %v10513_v8 = vpack.c.bf16 %v8564_v46, %v8563_v43  ;;  %v8633_v43 = vld [vmem:[%s14156_s3 + $0xc0] sm:$0xff]  ;;  %v8634_v46 = vld [vmem:[%s14156_s3 + $0xc8] sm:$0xff] }
 0x480   : > { %10066 = vmatprep.mubr.msk.f32.mxu1 %vm256_vm0, %v13226_v49  ;;  %v8597_v49 = vld [vmem:[%s14156_s3 + $0xa0] sm:$0xff] }
 0x483   : > { %10067 = vmatmul.mubr.msk.f32.gmra.mrb[30].mxu1 %vm256_vm0, %v13230_v33  ;;  %v10517_v33 = vpack.c.bf16 %v8598_v11, %v8597_v49  ;;  %v8600_v11 = vld [vmem:[%s14156_s3 + $0xb8] sm:$0xff] }
 0x484   : > { %10077 = vmatprep.mubr.msk.f32.mxu1 %vm256_vm0, %v12972_v7  ;;  %v13307_v7 = vld [vmem:[#allocation2 + $0x180] sm:$0xff] }
 0x487   : > { %10078 = vmatmul.mubr.msk.f32.vlgmr.msra.gmra.mrb[0].mxu1 %vm256_vm0, %v12979_v10  ;;  %v13311_v10 = vld [vmem:[#allocation2 + $0x188] sm:$0xff] }
 0x488   : > { %10512 = vmatpush3.bf16.msra.mxu1 %v13115_v2  ;;  %10080 = vmatprep.mubr.msk.f32.mxu1 %vm256_vm0, %v12983_v54  ;;  %v8599_v2 = vld [vmem:[%s14156_s3 + $0xb0] sm:$0xff] }
 0x489   : > { %10514 = vmatprep.subr.bf16.mxu1 %v10513_v8  ;;  %v10521_v49 = vpack.c.bf16 %v8600_v11, %v8599_v2  ;;  %v14476_v2 = vld [vmem:[#allocation60_spill] sm:$0xff]  ;;  %v14477_v11 = vld [vmem:[#allocation61_spill] sm:$0xff] }
 0x48b   : > { %10081 = vmatmul.mubr.msk.f32.gmra.mrb[2].mxu1 %vm256_vm0, %v12988_v22 }
 0x48c   : > { %10083 = vmatprep.mubr.msk.f32.mxu1 %vm256_vm0, %v12992_v55  ;;  %10516 = vmatpush3.bf16.msra.mxu1 %v10513_v8  ;;  %v10525_v8 = vpack.c.bf16 %v8634_v46, %v8633_v43  ;;  %v14479_v43 = vld [vmem:[#allocation63_spill] sm:$0xff]  ;;  %v14480_v46 = vld [vmem:[#allocation64_spill] sm:$0xff] }
 0x48d   : > { %10518 = vmatprep.subr.bf16.mxu1 %v10517_v33 }
 0x48f   : > { %10084 = vmatmul.mubr.msk.f32.gmra.mrb[4].mxu1 %vm256_vm0, %v12996_v21 }
 0x490   : > { %10086 = vmatprep.mubr.msk.f32.mxu1 %vm256_vm0, %v13000_v25 }
 0x493   : > { %10087 = vmatmul.mubr.msk.f32.gmra.mrb[6].mxu1 %vm256_vm0, %v13004_v32 }
 0x494   : > { %10089 = vmatprep.mubr.msk.f32.mxu1 %vm256_vm0, %v13008_v37 }
 0x497   : > { %10090 = vmatmul.mubr.msk.f32.gmra.mrb[8].mxu1 %vm256_vm0, %v13012_v48 }
 0x498   : > { %10092 = vmatprep.mubr.msk.f32.mxu1 %vm256_vm0, %v13016_v13 }
 0x49b   : > { %10093 = vmatmul.mubr.msk.f32.gmra.mrb[10].mxu1 %vm256_vm0, %v13020_v27 }
 0x49c   : > { %10095 = vmatprep.mubr.msk.f32.mxu1 %vm256_vm0, %v13024_v9 }
 0x49f   : > { %10096 = vmatmul.mubr.msk.f32.gmra.mrb[12].mxu1 %vm256_vm0, %v13028_v31 }
 0x4a0   : > { %10098 = vmatprep.mubr.msk.f32.mxu1 %vm256_vm0, %v13032_v39 }
 0x4a3   : > { %10099 = vmatmul.mubr.msk.f32.gmra.mrb[14].mxu1 %vm256_vm0, %v13036_v1 }
 0x4a4   : > { %10101 = vmatprep.mubr.msk.f32.mxu1 %vm256_vm0, %v13040_v6 }
 0x4a7   : > { %10102 = vmatmul.mubr.msk.f32.gmra.mrb[16].mxu1 %vm256_vm0, %v13044_v63 }
 0x4a8   : > { %10104 = vmatprep.mubr.msk.f32.mxu1 %vm256_vm0, %v13048_v62 }
 0x4ab   : > { %10105 = vmatmul.mubr.msk.f32.gmra.mrb[18].mxu1 %vm256_vm0, %v13052_v4 }
 0x4ac   : > { %10107 = vmatprep.mubr.msk.f32.mxu1 %vm256_vm0, %v13056_v53 }
 0x4af   : > { %10108 = vmatmul.mubr.msk.f32.gmra.mrb[20].mxu1 %vm256_vm0, %v13060_v36 }
 0x4b0   : > { %10110 = vmatprep.mubr.msk.f32.mxu1 %vm256_vm0, %v13064_v45 }
 0x4b3   : > { %10111 = vmatmul.mubr.msk.f32.gmra.mrb[22].mxu1 %vm256_vm0, %v13068_v19 }
 0x4b4   : > { %10113 = vmatprep.mubr.msk.f32.mxu1 %vm256_vm0, %v13072_v23 }
 0x4b7   : > { %10114 = vmatmul.mubr.msk.f32.gmra.mrb[24].mxu1 %vm256_vm0, %v13076_v34 }
 0x4b8   : > { %10116 = vmatprep.mubr.msk.f32.mxu1 %vm256_vm0, %v13080_v18 }
 0x4bb   : > { %10117 = vmatmul.mubr.msk.f32.gmra.mrb[26].mxu1 %vm256_vm0, %v13084_v40 }
 0x4bc   : > { %10119 = vmatprep.mubr.msk.f32.mxu1 %vm256_vm0, %v13088_v44 }
 0x4bf   : > { %10120 = vmatmul.mubr.msk.f32.gmra.mrb[28].mxu1 %vm256_vm0, %v13092_v0 }
 0x4c0   : > { %10122 = vmatprep.mubr.msk.f32.mxu1 %vm256_vm0, %v13307_v7 }
 0x4c3   : > { %10123 = vmatmul.mubr.msk.f32.gmra.mrb[30].mxu1 %vm256_vm0, %v13311_v10 }
 0x4c4   : > { %10133 = vmatprep.mubr.msk.f32.mxu1 %vm256_vm0, %v12799_v28  ;;  %v14456_v28 = vld [vmem:[#allocation38_spill] sm:$0xff] }
 0x4c7   : > { %10134 = vmatmul.mubr.msk.f32.vlgmr.msra.gmra.mrb[0].mxu1 %vm256_vm0, %v12806_v42  ;;  %v14457_v42 = vld [vmem:[#allocation39_spill] sm:$0xff] }
 0x4c8   : > { %10520 = vmatpush3.bf16.msra.mxu1 %v10517_v33  ;;  %10136 = vmatprep.mubr.msk.f32.mxu1 %vm256_vm0, %v12810_v30  ;;  %v14458_v30 = vld [vmem:[#allocation40_spill] sm:$0xff]  ;;  %v14475_v33 = vld [vmem:[#allocation59_spill] sm:$0xff] }
 0x4c9   : > { %10522 = vmatprep.subr.bf16.mxu1 %v10521_v49 }
 0x4cb   : > { %10137 = vmatmul.mubr.msk.f32.gmra.mrb[2].mxu1 %vm256_vm0, %v12815_v56  ;;  %v14459_v56 = vld [vmem:[#allocation41_spill] sm:$0xff] }
 0x4cc   : > { %10139 = vmatprep.mubr.msk.f32.mxu1 %vm256_vm0, %v12819_v51  ;;  %10524 = vmatpush3.bf16.msra.mxu1 %v10521_v49  ;;  %v14460_v51 = vld [vmem:[#allocation44_spill] sm:$0xff]  ;;  %v14478_v49 = vld [vmem:[#allocation62_spill] sm:$0xff] }
 0x4cd   : > { %10526 = vmatprep.subr.bf16.mxu1 %v10525_v8 }
 0x4cf   : > { %10140 = vmatmul.mubr.msk.f32.gmra.mrb[4].mxu1 %vm256_vm0, %v12825_v20  ;;  %v13387_v20 = vld [vmem:[#allocation2 + $0x181] sm:$0xff] }
 0x4d0   : > { %10142 = vmatprep.mubr.msk.f32.mxu1 %vm256_vm0, %v12831_v58  ;;  %v13391_v58 = vld [vmem:[#allocation2 + $0x189] sm:$0xff] }
 0x4d3   : > { %10143 = vmatmul.mubr.msk.f32.gmra.mrb[6].mxu1 %vm256_vm0, %v12839_v5  ;;  %v8635_v5 = vld [vmem:[%s14156_s3 + $0xd0] sm:$0xff] }
 0x4d4   : > { %10145 = vmatprep.mubr.msk.f32.mxu1 %vm256_vm0, %v12845_v60  ;;  %v8636_v60 = vld [vmem:[%s14156_s3 + $0xd8] sm:$0xff] }
 0x4d7   : > { %10146 = vmatmul.mubr.msk.f32.gmra.mrb[8].mxu1 %vm256_vm0, %v12852_v59  ;;  %v10529_v59 = vpack.c.bf16 %v8636_v60, %v8635_v5  ;;  %v14487_v5 = vld [vmem:[#allocation36_spill] sm:$0xff]  ;;  %v14488_v60 = vld [vmem:[#allocation37_spill] sm:$0xff] }
 0x4d8   : > { %10148 = vmatprep.mubr.msk.f32.mxu1 %vm256_vm0, %v12857_v52  ;;  %v8669_v52 = vld [vmem:[%s14156_s3 + $0xe0] sm:$0xff] }
 0x4db   : > { %10149 = vmatmul.mubr.msk.f32.gmra.mrb[10].mxu1 %vm256_vm0, %v12863_v41  ;;  %v8670_v41 = vld [vmem:[%s14156_s3 + $0xe8] sm:$0xff] }
 0x4dc   : > { %10151 = vmatprep.mubr.msk.f32.mxu1 %vm256_vm0, %v12867_v47  ;;  %v14461_v47 = vld [vmem:[#allocation45_spill] sm:$0xff] }
 0x4df   : > { %10152 = vmatmul.mubr.msk.f32.gmra.mrb[12].mxu1 %vm256_vm0, %v12874_v50  ;;  %v10533_v50 = vpack.c.bf16 %v8670_v41, %v8669_v52  ;;  %v13471_v52 = vld [vmem:[#allocation2 + $0x18a] sm:$0xff] }
 0x4e0   : > { %10154 = vmatprep.mubr.msk.f32.mxu1 %vm256_vm0, %v12879_v17  ;;  %v14462_v17 = vld [vmem:[#allocation46_spill] sm:$0xff]  ;;  %14490 = vst [vmem:[#allocation39_spill] sm:$0xff] %v13471_v52 }
 0x4e1   : > { %v8671_v41 = vld [vmem:[%s14156_s3 + $0xf0] sm:$0xff] }
 0x4e3   : > { %10155 = vmatmul.mubr.msk.f32.gmra.mrb[14].mxu1 %vm256_vm0, %v12887_v61  ;;  %v14463_v61 = vld [vmem:[#allocation47_spill] sm:$0xff] }
 0x4e4   : > { %10157 = vmatprep.mubr.msk.f32.mxu1 %vm256_vm0, %v12891_v3  ;;  %v14464_v3 = vld [vmem:[#allocation48_spill] sm:$0xff] }
 0x4e7   : > { %10158 = vmatmul.mubr.msk.f32.gmra.mrb[16].mxu1 %vm256_vm0, %v12898_v57  ;;  %v14465_v57 = vld [vmem:[#allocation49_spill] sm:$0xff] }
 0x4e8   : > { %10160 = vmatprep.mubr.msk.f32.mxu1 %vm256_vm0, %v12903_v38  ;;  %v14466_v38 = vld [vmem:[#allocation50_spill] sm:$0xff] }
 0x4eb   : > { %10161 = vmatmul.mubr.msk.f32.gmra.mrb[18].mxu1 %vm256_vm0, %v12910_v16  ;;  %v14467_v16 = vld [vmem:[#allocation51_spill] sm:$0xff] }
 0x4ec   : > { %10163 = vmatprep.mubr.msk.f32.mxu1 %vm256_vm0, %v12915_v14  ;;  %v14468_v14 = vld [vmem:[#allocation52_spill] sm:$0xff] }
 0x4ef   : > { %10164 = vmatmul.mubr.msk.f32.gmra.mrb[20].mxu1 %vm256_vm0, %v12921_v24  ;;  %v14469_v24 = vld [vmem:[#allocation53_spill] sm:$0xff] }
 0x4f0   : > { %10166 = vmatprep.mubr.msk.f32.mxu1 %vm256_vm0, %v12925_v15  ;;  %v14470_v15 = vld [vmem:[#allocation54_spill] sm:$0xff] }
 0x4f3   : > { %10167 = vmatmul.mubr.msk.f32.gmra.mrb[22].mxu1 %vm256_vm0, %v12929_v26  ;;  %v14471_v26 = vld [vmem:[#allocation55_spill] sm:$0xff] }
 0x4f4   : > { %10169 = vmatprep.mubr.msk.f32.mxu1 %vm256_vm0, %v12933_v29  ;;  %v14472_v29 = vld [vmem:[#allocation56_spill] sm:$0xff] }
 0x4f7   : > { %10170 = vmatmul.mubr.msk.f32.gmra.mrb[24].mxu1 %vm256_vm0, %v14456_v28  ;;  %v14482_v28 = vld [vmem:[#allocation66_spill] sm:$0xff] }
 0x4f8   : > { %10172 = vmatprep.mubr.msk.f32.mxu1 %vm256_vm0, %v14457_v42  ;;  %v14483_v42 = vld [vmem:[#allocation67_spill] sm:$0xff] }
 0x4fb   : > { %10173 = vmatmul.mubr.msk.f32.gmra.mrb[26].mxu1 %vm256_vm0, %v14458_v30  ;;  %v14484_v30 = vld [vmem:[#allocation68_spill] sm:$0xff] }
 0x4fc   : > { %10175 = vmatprep.mubr.msk.f32.mxu1 %vm256_vm0, %v14459_v56  ;;  %v14485_v56 = vld [vmem:[#allocation69_spill] sm:$0xff] }
 0x4ff   : > { %10176 = vmatmul.mubr.msk.f32.gmra.mrb[28].mxu1 %vm256_vm0, %v14460_v51  ;;  %v14486_v51 = vld [vmem:[#allocation70_spill] sm:$0xff] }
 0x500   : > { %10178 = vmatprep.mubr.msk.f32.mxu1 %vm256_vm0, %v13387_v20 }
 0x503   : > { %10179 = vmatmul.mubr.msk.f32.gmra.mrb[30].mxu1 %vm256_vm0, %v13391_v58 }
 0x504   : > { %10189 = vmatprep.mubr.msk.f32.mxu1 %vm256_vm0, %v13110_v12  ;;  %v14473_v12 = vld [vmem:[#allocation57_spill] sm:$0xff] }
 0x507   : > { %10190 = vmatmul.mubr.msk.f32.vlgmr.msra.gmra.mrb[0].mxu1 %vm256_vm0, %v13117_v35  ;;  %v14474_v35 = vld [vmem:[#allocation58_spill] sm:$0xff] }
 0x508   : > { %10528 = vmatpush3.bf16.msra.mxu1 %v10525_v8  ;;  %10192 = vmatprep.mubr.msk.f32.mxu1 %vm256_vm0, %v14461_v47  ;;  %v14481_v8 = vld [vmem:[#allocation65_spill] sm:$0xff] }
 0x509   : > { %10530 = vmatprep.subr.bf16.mxu1 %v10529_v59 }
 0x50b   : > { %10193 = vmatmul.mubr.msk.f32.gmra.mrb[2].mxu1 %vm256_vm0, %v14462_v17 }
 0x50c   : > { %10195 = vmatprep.mubr.msk.f32.mxu1 %vm256_vm0, %v14463_v61  ;;  %10532 = vmatpush3.bf16.msra.mxu1 %v10529_v59  ;;  %v13467_v59 = vld [vmem:[#allocation2 + $0x182] sm:$0xff] }
 0x50d   : > { %10534 = vmatprep.subr.bf16.mxu1 %v10533_v50  ;;  %14489 = vst [vmem:[#allocation38_spill] sm:$0xff] %v13467_v59 }
 0x50f   : > { %10196 = vmatmul.mubr.msk.f32.gmra.mrb[4].mxu1 %vm256_vm0, %v14464_v3 }
 0x510   : > { %10198 = vmatprep.mubr.msk.f32.mxu1 %vm256_vm0, %v14465_v57 }
 0x513   : > { %10199 = vmatmul.mubr.msk.f32.gmra.mrb[6].mxu1 %vm256_vm0, %v14466_v38 }
 0x514   : > { %10201 = vmatprep.mubr.msk.f32.mxu1 %vm256_vm0, %v14467_v16 }
 0x517   : > { %10202 = vmatmul.mubr.msk.f32.gmra.mrb[8].mxu1 %vm256_vm0, %v14468_v14 }
 0x518   : > { %10204 = vmatprep.mubr.msk.f32.mxu1 %vm256_vm0, %v14469_v24 }
 0x51b   : > { %10205 = vmatmul.mubr.msk.f32.gmra.mrb[10].mxu1 %vm256_vm0, %v14470_v15 }
 0x51c   : > { %10207 = vmatprep.mubr.msk.f32.mxu1 %vm256_vm0, %v14471_v26 }
 0x51f   : > { %10208 = vmatmul.mubr.msk.f32.gmra.mrb[12].mxu1 %vm256_vm0, %v14472_v29 }
 0x520   : > { %10210 = vmatprep.mubr.msk.f32.mxu1 %vm256_vm0, %v14473_v12 }
 0x523   : > { %10211 = vmatmul.mubr.msk.f32.gmra.mrb[14].mxu1 %vm256_vm0, %v14474_v35 }
 0x524   : > { %10213 = vmatprep.mubr.msk.f32.mxu1 %vm256_vm0, %v14475_v33 }
 0x527   : > { %10214 = vmatmul.mubr.msk.f32.gmra.mrb[16].mxu1 %vm256_vm0, %v14476_v2 }
 0x528   : > { %10216 = vmatprep.mubr.msk.f32.mxu1 %vm256_vm0, %v14477_v11 }
 0x52b   : > { %10217 = vmatmul.mubr.msk.f32.gmra.mrb[18].mxu1 %vm256_vm0, %v14478_v49 }
 0x52c   : > { %10219 = vmatprep.mubr.msk.f32.mxu1 %vm256_vm0, %v14479_v43 }
 0x52f   : > { %10220 = vmatmul.mubr.msk.f32.gmra.mrb[20].mxu1 %vm256_vm0, %v14480_v46 }
 0x530   : > { %10222 = vmatprep.mubr.msk.f32.mxu1 %vm256_vm0, %v14481_v8 }
 0x533   : > { %10223 = vmatmul.mubr.msk.f32.gmra.mrb[22].mxu1 %vm256_vm0, %v14482_v28 }
 0x534   : > { %10225 = vmatprep.mubr.msk.f32.mxu1 %vm256_vm0, %v14483_v42 }
 0x537   : > { %10226 = vmatmul.mubr.msk.f32.gmra.mrb[24].mxu1 %vm256_vm0, %v14484_v30 }
 0x538   : > { %10228 = vmatprep.mubr.msk.f32.mxu1 %vm256_vm0, %v14485_v56 }
 0x53b   : > { %10229 = vmatmul.mubr.msk.f32.gmra.mrb[26].mxu1 %vm256_vm0, %v14486_v51  ;;  %v8672_v51 = vld [vmem:[%s14156_s3 + $0xf8] sm:$0xff] }
 0x53c   : > { %10231 = vmatprep.mubr.msk.f32.mxu1 %vm256_vm0, %v14487_v5  ;;  %v8706_v5 = vld [vmem:[%s14156_s3 + $0x108] sm:$0xff] }
 0x53f   : > { %10232 = vmatmul.mubr.msk.f32.gmra.mrb[28].mxu1 %vm256_vm0, %v14488_v60  ;;  %v10537_v60 = vpack.c.bf16 %v8672_v51, %v8671_v41  ;;  %v6922_v51 = vld [vmem:[#allocation2 + $0x169] sm:$0xff] }
 0x540   : > { %10234 = vmatprep.mubr.msk.f32.mxu1 %vm256_vm0, %v13467_v59  ;;  %v8705_v59 = vld [vmem:[%s14156_s3 + $0x100] sm:$0xff] }
 0x543   : > { %10235 = vmatmul.mubr.msk.f32.gmra.mrb[30].mxu1 %vm256_vm0, %v13471_v52  ;;  %v10541_v52 = vpack.c.bf16 %v8706_v5, %v8705_v59  ;;  %v6923_v5 = vld [vmem:[#allocation2 + $0x171] sm:$0xff]  ;;  %v6927_v59 = vld [vmem:[#allocation2 + $0x1a1] sm:$0xff] }
 0x544   : > { %10245 = vmatprep.mubr.msk.f32.mxu1 %vm256_vm0, %v12983_v54  ;;  %v6536_v54 = vld [vmem:[#allocation2 + $0x198] sm:$0xff] }
 0x547   : > { %10246 = vmatmul.mubr.msk.f32.vlgmr.msra.gmra.mrb[0].mxu1 %vm256_vm0, %v12988_v22  ;;  %v6537_v22 = vld [vmem:[#allocation2 + $0x1a0] sm:$0xff] }
 0x548   : > { %10536 = vmatpush3.bf16.msra.mxu1 %v10533_v50  ;;  %10248 = vmatprep.mubr.msk.f32.mxu1 %vm256_vm0, %v12992_v55  ;;  %v8707_v55 = vld [vmem:[%s14156_s3 + $0x110] sm:$0xff]  ;;  %v6921_v50 = vld [vmem:[#allocation2 + $0x159] sm:$0xff] }
 0x549   : > { %10538 = vmatprep.subr.bf16.mxu1 %v10537_v60 }
 0x54b   : > { %10249 = vmatmul.mubr.msk.f32.gmra.mrb[2].mxu1 %vm256_vm0, %v12996_v21  ;;  %v8708_v21 = vld [vmem:[%s14156_s3 + $0x118] sm:$0xff] }
 0x54c   : > { %10251 = vmatprep.mubr.msk.f32.mxu1 %vm256_vm0, %v13000_v25  ;;  %10540 = vmatpush3.bf16.msra.mxu1 %v10537_v60  ;;  %v6896_v25 = vld [vmem:[#allocation2 + $0x31] sm:$0xff]  ;;  %v6926_v60 = vld [vmem:[#allocation2 + $0x199] sm:$0xff] }
 0x54d   : > { %10542 = vmatprep.subr.bf16.mxu1 %v10541_v52 }
 0x54f   : > { %10252 = vmatmul.mubr.msk.f32.gmra.mrb[4].mxu1 %vm256_vm0, %v13004_v32  ;;  %v10545_v32 = vpack.c.bf16 %v8708_v21, %v8707_v55 }
 0x550   : > { %10254 = vmatprep.mubr.msk.f32.mxu1 %vm256_vm0, %v13008_v37  ;;  %v6897_v37 = vld [vmem:[#allocation2 + $0x39] sm:$0xff] }
 0x553   : > { %10255 = vmatmul.mubr.msk.f32.gmra.mrb[6].mxu1 %vm256_vm0, %v13012_v48  ;;  %v6898_v48 = vld [vmem:[#allocation2 + $0x49] sm:$0xff] }
 0x554   : > { %10257 = vmatprep.mubr.msk.f32.mxu1 %vm256_vm0, %v13016_v13  ;;  %v6899_v13 = vld [vmem:[#allocation2 + $0x51] sm:$0xff] }
 0x557   : > { %10258 = vmatmul.mubr.msk.f32.gmra.mrb[8].mxu1 %vm256_vm0, %v13020_v27  ;;  %v6900_v27 = vld [vmem:[#allocation2 + $0x61] sm:$0xff] }
 0x558   : > { %10260 = vmatprep.mubr.msk.f32.mxu1 %vm256_vm0, %v13024_v9  ;;  %v6901_v9 = vld [vmem:[#allocation2 + $0x69] sm:$0xff] }
 0x55b   : > { %10261 = vmatmul.mubr.msk.f32.gmra.mrb[10].mxu1 %vm256_vm0, %v13028_v31  ;;  %v6902_v31 = vld [vmem:[#allocation2 + $0x79] sm:$0xff] }
 0x55c   : > { %10263 = vmatprep.mubr.msk.f32.mxu1 %vm256_vm0, %v13032_v39  ;;  %v6903_v39 = vld [vmem:[#allocation2 + $0x81] sm:$0xff] }
 0x55f   : > { %10264 = vmatmul.mubr.msk.f32.gmra.mrb[12].mxu1 %vm256_vm0, %v13036_v1  ;;  %v6904_v1 = vld [vmem:[#allocation2 + $0x91] sm:$0xff] }
 0x560   : > { %10266 = vmatprep.mubr.msk.f32.mxu1 %vm256_vm0, %v13040_v6  ;;  %v6905_v6 = vld [vmem:[#allocation2 + $0x99] sm:$0xff] }
 0x563   : > { %10267 = vmatmul.mubr.msk.f32.gmra.mrb[14].mxu1 %vm256_vm0, %v13044_v63  ;;  %v6906_v63 = vld [vmem:[#allocation2 + $0xa9] sm:$0xff] }
 0x564   : > { %10269 = vmatprep.mubr.msk.f32.mxu1 %vm256_vm0, %v13048_v62  ;;  %v6907_v62 = vld [vmem:[#allocation2 + $0xb1] sm:$0xff] }
 0x567   : > { %10270 = vmatmul.mubr.msk.f32.gmra.mrb[16].mxu1 %vm256_vm0, %v13052_v4  ;;  %v6908_v4 = vld [vmem:[#allocation2 + $0xc1] sm:$0xff] }
 0x568   : > { %10272 = vmatprep.mubr.msk.f32.mxu1 %vm256_vm0, %v13056_v53  ;;  %v6909_v53 = vld [vmem:[#allocation2 + $0xc9] sm:$0xff] }
 0x56b   : > { %10273 = vmatmul.mubr.msk.f32.gmra.mrb[18].mxu1 %vm256_vm0, %v13060_v36  ;;  %v6910_v36 = vld [vmem:[#allocation2 + $0xd9] sm:$0xff] }
 0x56c   : > { %10275 = vmatprep.mubr.msk.f32.mxu1 %vm256_vm0, %v13064_v45  ;;  %v6911_v45 = vld [vmem:[#allocation2 + $0xe1] sm:$0xff] }
 0x56f   : > { %10276 = vmatmul.mubr.msk.f32.gmra.mrb[20].mxu1 %vm256_vm0, %v13068_v19  ;;  %v6912_v19 = vld [vmem:[#allocation2 + $0xf1] sm:$0xff] }
 0x570   : > { %10278 = vmatprep.mubr.msk.f32.mxu1 %vm256_vm0, %v13072_v23  ;;  %v6913_v23 = vld [vmem:[#allocation2 + $0xf9] sm:$0xff] }
 0x573   : > { %10279 = vmatmul.mubr.msk.f32.gmra.mrb[22].mxu1 %vm256_vm0, %v13076_v34  ;;  %v6914_v34 = vld [vmem:[#allocation2 + $0x109] sm:$0xff] }
 0x574   : > { %10281 = vmatprep.mubr.msk.f32.mxu1 %vm256_vm0, %v13080_v18  ;;  %v6915_v18 = vld [vmem:[#allocation2 + $0x111] sm:$0xff] }
 0x577   : > { %10282 = vmatmul.mubr.msk.f32.gmra.mrb[24].mxu1 %vm256_vm0, %v13084_v40  ;;  %v6916_v40 = vld [vmem:[#allocation2 + $0x121] sm:$0xff] }
 0x578   : > { %10284 = vmatprep.mubr.msk.f32.mxu1 %vm256_vm0, %v13088_v44  ;;  %v6917_v44 = vld [vmem:[#allocation2 + $0x129] sm:$0xff] }
 0x57b   : > { %10285 = vmatmul.mubr.msk.f32.gmra.mrb[26].mxu1 %vm256_vm0, %v13092_v0  ;;  %v6918_v0 = vld [vmem:[#allocation2 + $0x139] sm:$0xff] }
 0x57c   : > { %10287 = vmatprep.mubr.msk.f32.mxu1 %vm256_vm0, %v13307_v7  ;;  %v6919_v7 = vld [vmem:[#allocation2 + $0x141] sm:$0xff] }
 0x57f   : > { %10288 = vmatmul.mubr.msk.f32.gmra.mrb[28].mxu1 %vm256_vm0, %v13311_v10  ;;  %v6920_v10 = vld [vmem:[#allocation2 + $0x151] sm:$0xff] }
 0x580   : > { %10290 = vmatprep.mubr.msk.f32.mxu1 %vm256_vm0, %v6536_v54 }
 0x583   : > { %10291 = vmatmul.mubr.msk.f32.gmra.mrb[30].mxu1 %vm256_vm0, %v6537_v22 }
 0x584   : > { %10301 = vmatprep.mubr.msk.f32.mxu1 %vm256_vm0, %v6896_v25 }
 0x587   : > { %10302 = vmatmul.mubr.msk.f32.vlgmr.msra.gmra.mrb[0].mxu1 %vm256_vm0, %v6897_v37 }
 0x588   : > { %10544 = vmatpush3.bf16.msra.mxu1 %v10541_v52  ;;  %10304 = vmatprep.mubr.msk.f32.mxu1 %vm256_vm0, %v6898_v48 }
 0x589   : > { %10546 = vmatprep.subr.bf16.mxu1 %v10545_v32 }
 0x58b   : > { %10305 = vmatmul.mubr.msk.f32.gmra.mrb[2].mxu1 %vm256_vm0, %v6899_v13 }
 0x58c   : > { %10307 = vmatprep.mubr.msk.f32.mxu1 %vm256_vm0, %v6900_v27  ;;  %10548 = vmatpush3.bf16.msra.mxu1 %v10545_v32 }
 0x58f   : > { %10308 = vmatmul.mubr.msk.f32.gmra.mrb[4].mxu1 %vm256_vm0, %v6901_v9 }
 0x590   : > { %10310 = vmatprep.mubr.msk.f32.mxu1 %vm256_vm0, %v6902_v31 }
 0x593   : > { %10311 = vmatmul.mubr.msk.f32.gmra.mrb[6].mxu1 %vm256_vm0, %v6903_v39 }
 0x594   : > { %10313 = vmatprep.mubr.msk.f32.mxu1 %vm256_vm0, %v6904_v1 }
 0x597   : > { %10314 = vmatmul.mubr.msk.f32.gmra.mrb[8].mxu1 %vm256_vm0, %v6905_v6 }
 0x598   : > { %10316 = vmatprep.mubr.msk.f32.mxu1 %vm256_vm0, %v6906_v63 }
 0x59b   : > { %10317 = vmatmul.mubr.msk.f32.gmra.mrb[10].mxu1 %vm256_vm0, %v6907_v62 }
 0x59c   : > { %10319 = vmatprep.mubr.msk.f32.mxu1 %vm256_vm0, %v6908_v4 }
 0x59f   : > { %10320 = vmatmul.mubr.msk.f32.gmra.mrb[12].mxu1 %vm256_vm0, %v6909_v53 }
 0x5a0   : > { %10322 = vmatprep.mubr.msk.f32.mxu1 %vm256_vm0, %v6910_v36 }
 0x5a3   : > { %10323 = vmatmul.mubr.msk.f32.gmra.mrb[14].mxu1 %vm256_vm0, %v6911_v45 }
 0x5a4   : > { %10325 = vmatprep.mubr.msk.f32.mxu1 %vm256_vm0, %v6912_v19 }
 0x5a7   : > { %10326 = vmatmul.mubr.msk.f32.gmra.mrb[16].mxu1 %vm256_vm0, %v6913_v23 }
 0x5a8   : > { %10328 = vmatprep.mubr.msk.f32.mxu1 %vm256_vm0, %v6914_v34 }
 0x5ab   : > { %10329 = vmatmul.mubr.msk.f32.gmra.mrb[18].mxu1 %vm256_vm0, %v6915_v18 }
 0x5ac   : > { %10331 = vmatprep.mubr.msk.f32.mxu1 %vm256_vm0, %v6916_v40 }
 0x5af   : > { %10332 = vmatmul.mubr.msk.f32.gmra.mrb[20].mxu1 %vm256_vm0, %v6917_v44 }
 0x5b0   : > { %10334 = vmatprep.mubr.msk.f32.mxu1 %vm256_vm0, %v6918_v0 }
 0x5b3   : > { %10335 = vmatmul.mubr.msk.f32.gmra.mrb[22].mxu1 %vm256_vm0, %v6919_v7 }
 0x5b4   : > { %10337 = vmatprep.mubr.msk.f32.mxu1 %vm256_vm0, %v6920_v10 }
 0x5b7   : > { %10338 = vmatmul.mubr.msk.f32.gmra.mrb[24].mxu1 %vm256_vm0, %v6921_v50 }
 0x5b8   : > { %10340 = vmatprep.mubr.msk.f32.mxu1 %vm256_vm0, %v6922_v51 }
 0x5bb   : > { %10341 = vmatmul.mubr.msk.f32.gmra.mrb[26].mxu1 %vm256_vm0, %v6923_v5 }
 0x5bc   : > { %10343 = vmatprep.mubr.msk.f32.mxu1 %vm256_vm0, %v13387_v20  ;;  %v14491_v20 = vld [vmem:[#allocation70_spill] sm:$0xff] }
 0x5bf   : > { %10344 = vmatmul.mubr.msk.f32.gmra.mrb[28].mxu1 %vm256_vm0, %v13391_v58  ;;  %v14492_v58 = vld [vmem:[#allocation36_spill] sm:$0xff] }
 0x5c0   : > { %10346 = vmatprep.mubr.msk.f32.mxu1 %vm256_vm0, %v6926_v60 }
 0x5c3   : > { %10347 = vmatmul.mubr.msk.f32.gmra.mrb[30].mxu1 %vm256_vm0, %v6927_v59 }
 0x5c4   : > { %10357 = vmatprep.mubr.msk.f32.mxu1 %vm256_vm0, %v14461_v47  ;;  %v14493_v47 = vld [vmem:[#allocation37_spill] sm:$0xff] }
 0x5c7   : > { %10358 = vmatmul.mubr.msk.f32.vlgmr.msra.gmra.mrb[0].mxu1 %vm256_vm0, %v14462_v17  ;;  %v14494_v17 = vld [vmem:[#allocation38_spill] sm:$0xff] }
 0x5c8   : > { %10360 = vmatprep.mubr.msk.f32.mxu1 %vm256_vm0, %v14463_v61  ;;  %v14495_v61 = vld [vmem:[#allocation39_spill] sm:$0xff] }
 0x5cb   : > { %10361 = vmatmul.mubr.msk.f32.gmra.mrb[2].mxu1 %vm256_vm0, %v14464_v3  ;;  %v7316_v3 = vld [vmem:[#allocation2 + $0x19a] sm:$0xff] }
 0x5cc   : > { %10363 = vmatprep.mubr.msk.f32.mxu1 %vm256_vm0, %v14465_v57  ;;  %v7317_v57 = vld [vmem:[#allocation2 + $0x1a2] sm:$0xff] }
 0x5cf   : > { %10364 = vmatmul.mubr.msk.f32.gmra.mrb[4].mxu1 %vm256_vm0, %v14466_v38  ;;  %v13654_v38 = vld [vmem:[%s14157_s4] ss:$0 sm:$0xff] }
 0x5d0   : > { %10366 = vmatprep.mubr.msk.f32.mxu1 %vm256_vm0, %v14467_v16 }
 0x5d3   : > { %10367 = vmatmul.mubr.msk.f32.gmra.mrb[6].mxu1 %vm256_vm0, %v14468_v14 }
 0x5d4   : > { %10369 = vmatprep.mubr.msk.f32.mxu1 %vm256_vm0, %v14469_v24 }
 0x5d7   : > { %10370 = vmatmul.mubr.msk.f32.gmra.mrb[8].mxu1 %vm256_vm0, %v14470_v15 }
 0x5d8   : > { %10372 = vmatprep.mubr.msk.f32.mxu1 %vm256_vm0, %v14471_v26 }
 0x5db   : > { %10373 = vmatmul.mubr.msk.f32.gmra.mrb[10].mxu1 %vm256_vm0, %v14472_v29 }
 0x5dc   : > { %10375 = vmatprep.mubr.msk.f32.mxu1 %vm256_vm0, %v14473_v12 }
 0x5df   : > { %10376 = vmatmul.mubr.msk.f32.gmra.mrb[12].mxu1 %vm256_vm0, %v14474_v35 }
 0x5e0   : > { %10378 = vmatprep.mubr.msk.f32.mxu1 %vm256_vm0, %v14475_v33 }
 0x5e3   : > { %10379 = vmatmul.mubr.msk.f32.gmra.mrb[14].mxu1 %vm256_vm0, %v14476_v2 }
 0x5e4   : > { %10381 = vmatprep.mubr.msk.f32.mxu1 %vm256_vm0, %v14477_v11 }
 0x5e7   : > { %10382 = vmatmul.mubr.msk.f32.gmra.mrb[16].mxu1 %vm256_vm0, %v14478_v49 }
 0x5e8   : > { %10384 = vmatprep.mubr.msk.f32.mxu1 %vm256_vm0, %v14479_v43 }
 0x5eb   : > { %10385 = vmatmul.mubr.msk.f32.gmra.mrb[18].mxu1 %vm256_vm0, %v14480_v46 }
 0x5ec   : > { %10387 = vmatprep.mubr.msk.f32.mxu1 %vm256_vm0, %v14481_v8 }
 0x5ef   : > { %10388 = vmatmul.mubr.msk.f32.gmra.mrb[20].mxu1 %vm256_vm0, %v14482_v28 }
 0x5f0   : > { %10390 = vmatprep.mubr.msk.f32.mxu1 %vm256_vm0, %v14483_v42 }
 0x5f3   : > { %10391 = vmatmul.mubr.msk.f32.gmra.mrb[22].mxu1 %vm256_vm0, %v14484_v30 }
 0x5f4   : > { %10393 = vmatprep.mubr.msk.f32.mxu1 %vm256_vm0, %v14485_v56 }
 0x5f7   : > { %10394 = vmatmul.mubr.msk.f32.gmra.mrb[24].mxu1 %vm256_vm0, %v14491_v20 }
 0x5f8   : > { %10396 = vmatprep.mubr.msk.f32.mxu1 %vm256_vm0, %v14492_v58 }
 0x5fb   : > { %10397 = vmatmul.mubr.msk.f32.gmra.mrb[26].mxu1 %vm256_vm0, %v14493_v47 }
 0x5fc   : > { %10399 = vmatprep.mubr.msk.f32.mxu1 %vm256_vm0, %v14494_v17 }
 0x5ff   : > { %10400 = vmatmul.mubr.msk.f32.gmra.mrb[28].mxu1 %vm256_vm0, %v14495_v61 }
 0x600   : > { %10402 = vmatprep.mubr.msk.f32.mxu1 %vm256_vm0, %v7316_v3 }
 0x603   : > { %10403 = vmatmul.mubr.msk.f32.gmra.mrb[30].mxu1 %vm256_vm0, %v7317_v57 }
 0x69a   : > { %v10359_v16 = vpop.f32.mrb[0].mxu1 }
 0x69b   : > { %v13657_v14 = vadd.f32 %v10359_v16, %v13654_v38  ;;  %v7485_v24 = vpop.f32.mrb[1].mxu1 }
 0x69c   : > { %v13660_v15 = vadd.f32 %v13654_v38, %v7485_v24 }
 0x69d   : > { %v7716_v26 = vsel %vm256_vm0, %v13657_v14, 0.0 }
 0x69e   : > { %v7715_v29 = vsel %vm256_vm0, %v13660_v15, 0.0  ;;  %v10362_v12 = vpop.f32.mrb[2].mxu1 }
 0x69f   : > { %v7495_v35 = vpop.f32.mrb[3].mxu1  ;;  %v13667_v33 = vadd.f32 %v10362_v12, %v13654_v38  ;;  %v7717_v11 = vadd.f32 %v7716_v26, %v7715_v29 }
 0x6a0   : > { %v13670_v2 = vadd.f32 %v13654_v38, %v7495_v35 }
 0x6a1   : > { %v7720_v28 = vsel %vm256_vm0, %v13667_v33, 0.0 }
 0x6a2   : > { %v7718_v49 = vsel %vm256_vm0, %v13670_v2, 0.0  ;;  %v10365_v43 = vpop.f32.mrb[4].mxu1 }
 0x6a3   : > { %v7719_v46 = vadd.f32 %v7718_v49, %v7717_v11  ;;  %v7505_v8 = vpop.f32.mrb[5].mxu1  ;;  %v13677_v42 = vadd.f32 %v10365_v43, %v13654_v38 }
 0x6a4   : > { %v13680_v30 = vadd.f32 %v13654_v38, %v7505_v8 }
 0x6a5   : > { %v7721_v56 = vadd.f32 %v7720_v28, %v7719_v46  ;;  %v7724_v55 = vsel %vm256_vm0, %v13677_v42, 0.0 }
 0x6a6   : > { %v7722_v52 = vsel %vm256_vm0, %v13680_v30, 0.0  ;;  %v10368_v41 = vpop.f32.mrb[6].mxu1 }
 0x6a7   : > { %v7723_v54 = vadd.f32 %v7722_v52, %v7721_v56  ;;  %v7515_v22 = vpop.f32.mrb[7].mxu1  ;;  %v13687_v21 = vadd.f32 %v10368_v41, %v13654_v38 }
 0x6a8   : > { %v13690_v25 = vadd.f32 %v13654_v38, %v7515_v22 }
 0x6a9   : > { %v7725_v32 = vadd.f32 %v7724_v55, %v7723_v54  ;;  %v7728_v9 = vsel %vm256_vm0, %v13687_v21, 0.0 }
 0x6aa   : > { %v7726_v37 = vsel %vm256_vm0, %v13690_v25, 0.0  ;;  %v10371_v48 = vpop.f32.mrb[8].mxu1 }
 0x6ab   : > { %v7727_v13 = vadd.f32 %v7726_v37, %v7725_v32  ;;  %v7525_v27 = vpop.f32.mrb[9].mxu1  ;;  %v13697_v31 = vadd.f32 %v10371_v48, %v13654_v38 }
 0x6ac   : > { %v13700_v39 = vadd.f32 %v13654_v38, %v7525_v27 }
 0x6ad   : > { %v7729_v1 = vadd.f32 %v7728_v9, %v7727_v13  ;;  %v7732_v53 = vsel %vm256_vm0, %v13697_v31, 0.0 }
 0x6ae   : > { %v7730_v6 = vsel %vm256_vm0, %v13700_v39, 0.0  ;;  %v10374_v63 = vpop.f32.mrb[10].mxu1 }
 0x6af   : > { %v7731_v62 = vadd.f32 %v7730_v6, %v7729_v1  ;;  %v7535_v4 = vpop.f32.mrb[11].mxu1  ;;  %v13707_v36 = vadd.f32 %v10374_v63, %v13654_v38 }
 0x6b0   : > { %v13710_v45 = vadd.f32 %v13654_v38, %v7535_v4 }
 0x6b1   : > { %v7733_v19 = vadd.f32 %v7732_v53, %v7731_v62  ;;  %v7736_v44 = vsel %vm256_vm0, %v13707_v36, 0.0 }
 0x6b2   : > { %v7734_v23 = vsel %vm256_vm0, %v13710_v45, 0.0  ;;  %v10377_v34 = vpop.f32.mrb[12].mxu1 }
 0x6b3   : > { %v7735_v18 = vadd.f32 %v7734_v23, %v7733_v19  ;;  %v7545_v40 = vpop.f32.mrb[13].mxu1  ;;  %v13717_v0 = vadd.f32 %v10377_v34, %v13654_v38 }
 0x6b4   : > { %v13720_v7 = vadd.f32 %v13654_v38, %v7545_v40 }
 0x6b5   : > { %v7737_v10 = vadd.f32 %v7736_v44, %v7735_v18  ;;  %v7740_v59 = vsel %vm256_vm0, %v13717_v0, 0.0 }
 0x6b6   : > { %v7738_v50 = vsel %vm256_vm0, %v13720_v7, 0.0  ;;  %v10380_v51 = vpop.f32.mrb[14].mxu1 }
 0x6b7   : > { %v7739_v5 = vadd.f32 %v7738_v50, %v7737_v10  ;;  %v7555_v60 = vpop.f32.mrb[15].mxu1  ;;  %v13727_v20 = vadd.f32 %v10380_v51, %v13654_v38 }
 0x6b8   : > { %v13730_v58 = vadd.f32 %v13654_v38, %v7555_v60 }
 0x6b9   : > { %v7741_v47 = vadd.f32 %v7740_v59, %v7739_v5  ;;  %v7744_v16 = vsel %vm256_vm0, %v13727_v20, 0.0 }
 0x6ba   : > { %v7742_v17 = vsel %vm256_vm0, %v13730_v58, 0.0  ;;  %v10383_v61 = vpop.f32.mrb[16].mxu1 }
 0x6bb   : > { %v7743_v3 = vadd.f32 %v7742_v17, %v7741_v47  ;;  %v7565_v57 = vpop.f32.mrb[17].mxu1  ;;  %v13737_v24 = vadd.f32 %v10383_v61, %v13654_v38 }
 0x6bc   : > { %v13740_v26 = vadd.f32 %v13654_v38, %v7565_v57 }
 0x6bd   : > { %v7745_v29 = vadd.f32 %v7744_v16, %v7743_v3  ;;  %v7748_v43 = vsel %vm256_vm0, %v13737_v24, 0.0 }
 0x6be   : > { %v7746_v12 = vsel %vm256_vm0, %v13740_v26, 0.0  ;;  %v10386_v35 = vpop.f32.mrb[18].mxu1 }
 0x6bf   : > { %v7747_v11 = vadd.f32 %v7746_v12, %v7745_v29  ;;  %v7575_v49 = vpop.f32.mrb[19].mxu1  ;;  %v13747_v46 = vadd.f32 %v10386_v35, %v13654_v38 }
 0x6c0   : > { %v13750_v8 = vadd.f32 %v13654_v38, %v7575_v49 }
 0x6c1   : > { %v7749_v28 = vadd.f32 %v7748_v43, %v7747_v11  ;;  %v7752_v22 = vsel %vm256_vm0, %v13747_v46, 0.0 }
 0x6c2   : > { %v7750_v56 = vsel %vm256_vm0, %v13750_v8, 0.0  ;;  %v10389_v52 = vpop.f32.mrb[20].mxu1 }
 0x6c3   : > { %v7751_v41 = vadd.f32 %v7750_v56, %v7749_v28  ;;  %v7585_v54 = vpop.f32.mrb[21].mxu1  ;;  %v13757_v55 = vadd.f32 %v10389_v52, %v13654_v38 }
 0x6c4   : > { %v13760_v32 = vadd.f32 %v13654_v38, %v7585_v54 }
 0x6c5   : > { %v7753_v37 = vadd.f32 %v7752_v22, %v7751_v41  ;;  %v7756_v1 = vsel %vm256_vm0, %v13757_v55, 0.0 }
 0x6c6   : > { %v7754_v48 = vsel %vm256_vm0, %v13760_v32, 0.0  ;;  %v10392_v13 = vpop.f32.mrb[22].mxu1 }
 0x6c7   : > { %v7755_v27 = vadd.f32 %v7754_v48, %v7753_v37  ;;  %v7595_v9 = vpop.f32.mrb[23].mxu1  ;;  %v7706_v6 = vadd.f32 %v10392_v13, %v13654_v38 }
 0x6c8   : > { %v7705_v63 = vadd.f32 %v13654_v38, %v7595_v9 }
 0x6c9   : > { %v7757_v62 = vadd.f32 %v7756_v1, %v7755_v27  ;;  %v7760_v34 = vsel %vm256_vm0, %v7706_v6, 0.0 }
 0x6ca   : > { %v7758_v4 = vsel %vm256_vm0, %v7705_v63, 0.0  ;;  %v10395_v53 = vpop.f32.mrb[24].mxu1 }
 0x6cb   : > { %v7759_v19 = vadd.f32 %v7758_v4, %v7757_v62  ;;  %v7605_v23 = vpop.f32.mrb[25].mxu1  ;;  %v7708_v18 = vadd.f32 %v10395_v53, %v13654_v38 }
 0x6cc   : > { %v7707_v40 = vadd.f32 %v13654_v38, %v7605_v23 }
 0x6cd   : > { %v7761_v44 = vadd.f32 %v7760_v34, %v7759_v19  ;;  %v7764_v60 = vsel %vm256_vm0, %v7708_v18, 0.0 }
 0x6ce   : > { %v7762_v10 = vsel %vm256_vm0, %v7707_v40, 0.0  ;;  %v10398_v50 = vpop.f32.mrb[26].mxu1 }
 0x6cf   : > { %v7763_v51 = vadd.f32 %v7762_v10, %v7761_v44  ;;  %v7615_v5 = vpop.f32.mrb[27].mxu1  ;;  %v7710_v59 = vadd.f32 %v10398_v50, %v13654_v38 }
 0x6d0   : > { %v7709_v47 = vadd.f32 %v13654_v38, %v7615_v5 }
 0x6d1   : > { %v7765_v17 = vadd.f32 %v7764_v60, %v7763_v51  ;;  %v7768_v29 = vsel %vm256_vm0, %v7710_v59, 0.0 }
 0x6d2   : > { %v7766_v61 = vsel %vm256_vm0, %v7709_v47, 0.0  ;;  %v10401_v3 = vpop.f32.mrb[28].mxu1 }
 0x6d3   : > { %v7767_v57 = vadd.f32 %v7766_v61, %v7765_v17  ;;  %v7625_v16 = vpop.f32.mrb[29].mxu1  ;;  %v7712_v12 = vadd.f32 %v10401_v3, %v13654_v38 }
 0x6d4   : > { %v7711_v35 = vadd.f32 %v13654_v38, %v7625_v16 }
 0x6d5   : > { %v7769_v11 = vadd.f32 %v7768_v29, %v7767_v57  ;;  %v7772_v52 = vsel %vm256_vm0, %v7712_v12, 0.0 }
 0x6d6   : > { %v7770_v49 = vsel %vm256_vm0, %v7711_v35, 0.0  ;;  %v10404_v43 = vpop.f32.mrb[30].mxu1 }
 0x6d7   : > { %v7771_v28 = vadd.f32 %v7770_v49, %v7769_v11  ;;  %v7635_v56 = vpop.f32.mrb[31].mxu1  ;;  %v7714_v41 = vadd.f32 %v10404_v43, %v13654_v38 }
 0x6d8   : > { %v7713_v54 = vadd.f32 %v13654_v38, %v7635_v56 }
 0x6d9   : > { %v7773_v22 = vadd.f32 %v7772_v52, %v7771_v28  ;;  %v7776_v13 = vsel %vm256_vm0, %v7714_v41, 0.0 }
 0x6da   : > { %v7774_v37 = vsel %vm256_vm0, %v7713_v54, 0.0 }
 0x6db   : > { %v7775_v48 = vadd.f32 %v7774_v37, %v7773_v22 }
 0x6dd   : > { %v7777_v27 = vadd.f32 %v7776_v13, %v7775_v48 }
 0x6df   : > { %v7778_v9 = vrot.slane %v7777_v27, 4 }
 0x6e1   : > { %v7779_v1 = vadd.f32 %v7778_v9, %v7777_v27 }
 0x6e3   : > { %v7780_v62 = vrot.slane %v7779_v1, 2 }
 0x6e5   : > { %v7781_v4 = vadd.f32 %v7780_v62, %v7779_v1 }
 0x6e7   : > { %v7782_v53 = vrot.slane %v7781_v4, 1 }
 0x6e9   : > { %v7783_v19 = vadd.f32 %v7782_v53, %v7781_v4 }
 0x6eb   : > { %v7784_v23 = vmul.f32 0.00390625, %v7783_v19 }
 0x6ed   : > { %v13787_v34 = vsub.f32 %v13710_v45, %v7784_v23  ;;  %v13790_v44 = vsub.f32 %v13707_v36, %v7784_v23  ;;  %v13793_v38 = vsub.f32 %v13720_v7, %v7784_v23  ;;  %v13796_v10 = vsub.f32 %v13717_v0, %v7784_v23 }
 0x6ee   : > { %v13799_v50 = vsub.f32 %v13730_v58, %v7784_v23  ;;  %v13802_v51 = vsub.f32 %v13727_v20, %v7784_v23  ;;  %v13805_v5 = vsub.f32 %v13740_v26, %v7784_v23  ;;  %v13808_v45 = vsub.f32 %v13737_v24, %v7784_v23 }
 0x6ef   : > { %v13811_v36 = vsub.f32 %v13750_v8, %v7784_v23  ;;  %v13814_v7 = vsub.f32 %v13747_v46, %v7784_v23  ;;  %v13817_v0 = vsub.f32 %v13760_v32, %v7784_v23  ;;  %v13820_v58 = vsub.f32 %v13757_v55, %v7784_v23 }
 0x6f0   : > { %v13822_v20 = vsub.f32 %v7705_v63, %v7784_v23  ;;  %v13824_v60 = vsub.f32 %v7706_v6, %v7784_v23  ;;  %v13826_v26 = vsub.f32 %v7707_v40, %v7784_v23  ;;  %v13828_v24 = vsub.f32 %v7708_v18, %v7784_v23 }
 0x6f1   : > { %v13830_v17 = vsub.f32 %v7709_v47, %v7784_v23  ;;  %v13832_v8 = vsub.f32 %v7710_v59, %v7784_v23  ;;  %v13834_v46 = vsub.f32 %v7711_v35, %v7784_v23  ;;  %v13836_v61 = vsub.f32 %v7712_v12, %v7784_v23 }
 0x6f2   : > { %v13838_v32 = vsub.f32 %v7713_v54, %v7784_v23  ;;  %v13840_v55 = vsub.f32 %v7714_v41, %v7784_v23  ;;  %v13843_v63 = vsub.f32 %v13660_v15, %v7784_v23  ;;  %v13846_v6 = vsub.f32 %v13657_v14, %v7784_v23 }
 0x6f3   : > { %v13849_v18 = vsub.f32 %v13670_v2, %v7784_v23  ;;  %v13852_v40 = vsub.f32 %v13667_v33, %v7784_v23  ;;  %v13859_v3 = vsub.f32 %v13680_v30, %v7784_v23  ;;  %v13864_v14 = vsub.f32 %v13677_v42, %v7784_v23 }
 0x6f4   : > { %v7817_v59 = vmul.f32 %v13843_v63, %v13843_v63  ;;  %v7818_v47 = vmul.f32 %v13846_v6, %v13846_v6  ;;  %v13871_v29 = vsub.f32 %v13690_v25, %v7784_v23  ;;  %v13877_v42 = vsub.f32 %v13687_v21, %v7784_v23 }
 0x6f5   : > { %v7819_v15 = vmul.f32 %v13849_v18, %v13849_v18  ;;  %v7820_v2 = vmul.f32 %v13852_v40, %v13852_v40  ;;  %v7821_v30 = vmul.f32 %v13859_v3, %v13859_v3  ;;  %v7822_v11 = vmul.f32 %v13864_v14, %v13864_v14 }
 0x6f6   : > { %v7849_v33 = vsel %vm256_vm0, %v7817_v59, 0.0  ;;  %v7850_v57 = vsel %vm256_vm0, %v7818_v47, 0.0  ;;  %v13883_v28 = vsub.f32 %v13700_v39, %v7784_v23  ;;  %v7823_v25 = vmul.f32 %v13871_v29, %v13871_v29 }
 0x6f7   : > { %v7851_v16 = vadd.f32 %v7850_v57, %v7849_v33  ;;  %v7852_v12 = vsel %vm256_vm0, %v7819_v15, 0.0  ;;  %v7854_v49 = vsel %vm256_vm0, %v7820_v2, 0.0  ;;  %v7856_v56 = vsel %vm256_vm0, %v7821_v30, 0.0 }
 0x6f8   : > { %v13889_v41 = vsub.f32 %v13697_v31, %v7784_v23  ;;  %v7824_v21 = vmul.f32 %v13877_v42, %v13877_v42  ;;  %v7858_v54 = vsel %vm256_vm0, %v7822_v11, 0.0  ;;  %v7825_v37 = vmul.f32 %v13883_v28, %v13883_v28 }
 0x6f9   : > { %v7853_v35 = vadd.f32 %v7852_v12, %v7851_v16  ;;  %v7860_v39 = vsel %vm256_vm0, %v7823_v25, 0.0  ;;  %v7827_v31 = vmul.f32 %v13787_v34, %v13787_v34  ;;  %v7828_v4 = vmul.f32 %v13790_v44, %v13790_v44 }
 0x6fa   : > { %v7826_v13 = vmul.f32 %v13889_v41, %v13889_v41  ;;  %v7862_v27 = vsel %vm256_vm0, %v7824_v21, 0.0  ;;  %v7864_v1 = vsel %vm256_vm0, %v7825_v37, 0.0  ;;  %v7829_v23 = vmul.f32 %v13793_v38, %v13793_v38 }
 0x6fb   : > { %v7855_v43 = vadd.f32 %v7854_v49, %v7853_v35  ;;  %v7868_v59 = vsel %vm256_vm0, %v7827_v31, 0.0  ;;  %v7830_v15 = vmul.f32 %v13796_v10, %v13796_v10  ;;  %v7870_v2 = vsel %vm256_vm0, %v7828_v4, 0.0 }
 0x6fc   : > { %v7866_v53 = vsel %vm256_vm0, %v7826_v13, 0.0  ;;  %v7831_v57 = vmul.f32 %v13799_v50, %v13799_v50  ;;  %v7872_v16 = vsel %vm256_vm0, %v7829_v23, 0.0  ;;  %v7832_v12 = vmul.f32 %v13802_v51, %v13802_v51 }
 0x6fd   : > { %v7857_v52 = vadd.f32 %v7856_v56, %v7855_v43  ;;  %v7874_v35 = vsel %vm256_vm0, %v7830_v15, 0.0  ;;  %v7833_v49 = vmul.f32 %v13805_v5, %v13805_v5  ;;  %v7834_v56 = vmul.f32 %v13808_v45, %v13808_v45 }
 0x6fe   : > { %v7876_v43 = vsel %vm256_vm0, %v7831_v57, 0.0 }
 0x6ff   : > { %v7859_v22 = vadd.f32 %v7858_v54, %v7857_v52  ;;  %v7878_v52 = vsel %vm256_vm0, %v7832_v12, 0.0  ;;  %v7835_v54 = vmul.f32 %v13811_v36, %v13811_v36 }
 0x701   : > { %v7861_v48 = vadd.f32 %v7860_v39, %v7859_v22  ;;  %v7880_v22 = vsel %vm256_vm0, %v7833_v49, 0.0  ;;  %v7836_v39 = vmul.f32 %v13814_v7, %v13814_v7 }
 0x703   : > { %v7863_v9 = vadd.f32 %v7862_v27, %v7861_v48  ;;  %v7882_v48 = vsel %vm256_vm0, %v7834_v56, 0.0  ;;  %v7837_v27 = vmul.f32 %v13817_v0, %v13817_v0 }
 0x705   : > { %v7865_v62 = vadd.f32 %v7864_v1, %v7863_v9  ;;  %v7884_v9 = vsel %vm256_vm0, %v7835_v54, 0.0  ;;  %v7838_v1 = vmul.f32 %v13820_v58, %v13820_v58 }
 0x707   : > { %v7867_v19 = vadd.f32 %v7866_v53, %v7865_v62  ;;  %v7886_v62 = vsel %vm256_vm0, %v7836_v39, 0.0  ;;  %v7839_v53 = vmul.f32 %v13822_v20, %v13822_v20 }
 0x709   : > { %v7869_v47 = vadd.f32 %v7868_v59, %v7867_v19  ;;  %v7888_v19 = vsel %vm256_vm0, %v7837_v27, 0.0  ;;  %v7840_v59 = vmul.f32 %v13824_v60, %v13824_v60 }
 0x70b   : > { %v7871_v33 = vadd.f32 %v7870_v2, %v7869_v47  ;;  %v7890_v47 = vsel %vm256_vm0, %v7838_v1, 0.0  ;;  %v7841_v2 = vmul.f32 %v13826_v26, %v13826_v26 }
 0x70d   : > { %v7873_v30 = vadd.f32 %v7872_v16, %v7871_v33  ;;  %v7892_v33 = vsel %vm256_vm0, %v7839_v53, 0.0  ;;  %v7842_v16 = vmul.f32 %v13828_v24, %v13828_v24 }
 0x70f   : > { %v7875_v11 = vadd.f32 %v7874_v35, %v7873_v30  ;;  %v7894_v30 = vsel %vm256_vm0, %v7840_v59, 0.0  ;;  %v7843_v35 = vmul.f32 %v13830_v17, %v13830_v17 }
 0x711   : > { %v7877_v25 = vadd.f32 %v7876_v43, %v7875_v11  ;;  %v7896_v11 = vsel %vm256_vm0, %v7841_v2, 0.0  ;;  %v7844_v43 = vmul.f32 %v13832_v8, %v13832_v8 }
 0x713   : > { %v7879_v21 = vadd.f32 %v7878_v52, %v7877_v25  ;;  %v7898_v25 = vsel %vm256_vm0, %v7842_v16, 0.0  ;;  %v7845_v52 = vmul.f32 %v13834_v46, %v13834_v46 }
 0x715   : > { %v7881_v37 = vadd.f32 %v7880_v22, %v7879_v21  ;;  %v7900_v21 = vsel %vm256_vm0, %v7843_v35, 0.0  ;;  %v7846_v22 = vmul.f32 %v13836_v61, %v13836_v61 }
 0x717   : > { %v7883_v13 = vadd.f32 %v7882_v48, %v7881_v37  ;;  %v7902_v37 = vsel %vm256_vm0, %v7844_v43, 0.0  ;;  %v7847_v48 = vmul.f32 %v13838_v32, %v13838_v32 }
 0x719   : > { %v7885_v31 = vadd.f32 %v7884_v9, %v7883_v13  ;;  %v7904_v13 = vsel %vm256_vm0, %v7845_v52, 0.0  ;;  %v7848_v9 = vmul.f32 %v13840_v55, %v13840_v55 }
 0x71b   : > { %v7887_v4 = vadd.f32 %v7886_v62, %v7885_v31  ;;  %v7906_v31 = vsel %vm256_vm0, %v7846_v22, 0.0  ;;  %v7908_v62 = vsel %vm256_vm0, %v7847_v48, 0.0  ;;  %v7910_v53 = vsel %vm256_vm0, %v7848_v9, 0.0  ;;  %v14503_v9 = vld [vmem:[#allocation12_spill] sm:$0xff] }
 0x71d   : > { %v7889_v23 = vadd.f32 %v7888_v19, %v7887_v4 }
 0x71f   : > { %v7891_v15 = vadd.f32 %v7890_v47, %v7889_v23 }
 0x721   : > { %v7893_v57 = vadd.f32 %v7892_v33, %v7891_v15 }
 0x723   : > { %v7895_v12 = vadd.f32 %v7894_v30, %v7893_v57 }
 0x725   : > { %v7897_v49 = vadd.f32 %v7896_v11, %v7895_v12 }
 0x727   : > { %v7899_v56 = vadd.f32 %v7898_v25, %v7897_v49 }
 0x729   : > { %v7901_v54 = vadd.f32 %v7900_v21, %v7899_v56  ;;  %v14496_v21 = vld [vmem:[#allocation42_spill] sm:$0xff] }
 0x72b   : > { %v7903_v39 = vadd.f32 %v7902_v37, %v7901_v54 }
 0x72d   : > { %v7905_v27 = vadd.f32 %v7904_v13, %v7903_v39  ;;  %v14501_v13 = vld [vmem:[#allocation10_spill] sm:$0xff] }
 0x72f   : > { %v7907_v1 = vadd.f32 %v7906_v31, %v7905_v27  ;;  %v14502_v27 = vld [vmem:[#allocation11_spill] sm:$0xff]  ;;  %v14504_v31 = vld [vmem:[#allocation13_spill] sm:$0xff] }
 0x731   : > { %v7909_v4 = vadd.f32 %v7908_v62, %v7907_v1  ;;  %v14505_v1 = vld [vmem:[#allocation14_spill] sm:$0xff] }
 0x733   : > { %v7911_v19 = vadd.f32 %v7910_v53, %v7909_v4  ;;  %v14506_v4 = vld [vmem:[#allocation15_spill] sm:$0xff] }
 0x735   : > { %v7912_v23 = vrot.slane %v7911_v19, 4 }
 0x737   : > { %v7913_v59 = vadd.f32 %v7912_v23, %v7911_v19  ;;  %v14507_v19 = vld [vmem:[#allocation16_spill] sm:$0xff] }
 0x739   : > { %v7914_v47 = vrot.slane %v7913_v59, 2 }
 0x73b   : > { %v7915_v15 = vadd.f32 %v7914_v47, %v7913_v59  ;;  %v14508_v59 = vld [vmem:[#allocation17_spill] sm:$0xff] }
 0x73d   : > { %v7916_v2 = vrot.slane %v7915_v15, 1 }
 0x73f   : > { %v7917_v33 = vadd.f32 %v7916_v2, %v7915_v15  ;;  %v14509_v15 = vld [vmem:[#allocation18_spill] sm:$0xff] }
 0x741   : > { %v7918_v57 = vmul.f32 0.00390625, %v7917_v33  ;;  %v14510_v33 = vld [vmem:[#allocation19_spill] sm:$0xff] }
 0x743   : > { %v7919_v16 = vadd.f32 1e-05, %v7918_v57 }
 0x745   : > { %11104 = vrsqrt.f32 %v7919_v16  ;;  %v14511_v16 = vld [vmem:[#allocation20_spill] sm:$0xff] }
 0x74f   : > { %v11105_v30 = vpop.eup %11104 }
 0x750   : > { %v7951_v12 = vmul.f32 %v11105_v30, %v13838_v32  ;;  %v7921_v35 = vmul.f32 %v11105_v30, %v13843_v63  ;;  %v7922_v11 = vmul.f32 %v11105_v30, %v13846_v6  ;;  %v7923_v49 = vmul.f32 %v11105_v30, %v13849_v18 }
 0x751   : > { %v7924_v43 = vmul.f32 %v11105_v30, %v13852_v40  ;;  %v7925_v25 = vmul.f32 %v11105_v30, %v13859_v3  ;;  %v7926_v56 = vmul.f32 %v11105_v30, %v13864_v14  ;;  %v7927_v52 = vmul.f32 %v11105_v30, %v13871_v29 }
 0x752   : > { %v7983_v54 = vadd.f32 %v7951_v12, %v14496_v21  ;;  %v7928_v22 = vmul.f32 %v11105_v30, %v13877_v42  ;;  %v7929_v32 = vmul.f32 %v11105_v30, %v13883_v28  ;;  %v7930_v63 = vmul.f32 %v11105_v30, %v13889_v41  ;;  %v14512_v12 = vld [vmem:[#allocation21_spill] sm:$0xff] }
 0x753   : > { %v7931_v6 = vmul.f32 %v11105_v30, %v13787_v34  ;;  %v7932_v18 = vmul.f32 %v11105_v30, %v13790_v44  ;;  %v7933_v40 = vmul.f32 %v11105_v30, %v13793_v38  ;;  %v7934_v3 = vmul.f32 %v11105_v30, %v13796_v10  ;;  %v14516_v21 = vld [vmem:[#allocation25_spill] sm:$0xff] }
 0x754   : > { %8015 = vst.msk [vmem:[%s13987_s16 + $0xf0] sm:$0xff] %vm256_vm0, %v7983_v54  ;;  %v7935_v14 = vmul.f32 %v11105_v30, %v13799_v50  ;;  %v7936_v29 = vmul.f32 %v11105_v30, %v13802_v51  ;;  %v7937_v42 = vmul.f32 %v11105_v30, %v13805_v5  ;;  %v7938_v28 = vmul.f32 %v11105_v30, %v13808_v45 }
 0x755   : > { %v7939_v34 = vmul.f32 %v11105_v30, %v13811_v36  ;;  %v7940_v44 = vmul.f32 %v11105_v30, %v13814_v7  ;;  %v7941_v38 = vmul.f32 %v11105_v30, %v13817_v0  ;;  %v7942_v10 = vmul.f32 %v11105_v30, %v13820_v58  ;;  %v14497_v58 = vld [vmem:[#allocation8_spill] sm:$0xff] }
 0x756   : > { %v7943_v41 = vmul.f32 %v11105_v30, %v13822_v20  ;;  %v7944_v37 = vmul.f32 %v11105_v30, %v13824_v60  ;;  %v7945_v50 = vmul.f32 %v11105_v30, %v13826_v26  ;;  %v7946_v51 = vmul.f32 %v11105_v30, %v13828_v24  ;;  %v14498_v60 = vld [vmem:[#allocation9_spill] sm:$0xff]  ;;  %v14499_v26 = vld [vmem:[#allocation6_spill] sm:$0xff]  ;;  %v14500_v24 = vld [vmem:[#allocation7_spill] sm:$0xff] }
 0x757   : > { %v7947_v5 = vmul.f32 %v11105_v30, %v13830_v17  ;;  %v7948_v45 = vmul.f32 %v11105_v30, %v13832_v8  ;;  %v7949_v36 = vmul.f32 %v11105_v30, %v13834_v46  ;;  %v7950_v7 = vmul.f32 %v11105_v30, %v13836_v61 }
 0x758   : > { %v7952_v0 = vmul.f32 %v11105_v30, %v13840_v55  ;;  %v7953_v20 = vadd.f32 %v7921_v35, %v14497_v58  ;;  %v7954_v39 = vadd.f32 %v7922_v11, %v14498_v60  ;;  %v7955_v48 = vadd.f32 %v7923_v49, %v14499_v26  ;;  %v14513_v11 = vld [vmem:[#allocation22_spill] sm:$0xff]  ;;  %v14527_v58 = vld [vmem:[#allocation43_spill] sm:$0xff] }
 0x759   : > { %v7956_v17 = vadd.f32 %v7924_v43, %v14500_v24  ;;  %v7957_v8 = vadd.f32 %v7925_v25, %v14501_v13  ;;  %v7958_v46 = vadd.f32 %v7926_v56, %v14502_v27  ;;  %v7959_v61 = vadd.f32 %v7927_v52, %v14503_v9  ;;  %v14514_v43 = vld [vmem:[#allocation23_spill] sm:$0xff]  ;;  %v14515_v56 = vld [vmem:[#allocation24_spill] sm:$0xff] }
 0x75a   : > { %v7960_v55 = vadd.f32 %v7928_v22, %v14504_v31  ;;  %v7961_v62 = vadd.f32 %v7929_v32, %v14505_v1  ;;  %v7962_v53 = vadd.f32 %v7930_v63, %v14506_v4  ;;  %v7963_v23 = vadd.f32 %v7931_v6, %v14507_v19  ;;  %7985 = vst.msk [vmem:[%s13987_s16] sm:$0xff] %vm256_vm0, %v7953_v20  ;;  %v14517_v22 = vld [vmem:[#allocation26_spill] sm:$0xff]  ;;  %v14518_v63 = vld [vmem:[#allocation27_spill] sm:$0xff] }
 0x75b   : > { %7986 = vst.msk [vmem:[%s13987_s16 + $0x8] sm:$0xff] %vm256_vm0, %v7954_v39  ;;  %7987 = vst.msk [vmem:[%s13987_s16 + $0x10] sm:$0xff] %vm256_vm0, %v7955_v48  ;;  %v7964_v47 = vadd.f32 %v7932_v18, %v14508_v59  ;;  %v7965_v2 = vadd.f32 %v7933_v40, %v14509_v15  ;;  %v7966_v57 = vadd.f32 %v7934_v3, %v14510_v33  ;;  %v14519_v18 = vld [vmem:[#allocation28_spill] sm:$0xff]  ;;  %v14520_v3 = vld [vmem:[#allocation29_spill] sm:$0xff] }
 0x75c   : > { %v7967_v30 = vadd.f32 %v7935_v14, %v14511_v16  ;;  %7988 = vst.msk [vmem:[%s13987_s16 + $0x18] sm:$0xff] %vm256_vm0, %v7956_v17  ;;  %7989 = vst.msk [vmem:[%s13987_s16 + $0x20] sm:$0xff] %vm256_vm0, %v7957_v8  ;;  %v7968_v35 = vadd.f32 %v7936_v29, %v14512_v12  ;;  %v7969_v49 = vadd.f32 %v7937_v42, %v14513_v11  ;;  %v14521_v29 = vld [vmem:[#allocation30_spill] sm:$0xff] }
 0x75d   : > { %7990 = vst.msk [vmem:[%s13987_s16 + $0x28] sm:$0xff] %vm256_vm0, %v7958_v46  ;;  %7991 = vst.msk [vmem:[%s13987_s16 + $0x30] sm:$0xff] %vm256_vm0, %v7959_v61  ;;  %v7970_v25 = vadd.f32 %v7938_v28, %v14514_v43  ;;  %v7971_v52 = vadd.f32 %v7939_v34, %v14515_v56  ;;  %v7972_v54 = vadd.f32 %v7940_v44, %v14516_v21  ;;  %v14522_v28 = vld [vmem:[#allocation31_spill] sm:$0xff]  ;;  %v14523_v44 = vld [vmem:[#allocation32_spill] sm:$0xff] }
 0x75e   : > { %7992 = vst.msk [vmem:[%s13987_s16 + $0x38] sm:$0xff] %vm256_vm0, %v7960_v55  ;;  %7993 = vst.msk [vmem:[%s13987_s16 + $0x40] sm:$0xff] %vm256_vm0, %v7961_v62  ;;  %v7973_v32 = vadd.f32 %v7941_v38, %v14517_v22  ;;  %v7974_v6 = vadd.f32 %v7942_v10, %v14518_v63  ;;  %v7975_v40 = vadd.f32 %v7943_v41, %v14519_v18  ;;  %v14524_v10 = vld [vmem:[#allocation33_spill] sm:$0xff] }
 0x75f   : > { %7994 = vst.msk [vmem:[%s13987_s16 + $0x48] sm:$0xff] %vm256_vm0, %v7962_v53  ;;  %7995 = vst.msk [vmem:[%s13987_s16 + $0x50] sm:$0xff] %vm256_vm0, %v7963_v23  ;;  %v7976_v14 = vadd.f32 %v7944_v37, %v14520_v3  ;;  %v7977_v42 = vadd.f32 %v7945_v50, %v14521_v29  ;;  %v7978_v34 = vadd.f32 %v7946_v51, %v14522_v28  ;;  %v14525_v37 = vld [vmem:[#allocation34_spill] sm:$0xff]  ;;  %v14526_v51 = vld [vmem:[#allocation35_spill] sm:$0xff] }
 0x760   : > { %7996 = vst.msk [vmem:[%s13987_s16 + $0x58] sm:$0xff] %vm256_vm0, %v7964_v47  ;;  %7997 = vst.msk [vmem:[%s13987_s16 + $0x60] sm:$0xff] %vm256_vm0, %v7965_v2  ;;  %v7979_v38 = vadd.f32 %v7947_v5, %v14523_v44  ;;  %v7980_v41 = vadd.f32 %v7948_v45, %v14524_v10  ;;  %v7981_v50 = vadd.f32 %v7949_v36, %v14525_v37 }
 0x761   : > { %7998 = vst.msk [vmem:[%s13987_s16 + $0x68] sm:$0xff] %vm256_vm0, %v7966_v57  ;;  %7999 = vst.msk [vmem:[%s13987_s16 + $0x70] sm:$0xff] %vm256_vm0, %v7967_v30  ;;  %v7982_v5 = vadd.f32 %v7950_v7, %v14526_v51  ;;  %v7984_v20 = vadd.f32 %v7952_v0, %v14527_v58 }
 0x762   : > { %8000 = vst.msk [vmem:[%s13987_s16 + $0x78] sm:$0xff] %vm256_vm0, %v7968_v35  ;;  %8001 = vst.msk [vmem:[%s13987_s16 + $0x80] sm:$0xff] %vm256_vm0, %v7969_v49 }
 0x763   : > { %8002 = vst.msk [vmem:[%s13987_s16 + $0x88] sm:$0xff] %vm256_vm0, %v7970_v25  ;;  %8003 = vst.msk [vmem:[%s13987_s16 + $0x90] sm:$0xff] %vm256_vm0, %v7971_v52 }
 0x764   : > { %8004 = vst.msk [vmem:[%s13987_s16 + $0x98] sm:$0xff] %vm256_vm0, %v7972_v54  ;;  %8005 = vst.msk [vmem:[%s13987_s16 + $0xa0] sm:$0xff] %vm256_vm0, %v7973_v32 }
 0x765   : > { %8006 = vst.msk [vmem:[%s13987_s16 + $0xa8] sm:$0xff] %vm256_vm0, %v7974_v6  ;;  %8007 = vst.msk [vmem:[%s13987_s16 + $0xb0] sm:$0xff] %vm256_vm0, %v7975_v40 }
 0x766   : > { %8008 = vst.msk [vmem:[%s13987_s16 + $0xb8] sm:$0xff] %vm256_vm0, %v7976_v14  ;;  %8009 = vst.msk [vmem:[%s13987_s16 + $0xc0] sm:$0xff] %vm256_vm0, %v7977_v42 }
 0x767   : > { %8010 = vst.msk [vmem:[%s13987_s16 + $0xc8] sm:$0xff] %vm256_vm0, %v7978_v34  ;;  %8011 = vst.msk [vmem:[%s13987_s16 + $0xd0] sm:$0xff] %vm256_vm0, %v7979_v38 }
 0x768   : > { %8012 = vst.msk [vmem:[%s13987_s16 + $0xd8] sm:$0xff] %vm256_vm0, %v7980_v41  ;;  %8013 = vst.msk [vmem:[%s13987_s16 + $0xe0] sm:$0xff] %vm256_vm0, %v7981_v50 }
 0x769   : > { %8014 = vst.msk [vmem:[%s13987_s16 + $0xe8] sm:$0xff] %vm256_vm0, %v7982_v5  ;;  %8016 = vst.msk [vmem:[%s13987_s16 + $0xf8] sm:$0xff] %vm256_vm0, %v7984_v20 }
 0x76a   : > { %11119 = shalt.err (!%p11116_p3)
}
 0x76b   : > { %s11120_s10 = scalar_lea.hbm %s14078_s26, 4096  ;;  %s11124_s13 = scalar_lea.hbm %s14158_s5, 8192 }
 0x76c   : > { %p11121_p4 = scmp.ne.s32.totalorder %s14078_s26, %s11120_s10  ;;  %p11125_p9 = scmp.lt.u32.totalorder %s14078_s26, %s14158_s5 }
 0x76d   : > { %p11126_p10 = scmp.lt.u32.totalorder %s11124_s13, %s11120_s10  ;;  %p11128_p12 = scmp.lt.u32.totalorder %s11120_s10, %s14078_s26 }
 0x76e   : > { %p11122_p7 = pnand %p11121_p4, %p11241_p5 }
 0x76f   : > { %p11127_p11 = por %p11126_p10, %p11125_p9 }
 0x770   : > { %p11123_p8 = pneg %p11122_p7 }
 0x771   : > { %p11129_p13 = por %p11128_p12, %p11127_p11 }
 0x773   : > { %p11130_p0 = pnand %p11129_p13, %p11123_p8 }
 0x775   : > { %11133 = shalt.err (!%p11130_p0)
}
 0x776   : > { %s11171_s16 = smov 128   ;;  %s11172_s17 = smov 8  }
 0x777   : > { %11061 = dma.vmem_to_hbm [thread:$0]  (%p11241_p5), %s14080_s23, 4096, %s14078_s26, %s14112_s6, %s11171_s16, %s11171_s16, %s11172_s17  }
 0x778 PF: > { %p11067_p1 = scmp.ge.s32.totalorder %s11168_s21, 2  ;;  %s8046_s22 = sand.u32 1, %s11156_s18  }
 0x779   : > { %s8047_s25 = scalar_lea.sflag [#allocation4], %s8046_s22 }
 0x77a   : > { %p11064_p2 = pnand %p11067_p1, %p11245_p6 }
 0x77c   : > { %11151 = dma.done.wait (!%p11064_p2), %s8047_s25, 4096  }
 0x77d   : > { %11153 = vsyncadd (!%p11064_p2), %s8047_s25, 4294963200  ;;  %p15_p3 = scmp.ge.s32.totalorder %s11228_s24, 4   ;;  %s14528_s18 = smov %s11160_s19 }
 0x77e   : > { %s14529_s19 = smov %s11164_s20  ;;  %s14530_s20 = smov %s11239_s27 }
 0x77f   : > { %s14531_s21 = smov %s11228_s24  ;;  %17 = sbr.rel (!%p15_p3) target bundleno = 3 (0x3), region = 94 }
 0x786   :  { %8052 = vsyncpa [#allocation4], 1 }
 0x787   :  { %8054 = vsyncpa [#allocation4 + $0x1], 1 }

</bundles_post_ra>
